<compile_context>
chip_gen: v5e
topology: v5e:2x2
jax: 0.10.0
libtpu: 0.0.40
codegen_flags: <defaults>
</compile_context>

<pallas_src>
import jax
import jax.numpy as jnp
from jax import lax
from jax.experimental import pallas as pl
from jax.experimental.pallas import tpu as pltpu

B = 2              # batch
C_IN = 3           # input channels (fixed by the module)
H = W = 32         # spatial (fixed: fc expects num_feature_maps*32*32)
F_MAPS = 16        # num_feature_maps
KS = 3             # kernel_size
PAD = KS // 2
NUM_CLASSES = 10
STD_DEV = 0.01
K_TAPS = C_IN * KS * KS        # 27 taps per output feature map
K_PAD = 32                     # taps zero-padded to 32 for a clean MXU contraction dim
HW = H * W                     # 1024 -> lane dimension


def fused_elm_kernel(taps_ref, wconv_ref, wfc_ref, bias_ref, o_ref):
    """Single invocation; processes the whole (tiny) batch.

    taps_ref : VMEM (B, 32, 1024)    im2col tap stack, [b, c*9+kh*3+kw, h*32+w]
    wconv_ref: VMEM (16, 32)         conv weight, [f, c*9+kh*3+kw] (zero-padded 27->32)
    wfc_ref  : VMEM (10, 16, 1024)   fc weight, [j, f, h*32+w]
    bias_ref : VMEM (1, 10)
    o_ref    : VMEM (B, 10)          class probabilities
    """
    wconv = wconv_ref[...]                                            # (16, 32)
    lane_ids = lax.broadcasted_iota(jnp.int32, (1, NUM_CLASSES), 1)   # (1, 10)

    for b in range(B):
        # ---- fixed conv (3x3, pad=1, no bias) + ReLU: one MXU matmul ------------
        feats = jnp.dot(wconv, taps_ref[b],
                        preferred_element_type=jnp.float32)           # (16, 1024)
        feats = jnp.maximum(feats, 0.0)

        # ---- trainable FC (10 classes): lane-dense VPU multiply + reduce --------
        logits = bias_ref[...]                                        # (1, 10)
        for j in range(NUM_CLASSES):
            prod = feats * wfc_ref[j]                                 # (16, 1024) dense
            colsum = jnp.sum(prod, axis=0, keepdims=True)             # (1, 1024)
            s = jnp.sum(colsum, axis=1, keepdims=True)                # (1, 1)
            logits = logits + jnp.where(lane_ids == j, s, 0.0)

        # ---- numerically-stable softmax ------------------------------------------
        m = jnp.max(logits, axis=1, keepdims=True)
        e = jnp.exp(logits - m)
        o_ref[pl.ds(b, 1), :] = e / jnp.sum(e, axis=1, keepdims=True)


@jax.jit
def elm_forward(x, w_conv, w_fc, b_fc):
    # Wrapper-side im2col: 27 shifted views, spatial flattened into lanes.
    x_pad = jnp.pad(x, ((0, 0), (0, 0), (PAD, PAD), (PAD, PAD)))      # (B, 3, 34, 34)
    taps = jnp.stack(
        [x_pad[:, c, kh:kh + H, kw:kw + W].reshape(B, HW)
         for c in range(C_IN) for kh in range(KS) for kw in range(KS)],
        axis=1)                                                       # (B, 27, 1024)
    taps = jnp.pad(taps, ((0, 0), (0, K_PAD - K_TAPS), (0, 0)))       # (B, 32, 1024)

    wconv_mat = jnp.pad(w_conv.reshape(F_MAPS, K_TAPS),
                        ((0, 0), (0, K_PAD - K_TAPS)))                # (16, 32)
    wfc_packed = w_fc.reshape(NUM_CLASSES, F_MAPS, HW)                # (10, 16, 1024), free
    bias_row = b_fc.reshape(1, NUM_CLASSES)                           # (1, 10)

    return pl.pallas_call(
        fused_elm_kernel,
        out_shape=jax.ShapeDtypeStruct((B, NUM_CLASSES), jnp.float32),
        in_specs=[pl.BlockSpec(memory_space=pltpu.MemorySpace.VMEM)
                  for _ in range(4)],
        out_specs=pl.BlockSpec(memory_space=pltpu.MemorySpace.VMEM),
    )(taps, wconv_mat, wfc_packed, bias_row)


if __name__ == "__main__":
    key = jax.random.PRNGKey(0)
    kx, kc, kw, kb = jax.random.split(key, 4)

    # deterministic parameter init (shapes from the module's __init__)
    x = jax.random.normal(kx, (B, C_IN, H, W), jnp.float32)
    w_conv = STD_DEV * jax.random.normal(kc, (F_MAPS, C_IN, KS, KS), jnp.float32)
    fan_in = F_MAPS * H * W
    bound = 1.0 / float(jnp.sqrt(fan_in))
    w_fc = jax.random.uniform(kw, (NUM_CLASSES, fan_in), jnp.float32, -bound, bound)
    b_fc = jax.random.uniform(kb, (NUM_CLASSES,), jnp.float32, -bound, bound)

    probs = jax.block_until_ready(elm_forward(x, w_conv, w_fc, b_fc))

    # pure-JAX reference for correctness
    ref_conv = lax.conv_general_dilated(
        x, w_conv, window_strides=(1, 1), padding=((PAD, PAD), (PAD, PAD)),
        dimension_numbers=("NCHW", "OIHW", "NCHW"))
    ref_feat = jnp.maximum(ref_conv, 0.0).reshape(B, -1)
    ref_logits = ref_feat @ w_fc.T + b_fc
    ref_probs = jax.nn.softmax(ref_logits, axis=1)

    assert probs.shape == (B, NUM_CLASSES)
    assert jnp.allclose(probs, ref_probs, atol=1e-4, rtol=1e-3), (
        float(jnp.max(jnp.abs(probs - ref_probs))))

    print("KERNEL_OK")
</pallas_src>

<mosaic_0001>
module attributes {stable_mosaic.version = 11 : i64} {
  func.func @fused_elm_kernel(%arg0: memref<2x32x1024xf32, #tpu.memory_space<vmem>>, %arg1: memref<16x32xf32, #tpu.memory_space<vmem>>, %arg2: memref<10x16x1024xf32, #tpu.memory_space<vmem>>, %arg3: memref<1x10xf32, #tpu.memory_space<vmem>>, %arg4: memref<2x10xf32, #tpu.memory_space<vmem>>) attributes {dimension_semantics = [], scalar_prefetch = 0 : i64, scratch_operands = 0 : i64, tpu.core_type = #tpu.core_type<tc>} {
    %c0 = arith.constant 0 : index
    %c0_0 = arith.constant 0 : index
    %0 = vector.load %arg1[%c0, %c0_0] : memref<16x32xf32, #tpu.memory_space<vmem>>, vector<16x32xf32>
    %1 = tpu.iota {dimensions = array<i32: 1>} : vector<1x10xi32>
    %c0_1 = arith.constant 0 : index
    %c0_2 = arith.constant 0 : index
    %c0_3 = arith.constant 0 : index
    %2 = vector.load %arg0[%c0_1, %c0_2, %c0_3] : memref<2x32x1024xf32, #tpu.memory_space<vmem>>, vector<1x32x1024xf32>
    %3 = vector.shape_cast %2 : vector<1x32x1024xf32> to vector<32x1024xf32>
    %cst = arith.constant dense<0.000000e+00> : vector<16x1024xf32>
    %4 = tpu.matmul %0, %3, %cst {dimension_numbers = #tpu.dot_dimension_numbers<[1], [0], [0], [1], [0, 0, 1, 1], [], []>} : vector<16x32xf32>, vector<32x1024xf32>, vector<16x1024xf32> -> vector<16x1024xf32>
    %cst_4 = arith.constant 0.000000e+00 : f32
    %5 = vector.broadcast %cst_4 : f32 to vector<16x1024xf32>
    %6 = arith.maximumf %4, %5 : vector<16x1024xf32>
    %c0_5 = arith.constant 0 : index
    %c0_6 = arith.constant 0 : index
    %7 = vector.load %arg3[%c0_5, %c0_6] : memref<1x10xf32, #tpu.memory_space<vmem>>, vector<1x10xf32>
    %c0_7 = arith.constant 0 : index
    %c0_8 = arith.constant 0 : index
    %c0_9 = arith.constant 0 : index
    %8 = vector.load %arg2[%c0_7, %c0_8, %c0_9] : memref<10x16x1024xf32, #tpu.memory_space<vmem>>, vector<1x16x1024xf32>
    %9 = vector.shape_cast %8 : vector<1x16x1024xf32> to vector<16x1024xf32>
    %10 = arith.mulf %6, %9 : vector<16x1024xf32>
    %cst_10 = arith.constant dense<0.000000e+00> : vector<1024xf32>
    %11 = vector.multi_reduction <add>, %10, %cst_10 [0] : vector<16x1024xf32> to vector<1024xf32>
    %12 = vector.shape_cast %11 : vector<1024xf32> to vector<1x1024xf32>
    %cst_11 = arith.constant dense<0.000000e+00> : vector<1xf32>
    %13 = vector.multi_reduction <add>, %12, %cst_11 [1] : vector<1x1024xf32> to vector<1xf32>
    %14 = vector.shape_cast %13 : vector<1xf32> to vector<1x1xf32>
    %c0_i32 = arith.constant 0 : i32
    %15 = vector.broadcast %c0_i32 : i32 to vector<1x10xi32>
    %16 = arith.cmpi eq, %1, %15 : vector<1x10xi32>
    %cst_12 = arith.constant 0.000000e+00 : f32
    %17 = vector.shape_cast %14 : vector<1x1xf32> to vector<1x1xf32>
    %18 = vector.broadcast %17 : vector<1x1xf32> to vector<1x10xf32>
    %19 = vector.broadcast %cst_12 : f32 to vector<1x10xf32>
    %20 = arith.select %16, %18, %19 : vector<1x10xi1>, vector<1x10xf32>
    %21 = arith.addf %7, %20 : vector<1x10xf32>
    %c1 = arith.constant 1 : index
    %c0_13 = arith.constant 0 : index
    %c0_14 = arith.constant 0 : index
    %22 = vector.load %arg2[%c1, %c0_13, %c0_14] : memref<10x16x1024xf32, #tpu.memory_space<vmem>>, vector<1x16x1024xf32>
    %23 = vector.shape_cast %22 : vector<1x16x1024xf32> to vector<16x1024xf32>
    %24 = arith.mulf %6, %23 : vector<16x1024xf32>
    %cst_15 = arith.constant dense<0.000000e+00> : vector<1024xf32>
    %25 = vector.multi_reduction <add>, %24, %cst_15 [0] : vector<16x1024xf32> to vector<1024xf32>
    %26 = vector.shape_cast %25 : vector<1024xf32> to vector<1x1024xf32>
    %cst_16 = arith.constant dense<0.000000e+00> : vector<1xf32>
    %27 = vector.multi_reduction <add>, %26, %cst_16 [1] : vector<1x1024xf32> to vector<1xf32>
    %28 = vector.shape_cast %27 : vector<1xf32> to vector<1x1xf32>
    %c1_i32 = arith.constant 1 : i32
    %29 = vector.broadcast %c1_i32 : i32 to vector<1x10xi32>
    %30 = arith.cmpi eq, %1, %29 : vector<1x10xi32>
    %cst_17 = arith.constant 0.000000e+00 : f32
    %31 = vector.shape_cast %28 : vector<1x1xf32> to vector<1x1xf32>
    %32 = vector.broadcast %31 : vector<1x1xf32> to vector<1x10xf32>
    %33 = vector.broadcast %cst_17 : f32 to vector<1x10xf32>
    %34 = arith.select %30, %32, %33 : vector<1x10xi1>, vector<1x10xf32>
    %35 = arith.addf %21, %34 : vector<1x10xf32>
    %c2 = arith.constant 2 : index
    %c0_18 = arith.constant 0 : index
    %c0_19 = arith.constant 0 : index
    %36 = vector.load %arg2[%c2, %c0_18, %c0_19] : memref<10x16x1024xf32, #tpu.memory_space<vmem>>, vector<1x16x1024xf32>
    %37 = vector.shape_cast %36 : vector<1x16x1024xf32> to vector<16x1024xf32>
    %38 = arith.mulf %6, %37 : vector<16x1024xf32>
    %cst_20 = arith.constant dense<0.000000e+00> : vector<1024xf32>
    %39 = vector.multi_reduction <add>, %38, %cst_20 [0] : vector<16x1024xf32> to vector<1024xf32>
    %40 = vector.shape_cast %39 : vector<1024xf32> to vector<1x1024xf32>
    %cst_21 = arith.constant dense<0.000000e+00> : vector<1xf32>
    %41 = vector.multi_reduction <add>, %40, %cst_21 [1] : vector<1x1024xf32> to vector<1xf32>
    %42 = vector.shape_cast %41 : vector<1xf32> to vector<1x1xf32>
    %c2_i32 = arith.constant 2 : i32
    %43 = vector.broadcast %c2_i32 : i32 to vector<1x10xi32>
    %44 = arith.cmpi eq, %1, %43 : vector<1x10xi32>
    %cst_22 = arith.constant 0.000000e+00 : f32
    %45 = vector.shape_cast %42 : vector<1x1xf32> to vector<1x1xf32>
    %46 = vector.broadcast %45 : vector<1x1xf32> to vector<1x10xf32>
    %47 = vector.broadcast %cst_22 : f32 to vector<1x10xf32>
    %48 = arith.select %44, %46, %47 : vector<1x10xi1>, vector<1x10xf32>
    %49 = arith.addf %35, %48 : vector<1x10xf32>
    %c3 = arith.constant 3 : index
    %c0_23 = arith.constant 0 : index
    %c0_24 = arith.constant 0 : index
    %50 = vector.load %arg2[%c3, %c0_23, %c0_24] : memref<10x16x1024xf32, #tpu.memory_space<vmem>>, vector<1x16x1024xf32>
    %51 = vector.shape_cast %50 : vector<1x16x1024xf32> to vector<16x1024xf32>
    %52 = arith.mulf %6, %51 : vector<16x1024xf32>
    %cst_25 = arith.constant dense<0.000000e+00> : vector<1024xf32>
    %53 = vector.multi_reduction <add>, %52, %cst_25 [0] : vector<16x1024xf32> to vector<1024xf32>
    %54 = vector.shape_cast %53 : vector<1024xf32> to vector<1x1024xf32>
    %cst_26 = arith.constant dense<0.000000e+00> : vector<1xf32>
    %55 = vector.multi_reduction <add>, %54, %cst_26 [1] : vector<1x1024xf32> to vector<1xf32>
    %56 = vector.shape_cast %55 : vector<1xf32> to vector<1x1xf32>
    %c3_i32 = arith.constant 3 : i32
    %57 = vector.broadcast %c3_i32 : i32 to vector<1x10xi32>
    %58 = arith.cmpi eq, %1, %57 : vector<1x10xi32>
    %cst_27 = arith.constant 0.000000e+00 : f32
    %59 = vector.shape_cast %56 : vector<1x1xf32> to vector<1x1xf32>
    %60 = vector.broadcast %59 : vector<1x1xf32> to vector<1x10xf32>
    %61 = vector.broadcast %cst_27 : f32 to vector<1x10xf32>
    %62 = arith.select %58, %60, %61 : vector<1x10xi1>, vector<1x10xf32>
    %63 = arith.addf %49, %62 : vector<1x10xf32>
    %c4 = arith.constant 4 : index
    %c0_28 = arith.constant 0 : index
    %c0_29 = arith.constant 0 : index
    %64 = vector.load %arg2[%c4, %c0_28, %c0_29] : memref<10x16x1024xf32, #tpu.memory_space<vmem>>, vector<1x16x1024xf32>
    %65 = vector.shape_cast %64 : vector<1x16x1024xf32> to vector<16x1024xf32>
    %66 = arith.mulf %6, %65 : vector<16x1024xf32>
    %cst_30 = arith.constant dense<0.000000e+00> : vector<1024xf32>
    %67 = vector.multi_reduction <add>, %66, %cst_30 [0] : vector<16x1024xf32> to vector<1024xf32>
    %68 = vector.shape_cast %67 : vector<1024xf32> to vector<1x1024xf32>
    %cst_31 = arith.constant dense<0.000000e+00> : vector<1xf32>
    %69 = vector.multi_reduction <add>, %68, %cst_31 [1] : vector<1x1024xf32> to vector<1xf32>
    %70 = vector.shape_cast %69 : vector<1xf32> to vector<1x1xf32>
    %c4_i32 = arith.constant 4 : i32
    %71 = vector.broadcast %c4_i32 : i32 to vector<1x10xi32>
    %72 = arith.cmpi eq, %1, %71 : vector<1x10xi32>
    %cst_32 = arith.constant 0.000000e+00 : f32
    %73 = vector.shape_cast %70 : vector<1x1xf32> to vector<1x1xf32>
    %74 = vector.broadcast %73 : vector<1x1xf32> to vector<1x10xf32>
    %75 = vector.broadcast %cst_32 : f32 to vector<1x10xf32>
    %76 = arith.select %72, %74, %75 : vector<1x10xi1>, vector<1x10xf32>
    %77 = arith.addf %63, %76 : vector<1x10xf32>
    %c5 = arith.constant 5 : index
    %c0_33 = arith.constant 0 : index
    %c0_34 = arith.constant 0 : index
    %78 = vector.load %arg2[%c5, %c0_33, %c0_34] : memref<10x16x1024xf32, #tpu.memory_space<vmem>>, vector<1x16x1024xf32>
    %79 = vector.shape_cast %78 : vector<1x16x1024xf32> to vector<16x1024xf32>
    %80 = arith.mulf %6, %79 : vector<16x1024xf32>
    %cst_35 = arith.constant dense<0.000000e+00> : vector<1024xf32>
    %81 = vector.multi_reduction <add>, %80, %cst_35 [0] : vector<16x1024xf32> to vector<1024xf32>
    %82 = vector.shape_cast %81 : vector<1024xf32> to vector<1x1024xf32>
    %cst_36 = arith.constant dense<0.000000e+00> : vector<1xf32>
    %83 = vector.multi_reduction <add>, %82, %cst_36 [1] : vector<1x1024xf32> to vector<1xf32>
    %84 = vector.shape_cast %83 : vector<1xf32> to vector<1x1xf32>
    %c5_i32 = arith.constant 5 : i32
    %85 = vector.broadcast %c5_i32 : i32 to vector<1x10xi32>
    %86 = arith.cmpi eq, %1, %85 : vector<1x10xi32>
    %cst_37 = arith.constant 0.000000e+00 : f32
    %87 = vector.shape_cast %84 : vector<1x1xf32> to vector<1x1xf32>
    %88 = vector.broadcast %87 : vector<1x1xf32> to vector<1x10xf32>
    %89 = vector.broadcast %cst_37 : f32 to vector<1x10xf32>
    %90 = arith.select %86, %88, %89 : vector<1x10xi1>, vector<1x10xf32>
    %91 = arith.addf %77, %90 : vector<1x10xf32>
    %c6 = arith.constant 6 : index
    %c0_38 = arith.constant 0 : index
    %c0_39 = arith.constant 0 : index
    %92 = vector.load %arg2[%c6, %c0_38, %c0_39] : memref<10x16x1024xf32, #tpu.memory_space<vmem>>, vector<1x16x1024xf32>
    %93 = vector.shape_cast %92 : vector<1x16x1024xf32> to vector<16x1024xf32>
    %94 = arith.mulf %6, %93 : vector<16x1024xf32>
    %cst_40 = arith.constant dense<0.000000e+00> : vector<1024xf32>
    %95 = vector.multi_reduction <add>, %94, %cst_40 [0] : vector<16x1024xf32> to vector<1024xf32>
    %96 = vector.shape_cast %95 : vector<1024xf32> to vector<1x1024xf32>
    %cst_41 = arith.constant dense<0.000000e+00> : vector<1xf32>
    %97 = vector.multi_reduction <add>, %96, %cst_41 [1] : vector<1x1024xf32> to vector<1xf32>
    %98 = vector.shape_cast %97 : vector<1xf32> to vector<1x1xf32>
    %c6_i32 = arith.constant 6 : i32
    %99 = vector.broadcast %c6_i32 : i32 to vector<1x10xi32>
    %100 = arith.cmpi eq, %1, %99 : vector<1x10xi32>
    %cst_42 = arith.constant 0.000000e+00 : f32
    %101 = vector.shape_cast %98 : vector<1x1xf32> to vector<1x1xf32>
    %102 = vector.broadcast %101 : vector<1x1xf32> to vector<1x10xf32>
    %103 = vector.broadcast %cst_42 : f32 to vector<1x10xf32>
    %104 = arith.select %100, %102, %103 : vector<1x10xi1>, vector<1x10xf32>
    %105 = arith.addf %91, %104 : vector<1x10xf32>
    %c7 = arith.constant 7 : index
    %c0_43 = arith.constant 0 : index
    %c0_44 = arith.constant 0 : index
    %106 = vector.load %arg2[%c7, %c0_43, %c0_44] : memref<10x16x1024xf32, #tpu.memory_space<vmem>>, vector<1x16x1024xf32>
    %107 = vector.shape_cast %106 : vector<1x16x1024xf32> to vector<16x1024xf32>
    %108 = arith.mulf %6, %107 : vector<16x1024xf32>
    %cst_45 = arith.constant dense<0.000000e+00> : vector<1024xf32>
    %109 = vector.multi_reduction <add>, %108, %cst_45 [0] : vector<16x1024xf32> to vector<1024xf32>
    %110 = vector.shape_cast %109 : vector<1024xf32> to vector<1x1024xf32>
    %cst_46 = arith.constant dense<0.000000e+00> : vector<1xf32>
    %111 = vector.multi_reduction <add>, %110, %cst_46 [1] : vector<1x1024xf32> to vector<1xf32>
    %112 = vector.shape_cast %111 : vector<1xf32> to vector<1x1xf32>
    %c7_i32 = arith.constant 7 : i32
    %113 = vector.broadcast %c7_i32 : i32 to vector<1x10xi32>
    %114 = arith.cmpi eq, %1, %113 : vector<1x10xi32>
    %cst_47 = arith.constant 0.000000e+00 : f32
    %115 = vector.shape_cast %112 : vector<1x1xf32> to vector<1x1xf32>
    %116 = vector.broadcast %115 : vector<1x1xf32> to vector<1x10xf32>
    %117 = vector.broadcast %cst_47 : f32 to vector<1x10xf32>
    %118 = arith.select %114, %116, %117 : vector<1x10xi1>, vector<1x10xf32>
    %119 = arith.addf %105, %118 : vector<1x10xf32>
    %c8 = arith.constant 8 : index
    %c0_48 = arith.constant 0 : index
    %c0_49 = arith.constant 0 : index
    %120 = vector.load %arg2[%c8, %c0_48, %c0_49] : memref<10x16x1024xf32, #tpu.memory_space<vmem>>, vector<1x16x1024xf32>
    %121 = vector.shape_cast %120 : vector<1x16x1024xf32> to vector<16x1024xf32>
    %122 = arith.mulf %6, %121 : vector<16x1024xf32>
    %cst_50 = arith.constant dense<0.000000e+00> : vector<1024xf32>
    %123 = vector.multi_reduction <add>, %122, %cst_50 [0] : vector<16x1024xf32> to vector<1024xf32>
    %124 = vector.shape_cast %123 : vector<1024xf32> to vector<1x1024xf32>
    %cst_51 = arith.constant dense<0.000000e+00> : vector<1xf32>
    %125 = vector.multi_reduction <add>, %124, %cst_51 [1] : vector<1x1024xf32> to vector<1xf32>
    %126 = vector.shape_cast %125 : vector<1xf32> to vector<1x1xf32>
    %c8_i32 = arith.constant 8 : i32
    %127 = vector.broadcast %c8_i32 : i32 to vector<1x10xi32>
    %128 = arith.cmpi eq, %1, %127 : vector<1x10xi32>
    %cst_52 = arith.constant 0.000000e+00 : f32
    %129 = vector.shape_cast %126 : vector<1x1xf32> to vector<1x1xf32>
    %130 = vector.broadcast %129 : vector<1x1xf32> to vector<1x10xf32>
    %131 = vector.broadcast %cst_52 : f32 to vector<1x10xf32>
    %132 = arith.select %128, %130, %131 : vector<1x10xi1>, vector<1x10xf32>
    %133 = arith.addf %119, %132 : vector<1x10xf32>
    %c9 = arith.constant 9 : index
    %c0_53 = arith.constant 0 : index
    %c0_54 = arith.constant 0 : index
    %134 = vector.load %arg2[%c9, %c0_53, %c0_54] : memref<10x16x1024xf32, #tpu.memory_space<vmem>>, vector<1x16x1024xf32>
    %135 = vector.shape_cast %134 : vector<1x16x1024xf32> to vector<16x1024xf32>
    %136 = arith.mulf %6, %135 : vector<16x1024xf32>
    %cst_55 = arith.constant dense<0.000000e+00> : vector<1024xf32>
    %137 = vector.multi_reduction <add>, %136, %cst_55 [0] : vector<16x1024xf32> to vector<1024xf32>
    %138 = vector.shape_cast %137 : vector<1024xf32> to vector<1x1024xf32>
    %cst_56 = arith.constant dense<0.000000e+00> : vector<1xf32>
    %139 = vector.multi_reduction <add>, %138, %cst_56 [1] : vector<1x1024xf32> to vector<1xf32>
    %140 = vector.shape_cast %139 : vector<1xf32> to vector<1x1xf32>
    %c9_i32 = arith.constant 9 : i32
    %141 = vector.broadcast %c9_i32 : i32 to vector<1x10xi32>
    %142 = arith.cmpi eq, %1, %141 : vector<1x10xi32>
    %cst_57 = arith.constant 0.000000e+00 : f32
    %143 = vector.shape_cast %140 : vector<1x1xf32> to vector<1x1xf32>
    %144 = vector.broadcast %143 : vector<1x1xf32> to vector<1x10xf32>
    %145 = vector.broadcast %cst_57 : f32 to vector<1x10xf32>
    %146 = arith.select %142, %144, %145 : vector<1x10xi1>, vector<1x10xf32>
    %147 = arith.addf %133, %146 : vector<1x10xf32>
    %cst_58 = arith.constant dense<0xFF800000> : vector<1xf32>
    %148 = vector.multi_reduction <maximumf>, %147, %cst_58 [1] : vector<1x10xf32> to vector<1xf32>
    %149 = vector.shape_cast %148 : vector<1xf32> to vector<1x1xf32>
    %150 = vector.broadcast %149 : vector<1x1xf32> to vector<1x10xf32>
    %151 = arith.subf %147, %150 : vector<1x10xf32>
    %152 = math.exp %151 : vector<1x10xf32>
    %cst_59 = arith.constant dense<0.000000e+00> : vector<1xf32>
    %153 = vector.multi_reduction <add>, %152, %cst_59 [1] : vector<1x10xf32> to vector<1xf32>
    %154 = vector.shape_cast %153 : vector<1xf32> to vector<1x1xf32>
    %155 = vector.broadcast %154 : vector<1x1xf32> to vector<1x10xf32>
    %156 = arith.divf %152, %155 : vector<1x10xf32>
    %c0_60 = arith.constant 0 : index
    %c0_61 = arith.constant 0 : index
    %157 = vector.load %arg4[%c0_60, %c0_61] : memref<2x10xf32, #tpu.memory_space<vmem>>, vector<1x10xf32>
    tpu.vector_store %arg4[%c0_60, %c0_61], %156 {strides = array<i32>} : memref<2x10xf32, #tpu.memory_space<vmem>>, vector<1x10xf32>,
    %c1_62 = arith.constant 1 : index
    %c0_63 = arith.constant 0 : index
    %c0_64 = arith.constant 0 : index
    %158 = vector.load %arg0[%c1_62, %c0_63, %c0_64] : memref<2x32x1024xf32, #tpu.memory_space<vmem>>, vector<1x32x1024xf32>
    %159 = vector.shape_cast %158 : vector<1x32x1024xf32> to vector<32x1024xf32>
    %cst_65 = arith.constant dense<0.000000e+00> : vector<16x1024xf32>
    %160 = tpu.matmul %0, %159, %cst_65 {dimension_numbers = #tpu.dot_dimension_numbers<[1], [0], [0], [1], [0, 0, 1, 1], [], []>} : vector<16x32xf32>, vector<32x1024xf32>, vector<16x1024xf32> -> vector<16x1024xf32>
    %cst_66 = arith.constant 0.000000e+00 : f32
    %161 = vector.broadcast %cst_66 : f32 to vector<16x1024xf32>
    %162 = arith.maximumf %160, %161 : vector<16x1024xf32>
    %c0_67 = arith.constant 0 : index
    %c0_68 = arith.constant 0 : index
    %163 = vector.load %arg3[%c0_67, %c0_68] : memref<1x10xf32, #tpu.memory_space<vmem>>, vector<1x10xf32>
    %c0_69 = arith.constant 0 : index
    %c0_70 = arith.constant 0 : index
    %c0_71 = arith.constant 0 : index
    %164 = vector.load %arg2[%c0_69, %c0_70, %c0_71] : memref<10x16x1024xf32, #tpu.memory_space<vmem>>, vector<1x16x1024xf32>
    %165 = vector.shape_cast %164 : vector<1x16x1024xf32> to vector<16x1024xf32>
    %166 = arith.mulf %162, %165 : vector<16x1024xf32>
    %cst_72 = arith.constant dense<0.000000e+00> : vector<1024xf32>
    %167 = vector.multi_reduction <add>, %166, %cst_72 [0] : vector<16x1024xf32> to vector<1024xf32>
    %168 = vector.shape_cast %167 : vector<1024xf32> to vector<1x1024xf32>
    %cst_73 = arith.constant dense<0.000000e+00> : vector<1xf32>
    %169 = vector.multi_reduction <add>, %168, %cst_73 [1] : vector<1x1024xf32> to vector<1xf32>
    %170 = vector.shape_cast %169 : vector<1xf32> to vector<1x1xf32>
    %c0_i32_74 = arith.constant 0 : i32
    %171 = vector.broadcast %c0_i32_74 : i32 to vector<1x10xi32>
    %172 = arith.cmpi eq, %1, %171 : vector<1x10xi32>
    %cst_75 = arith.constant 0.000000e+00 : f32
    %173 = vector.shape_cast %170 : vector<1x1xf32> to vector<1x1xf32>
    %174 = vector.broadcast %173 : vector<1x1xf32> to vector<1x10xf32>
    %175 = vector.broadcast %cst_75 : f32 to vector<1x10xf32>
    %176 = arith.select %172, %174, %175 : vector<1x10xi1>, vector<1x10xf32>
    %177 = arith.addf %163, %176 : vector<1x10xf32>
    %c1_76 = arith.constant 1 : index
    %c0_77 = arith.constant 0 : index
    %c0_78 = arith.constant 0 : index
    %178 = vector.load %arg2[%c1_76, %c0_77, %c0_78] : memref<10x16x1024xf32, #tpu.memory_space<vmem>>, vector<1x16x1024xf32>
    %179 = vector.shape_cast %178 : vector<1x16x1024xf32> to vector<16x1024xf32>
    %180 = arith.mulf %162, %179 : vector<16x1024xf32>
    %cst_79 = arith.constant dense<0.000000e+00> : vector<1024xf32>
    %181 = vector.multi_reduction <add>, %180, %cst_79 [0] : vector<16x1024xf32> to vector<1024xf32>
    %182 = vector.shape_cast %181 : vector<1024xf32> to vector<1x1024xf32>
    %cst_80 = arith.constant dense<0.000000e+00> : vector<1xf32>
    %183 = vector.multi_reduction <add>, %182, %cst_80 [1] : vector<1x1024xf32> to vector<1xf32>
    %184 = vector.shape_cast %183 : vector<1xf32> to vector<1x1xf32>
    %c1_i32_81 = arith.constant 1 : i32
    %185 = vector.broadcast %c1_i32_81 : i32 to vector<1x10xi32>
    %186 = arith.cmpi eq, %1, %185 : vector<1x10xi32>
    %cst_82 = arith.constant 0.000000e+00 : f32
    %187 = vector.shape_cast %184 : vector<1x1xf32> to vector<1x1xf32>
    %188 = vector.broadcast %187 : vector<1x1xf32> to vector<1x10xf32>
    %189 = vector.broadcast %cst_82 : f32 to vector<1x10xf32>
    %190 = arith.select %186, %188, %189 : vector<1x10xi1>, vector<1x10xf32>
    %191 = arith.addf %177, %190 : vector<1x10xf32>
    %c2_83 = arith.constant 2 : index
    %c0_84 = arith.constant 0 : index
    %c0_85 = arith.constant 0 : index
    %192 = vector.load %arg2[%c2_83, %c0_84, %c0_85] : memref<10x16x1024xf32, #tpu.memory_space<vmem>>, vector<1x16x1024xf32>
    %193 = vector.shape_cast %192 : vector<1x16x1024xf32> to vector<16x1024xf32>
    %194 = arith.mulf %162, %193 : vector<16x1024xf32>
    %cst_86 = arith.constant dense<0.000000e+00> : vector<1024xf32>
    %195 = vector.multi_reduction <add>, %194, %cst_86 [0] : vector<16x1024xf32> to vector<1024xf32>
    %196 = vector.shape_cast %195 : vector<1024xf32> to vector<1x1024xf32>
    %cst_87 = arith.constant dense<0.000000e+00> : vector<1xf32>
    %197 = vector.multi_reduction <add>, %196, %cst_87 [1] : vector<1x1024xf32> to vector<1xf32>
    %198 = vector.shape_cast %197 : vector<1xf32> to vector<1x1xf32>
    %c2_i32_88 = arith.constant 2 : i32
    %199 = vector.broadcast %c2_i32_88 : i32 to vector<1x10xi32>
    %200 = arith.cmpi eq, %1, %199 : vector<1x10xi32>
    %cst_89 = arith.constant 0.000000e+00 : f32
    %201 = vector.shape_cast %198 : vector<1x1xf32> to vector<1x1xf32>
    %202 = vector.broadcast %201 : vector<1x1xf32> to vector<1x10xf32>
    %203 = vector.broadcast %cst_89 : f32 to vector<1x10xf32>
    %204 = arith.select %200, %202, %203 : vector<1x10xi1>, vector<1x10xf32>
    %205 = arith.addf %191, %204 : vector<1x10xf32>
    %c3_90 = arith.constant 3 : index
    %c0_91 = arith.constant 0 : index
    %c0_92 = arith.constant 0 : index
    %206 = vector.load %arg2[%c3_90, %c0_91, %c0_92] : memref<10x16x1024xf32, #tpu.memory_space<vmem>>, vector<1x16x1024xf32>
    %207 = vector.shape_cast %206 : vector<1x16x1024xf32> to vector<16x1024xf32>
    %208 = arith.mulf %162, %207 : vector<16x1024xf32>
    %cst_93 = arith.constant dense<0.000000e+00> : vector<1024xf32>
    %209 = vector.multi_reduction <add>, %208, %cst_93 [0] : vector<16x1024xf32> to vector<1024xf32>
    %210 = vector.shape_cast %209 : vector<1024xf32> to vector<1x1024xf32>
    %cst_94 = arith.constant dense<0.000000e+00> : vector<1xf32>
    %211 = vector.multi_reduction <add>, %210, %cst_94 [1] : vector<1x1024xf32> to vector<1xf32>
    %212 = vector.shape_cast %211 : vector<1xf32> to vector<1x1xf32>
    %c3_i32_95 = arith.constant 3 : i32
    %213 = vector.broadcast %c3_i32_95 : i32 to vector<1x10xi32>
    %214 = arith.cmpi eq, %1, %213 : vector<1x10xi32>
    %cst_96 = arith.constant 0.000000e+00 : f32
    %215 = vector.shape_cast %212 : vector<1x1xf32> to vector<1x1xf32>
    %216 = vector.broadcast %215 : vector<1x1xf32> to vector<1x10xf32>
    %217 = vector.broadcast %cst_96 : f32 to vector<1x10xf32>
    %218 = arith.select %214, %216, %217 : vector<1x10xi1>, vector<1x10xf32>
    %219 = arith.addf %205, %218 : vector<1x10xf32>
    %c4_97 = arith.constant 4 : index
    %c0_98 = arith.constant 0 : index
    %c0_99 = arith.constant 0 : index
    %220 = vector.load %arg2[%c4_97, %c0_98, %c0_99] : memref<10x16x1024xf32, #tpu.memory_space<vmem>>, vector<1x16x1024xf32>
    %221 = vector.shape_cast %220 : vector<1x16x1024xf32> to vector<16x1024xf32>
    %222 = arith.mulf %162, %221 : vector<16x1024xf32>
    %cst_100 = arith.constant dense<0.000000e+00> : vector<1024xf32>
    %223 = vector.multi_reduction <add>, %222, %cst_100 [0] : vector<16x1024xf32> to vector<1024xf32>
    %224 = vector.shape_cast %223 : vector<1024xf32> to vector<1x1024xf32>
    %cst_101 = arith.constant dense<0.000000e+00> : vector<1xf32>
    %225 = vector.multi_reduction <add>, %224, %cst_101 [1] : vector<1x1024xf32> to vector<1xf32>
    %226 = vector.shape_cast %225 : vector<1xf32> to vector<1x1xf32>
    %c4_i32_102 = arith.constant 4 : i32
    %227 = vector.broadcast %c4_i32_102 : i32 to vector<1x10xi32>
    %228 = arith.cmpi eq, %1, %227 : vector<1x10xi32>
    %cst_103 = arith.constant 0.000000e+00 : f32
    %229 = vector.shape_cast %226 : vector<1x1xf32> to vector<1x1xf32>
    %230 = vector.broadcast %229 : vector<1x1xf32> to vector<1x10xf32>
    %231 = vector.broadcast %cst_103 : f32 to vector<1x10xf32>
    %232 = arith.select %228, %230, %231 : vector<1x10xi1>, vector<1x10xf32>
    %233 = arith.addf %219, %232 : vector<1x10xf32>
    %c5_104 = arith.constant 5 : index
    %c0_105 = arith.constant 0 : index
    %c0_106 = arith.constant 0 : index
    %234 = vector.load %arg2[%c5_104, %c0_105, %c0_106] : memref<10x16x1024xf32, #tpu.memory_space<vmem>>, vector<1x16x1024xf32>
    %235 = vector.shape_cast %234 : vector<1x16x1024xf32> to vector<16x1024xf32>
    %236 = arith.mulf %162, %235 : vector<16x1024xf32>
    %cst_107 = arith.constant dense<0.000000e+00> : vector<1024xf32>
    %237 = vector.multi_reduction <add>, %236, %cst_107 [0] : vector<16x1024xf32> to vector<1024xf32>
    %238 = vector.shape_cast %237 : vector<1024xf32> to vector<1x1024xf32>
    %cst_108 = arith.constant dense<0.000000e+00> : vector<1xf32>
    %239 = vector.multi_reduction <add>, %238, %cst_108 [1] : vector<1x1024xf32> to vector<1xf32>
    %240 = vector.shape_cast %239 : vector<1xf32> to vector<1x1xf32>
    %c5_i32_109 = arith.constant 5 : i32
    %241 = vector.broadcast %c5_i32_109 : i32 to vector<1x10xi32>
    %242 = arith.cmpi eq, %1, %241 : vector<1x10xi32>
    %cst_110 = arith.constant 0.000000e+00 : f32
    %243 = vector.shape_cast %240 : vector<1x1xf32> to vector<1x1xf32>
    %244 = vector.broadcast %243 : vector<1x1xf32> to vector<1x10xf32>
    %245 = vector.broadcast %cst_110 : f32 to vector<1x10xf32>
    %246 = arith.select %242, %244, %245 : vector<1x10xi1>, vector<1x10xf32>
    %247 = arith.addf %233, %246 : vector<1x10xf32>
    %c6_111 = arith.constant 6 : index
    %c0_112 = arith.constant 0 : index
    %c0_113 = arith.constant 0 : index
    %248 = vector.load %arg2[%c6_111, %c0_112, %c0_113] : memref<10x16x1024xf32, #tpu.memory_space<vmem>>, vector<1x16x1024xf32>
    %249 = vector.shape_cast %248 : vector<1x16x1024xf32> to vector<16x1024xf32>
    %250 = arith.mulf %162, %249 : vector<16x1024xf32>
    %cst_114 = arith.constant dense<0.000000e+00> : vector<1024xf32>
    %251 = vector.multi_reduction <add>, %250, %cst_114 [0] : vector<16x1024xf32> to vector<1024xf32>
    %252 = vector.shape_cast %251 : vector<1024xf32> to vector<1x1024xf32>
    %cst_115 = arith.constant dense<0.000000e+00> : vector<1xf32>
    %253 = vector.multi_reduction <add>, %252, %cst_115 [1] : vector<1x1024xf32> to vector<1xf32>
    %254 = vector.shape_cast %253 : vector<1xf32> to vector<1x1xf32>
    %c6_i32_116 = arith.constant 6 : i32
    %255 = vector.broadcast %c6_i32_116 : i32 to vector<1x10xi32>
    %256 = arith.cmpi eq, %1, %255 : vector<1x10xi32>
    %cst_117 = arith.constant 0.000000e+00 : f32
    %257 = vector.shape_cast %254 : vector<1x1xf32> to vector<1x1xf32>
    %258 = vector.broadcast %257 : vector<1x1xf32> to vector<1x10xf32>
    %259 = vector.broadcast %cst_117 : f32 to vector<1x10xf32>
    %260 = arith.select %256, %258, %259 : vector<1x10xi1>, vector<1x10xf32>
    %261 = arith.addf %247, %260 : vector<1x10xf32>
    %c7_118 = arith.constant 7 : index
    %c0_119 = arith.constant 0 : index
    %c0_120 = arith.constant 0 : index
    %262 = vector.load %arg2[%c7_118, %c0_119, %c0_120] : memref<10x16x1024xf32, #tpu.memory_space<vmem>>, vector<1x16x1024xf32>
    %263 = vector.shape_cast %262 : vector<1x16x1024xf32> to vector<16x1024xf32>
    %264 = arith.mulf %162, %263 : vector<16x1024xf32>
    %cst_121 = arith.constant dense<0.000000e+00> : vector<1024xf32>
    %265 = vector.multi_reduction <add>, %264, %cst_121 [0] : vector<16x1024xf32> to vector<1024xf32>
    %266 = vector.shape_cast %265 : vector<1024xf32> to vector<1x1024xf32>
    %cst_122 = arith.constant dense<0.000000e+00> : vector<1xf32>
    %267 = vector.multi_reduction <add>, %266, %cst_122 [1] : vector<1x1024xf32> to vector<1xf32>
    %268 = vector.shape_cast %267 : vector<1xf32> to vector<1x1xf32>
    %c7_i32_123 = arith.constant 7 : i32
    %269 = vector.broadcast %c7_i32_123 : i32 to vector<1x10xi32>
    %270 = arith.cmpi eq, %1, %269 : vector<1x10xi32>
    %cst_124 = arith.constant 0.000000e+00 : f32
    %271 = vector.shape_cast %268 : vector<1x1xf32> to vector<1x1xf32>
    %272 = vector.broadcast %271 : vector<1x1xf32> to vector<1x10xf32>
    %273 = vector.broadcast %cst_124 : f32 to vector<1x10xf32>
    %274 = arith.select %270, %272, %273 : vector<1x10xi1>, vector<1x10xf32>
    %275 = arith.addf %261, %274 : vector<1x10xf32>
    %c8_125 = arith.constant 8 : index
    %c0_126 = arith.constant 0 : index
    %c0_127 = arith.constant 0 : index
    %276 = vector.load %arg2[%c8_125, %c0_126, %c0_127] : memref<10x16x1024xf32, #tpu.memory_space<vmem>>, vector<1x16x1024xf32>
    %277 = vector.shape_cast %276 : vector<1x16x1024xf32> to vector<16x1024xf32>
    %278 = arith.mulf %162, %277 : vector<16x1024xf32>
    %cst_128 = arith.constant dense<0.000000e+00> : vector<1024xf32>
    %279 = vector.multi_reduction <add>, %278, %cst_128 [0] : vector<16x1024xf32> to vector<1024xf32>
    %280 = vector.shape_cast %279 : vector<1024xf32> to vector<1x1024xf32>
    %cst_129 = arith.constant dense<0.000000e+00> : vector<1xf32>
    %281 = vector.multi_reduction <add>, %280, %cst_129 [1] : vector<1x1024xf32> to vector<1xf32>
    %282 = vector.shape_cast %281 : vector<1xf32> to vector<1x1xf32>
    %c8_i32_130 = arith.constant 8 : i32
    %283 = vector.broadcast %c8_i32_130 : i32 to vector<1x10xi32>
    %284 = arith.cmpi eq, %1, %283 : vector<1x10xi32>
    %cst_131 = arith.constant 0.000000e+00 : f32
    %285 = vector.shape_cast %282 : vector<1x1xf32> to vector<1x1xf32>
    %286 = vector.broadcast %285 : vector<1x1xf32> to vector<1x10xf32>
    %287 = vector.broadcast %cst_131 : f32 to vector<1x10xf32>
    %288 = arith.select %284, %286, %287 : vector<1x10xi1>, vector<1x10xf32>
    %289 = arith.addf %275, %288 : vector<1x10xf32>
    %c9_132 = arith.constant 9 : index
    %c0_133 = arith.constant 0 : index
    %c0_134 = arith.constant 0 : index
    %290 = vector.load %arg2[%c9_132, %c0_133, %c0_134] : memref<10x16x1024xf32, #tpu.memory_space<vmem>>, vector<1x16x1024xf32>
    %291 = vector.shape_cast %290 : vector<1x16x1024xf32> to vector<16x1024xf32>
    %292 = arith.mulf %162, %291 : vector<16x1024xf32>
    %cst_135 = arith.constant dense<0.000000e+00> : vector<1024xf32>
    %293 = vector.multi_reduction <add>, %292, %cst_135 [0] : vector<16x1024xf32> to vector<1024xf32>
    %294 = vector.shape_cast %293 : vector<1024xf32> to vector<1x1024xf32>
    %cst_136 = arith.constant dense<0.000000e+00> : vector<1xf32>
    %295 = vector.multi_reduction <add>, %294, %cst_136 [1] : vector<1x1024xf32> to vector<1xf32>
    %296 = vector.shape_cast %295 : vector<1xf32> to vector<1x1xf32>
    %c9_i32_137 = arith.constant 9 : i32
    %297 = vector.broadcast %c9_i32_137 : i32 to vector<1x10xi32>
    %298 = arith.cmpi eq, %1, %297 : vector<1x10xi32>
    %cst_138 = arith.constant 0.000000e+00 : f32
    %299 = vector.shape_cast %296 : vector<1x1xf32> to vector<1x1xf32>
    %300 = vector.broadcast %299 : vector<1x1xf32> to vector<1x10xf32>
    %301 = vector.broadcast %cst_138 : f32 to vector<1x10xf32>
    %302 = arith.select %298, %300, %301 : vector<1x10xi1>, vector<1x10xf32>
    %303 = arith.addf %289, %302 : vector<1x10xf32>
    %cst_139 = arith.constant dense<0xFF800000> : vector<1xf32>
    %304 = vector.multi_reduction <maximumf>, %303, %cst_139 [1] : vector<1x10xf32> to vector<1xf32>
    %305 = vector.shape_cast %304 : vector<1xf32> to vector<1x1xf32>
    %306 = vector.broadcast %305 : vector<1x1xf32> to vector<1x10xf32>
    %307 = arith.subf %303, %306 : vector<1x10xf32>
    %308 = math.exp %307 : vector<1x10xf32>
    %cst_140 = arith.constant dense<0.000000e+00> : vector<1xf32>
    %309 = vector.multi_reduction <add>, %308, %cst_140 [1] : vector<1x10xf32> to vector<1xf32>
    %310 = vector.shape_cast %309 : vector<1xf32> to vector<1x1xf32>
    %311 = vector.broadcast %310 : vector<1x1xf32> to vector<1x10xf32>
    %312 = arith.divf %308, %311 : vector<1x10xf32>
    %c1_141 = arith.constant 1 : index
    %c0_142 = arith.constant 0 : index
    %313 = vector.load %arg4[%c1_141, %c0_142] : memref<2x10xf32, #tpu.memory_space<vmem>>, vector<1x10xf32>
    tpu.vector_store %arg4[%c1_141, %c0_142], %312 {strides = array<i32>} : memref<2x10xf32, #tpu.memory_space<vmem>>, vector<1x10xf32>,
    return
  }
}

</mosaic_0001>

<bundles_post_ra>
// kernel: squeeze.28
= control target key start
LH: loop header
LB: loop body
LE: loop exit
PB: predicated region body
PF: predicated region fallthrough
CT: control target
= control target key end

     0   :  { %s182_s10 = smov 96   ;;  %s183_s11 = smov 64   ;;  %vm3_vm0 = vcmask 261120   ;;  %vm17_vm1 = vcmask 1048320   ;;  %vm33_vm2 = vcmask 785920   ;;  %vm49_vm3 = vcmask 523520   ;;  %s275_s0 = inlined_call_operand.vmem [shape: f32[2,1,32,32], index: 0, kind: input, shape index: {}]   ;;  %s276_s1 = inlined_call_operand.vmem [shape: f32[2,1,1024], index: 1, kind: output, shape index: {}]  }
   0x1   :  { %v158_v0 = vld [vmem:[%s275_s0 + $0x3] ss:$4 sm:$0xff]   ;;  %v160_v1 = vld [vmem:[%s275_s0 + $0x2] ss:$4 sm:$0xff]   ;;  %v162_v2 = vld [vmem:[%s275_s0 + $0x1] ss:$4 sm:$0xff]  }
   0x2   :  { %15 = vrot.lane.b32.xlu0 %v158_v0, %s182_s10  ;;  %31 = vrot.lane.b32.xlu1 %v160_v1, %s183_s11  ;;  %s184_s14 = smov 32   ;;  %v159_v3 = vld [vmem:[%s275_s0 + $0x23] ss:$4 sm:$0xff]   ;;  %v161_v4 = vld [vmem:[%s275_s0 + $0x22] ss:$4 sm:$0xff]  }
   0x3   :  { %47 = vrot.lane.b32.xlu2 %v162_v2, %s184_s14  ;;  %v163_v5 = vld [vmem:[%s275_s0 + $0x21] ss:$4 sm:$0xff]   ;;  %v2_v6 = vld [vmem:[%s275_s0] ss:$4 sm:$0xff]  }
   0x4   :  { %4 = vst.msk [vmem:[#allocation0] ss:$8 sm:$0xf] %vm3_vm0, %v2_v6   ;;  %v157_v8 = vld [vmem:[%s275_s0 + $0x20] ss:$4 sm:$0xff]  }
   0x5   :  { %5 = vst.msk [vmem:[#allocation0] ss:$8 sm:$0xf0] %vm3_vm0, %v2_v6  }
   0x6   :  { %10 = vst.msk [vmem:[#allocation0 + $0x40] ss:$8 sm:$0xf] %vm3_vm0, %v157_v8  }
   0x7   :  { %12 = vst.msk [vmem:[#allocation0 + $0x40] ss:$8 sm:$0xf0] %vm3_vm0, %v157_v8  }
   0xa   :  { %22 = vrot.lane.b32.xlu0 %v159_v3, %s182_s10  ;;  %38 = vrot.lane.b32.xlu1 %v161_v4, %s183_s11 }
   0xb   :  { %54 = vrot.lane.b32.xlu2 %v163_v5, %s184_s14 }
  0x5d   :  { %v48_v7 = vpop.permute.xlu2 %47  }
  0x65   :  { %v55_v9 = vpop.permute.xlu2 %54  }
  0x74   :  { %v16_v10 = vpop.permute.xlu0 %15   ;;  %v32_v11 = vpop.permute.xlu1 %31  }
  0x75   :  { %18 = vst.msk [vmem:[#allocation0] ss:$8 sm:$0xf] %vm17_vm1, %v16_v10  }
  0x76   :  { %19 = vst.msk [vmem:[#allocation0] ss:$8 sm:$0xf0] %vm17_vm1, %v16_v10  }
  0x77   :  { %34 = vst.msk [vmem:[#allocation0] ss:$8 sm:$0xf] %vm33_vm2, %v32_v11  }
  0x78   :  { %35 = vst.msk [vmem:[#allocation0] ss:$8 sm:$0xf0] %vm33_vm2, %v32_v11  }
  0x79   :  { %50 = vst.msk [vmem:[#allocation0] ss:$8 sm:$0xf] %vm49_vm3, %v48_v7  }
  0x7a   :  { %51 = vst.msk [vmem:[#allocation0] ss:$8 sm:$0xf0] %vm49_vm3, %v48_v7  }
  0x7c   :  { %v23_v12 = vpop.permute.xlu0 %22   ;;  %v39_v13 = vpop.permute.xlu1 %38  }
  0x7d   :  { %26 = vst.msk [vmem:[#allocation0 + $0x40] ss:$8 sm:$0xf] %vm17_vm1, %v23_v12  }
  0x7e   :  { %28 = vst.msk [vmem:[#allocation0 + $0x40] ss:$8 sm:$0xf0] %vm17_vm1, %v23_v12  }
  0x7f   :  { %42 = vst.msk [vmem:[#allocation0 + $0x40] ss:$8 sm:$0xf] %vm33_vm2, %v39_v13  }
  0x80   :  { %v63_v14 = vld [vmem:[#allocation0] sm:$0x1]  ;;  %v68_v15 = vld [vmem:[#allocation0 + $0x8] sm:$0x1]  ;;  %v74_v16 = vld [vmem:[#allocation0 + $0x10] sm:$0x1] }
  0x81   :  { %66 = vst [vmem:[%s276_s1] sm:$0x1] %v63_v14  ;;  %v80_v17 = vld [vmem:[#allocation0 + $0x18] sm:$0x1]  ;;  %v86_v18 = vld [vmem:[#allocation0 + $0x20] sm:$0x1] }
  0x82   :  { %164 = vst [vmem:[%s276_s1 + $0x1] sm:$0x1] %v68_v15  ;;  %v92_v19 = vld [vmem:[#allocation0 + $0x28] sm:$0x1]  ;;  %v98_v20 = vld [vmem:[#allocation0 + $0x30] sm:$0x1] }
  0x83   :  { %165 = vst [vmem:[%s276_s1 + $0x2] sm:$0x1] %v74_v16  ;;  %v104_v21 = vld [vmem:[#allocation0 + $0x38] sm:$0x1] }
  0x84   :  { %166 = vst [vmem:[%s276_s1 + $0x3] sm:$0x1] %v80_v17 }
  0x85   :  { %167 = vst [vmem:[%s276_s1 + $0x4] sm:$0x1] %v86_v18 }
  0x86   :  { %168 = vst [vmem:[%s276_s1 + $0x5] sm:$0x1] %v92_v19 }
  0x87   :  { %169 = vst [vmem:[%s276_s1 + $0x6] sm:$0x1] %v98_v20 }
  0x88   :  { %170 = vst [vmem:[%s276_s1 + $0x7] sm:$0x1] %v104_v21 }
  0x89   :  { %44 = vst.msk [vmem:[#allocation0 + $0x40] ss:$8 sm:$0xf0] %vm33_vm2, %v39_v13  }
  0x8a   :  { %58 = vst.msk [vmem:[#allocation0 + $0x40] ss:$8 sm:$0xf] %vm49_vm3, %v55_v9  }
  0x8b   :  { %60 = vst.msk [vmem:[#allocation0 + $0x40] ss:$8 sm:$0xf0] %vm49_vm3, %v55_v9  }
  0x91   :  { %v110_v22 = vld [vmem:[#allocation0 + $0x40] sm:$0x1]  ;;  %v116_v23 = vld [vmem:[#allocation0 + $0x48] sm:$0x1]  ;;  %v122_v24 = vld [vmem:[#allocation0 + $0x50] sm:$0x1] }
  0x92   :  { %171 = vst [vmem:[%s276_s1 + $0x8] sm:$0x1] %v110_v22  ;;  %v128_v25 = vld [vmem:[#allocation0 + $0x58] sm:$0x1]  ;;  %v134_v26 = vld [vmem:[#allocation0 + $0x60] sm:$0x1] }
  0x93   :  { %172 = vst [vmem:[%s276_s1 + $0x9] sm:$0x1] %v116_v23  ;;  %v140_v27 = vld [vmem:[#allocation0 + $0x68] sm:$0x1]  ;;  %v146_v28 = vld [vmem:[#allocation0 + $0x70] sm:$0x1] }
  0x94   :  { %173 = vst [vmem:[%s276_s1 + $0xa] sm:$0x1] %v122_v24  ;;  %v152_v29 = vld [vmem:[#allocation0 + $0x78] sm:$0x1] }
  0x95   :  { %174 = vst [vmem:[%s276_s1 + $0xb] sm:$0x1] %v128_v25 }
  0x96   :  { %175 = vst [vmem:[%s276_s1 + $0xc] sm:$0x1] %v134_v26 }
  0x97   :  { %176 = vst [vmem:[%s276_s1 + $0xd] sm:$0x1] %v140_v27 }
  0x98   :  { %177 = vst [vmem:[%s276_s1 + $0xe] sm:$0x1] %v146_v28 }
  0x99   :  { %178 = vst [vmem:[%s276_s1 + $0xf] sm:$0x1] %v152_v29 }

// kernel: elm_forward.1
= control target key start
LH: loop header
LB: loop body
LE: loop exit
PB: predicated region body
PF: predicated region fallthrough
CT: control target
= control target key end

     0   :  { %vm54_vm0 = vcmask 261120   ;;  %s4718_s0 = inlined_call_operand.vmem [shape: f32[2,32,1024], index: 0, kind: input, shape index: {}]   ;;  %s4719_s1 = inlined_call_operand.vmem [shape: f32[16,32], index: 1, kind: input, shape index: {}]   ;;  %s4720_s2 = inlined_call_operand.vmem [shape: f32[10,16,1024], index: 2, kind: input, shape index: {}]   ;;  %s4721_s3 = inlined_call_operand.vmem [shape: f32[1,10], index: 3, kind: input, shape index: {}]   ;;  %s4722_s4 = inlined_call_operand.hbm [shape: f32[2,10], index: 4, kind: output, shape index: {}]  }
   0x1   :  { %v46_v0 = vld [vmem:[%s4718_s0 + $0xc0] sm:$0xff]  ;;  %v47_v1 = vld [vmem:[%s4718_s0 + $0xc8] sm:$0xff]  ;;  %v48_v2 = vld [vmem:[%s4718_s0 + $0xd0] sm:$0xff] }
   0x2   :  { %73 = vmatpush.msra.mxu0 %v46_v0  ;;  %96 = vmatpush.msra.mxu1 %v47_v1  ;;  %v49_v3 = vld [vmem:[%s4718_s0 + $0xd8] sm:$0xff]  ;;  %v38_v4 = vld [vmem:[%s4718_s0 + $0x80] sm:$0xff]  ;;  %v39_v5 = vld [vmem:[%s4718_s0 + $0x88] sm:$0xff] }
   0x3   :  { %119 = vmatpush.msra.mxu2 %v48_v2  ;;  %142 = vmatpush.msra.mxu3 %v49_v3  ;;  %v40_v6 = vld [vmem:[%s4718_s0 + $0x90] sm:$0xff]  ;;  %v41_v7 = vld [vmem:[%s4718_s0 + $0x98] sm:$0xff]  ;;  %v30_v8 = vld [vmem:[%s4718_s0 + $0x40] sm:$0xff] }
   0x4   :  { %74 = vmatpush.msra.mxu0 %v38_v4  ;;  %97 = vmatpush.msra.mxu1 %v39_v5  ;;  %v31_v9 = vld [vmem:[%s4718_s0 + $0x48] sm:$0xff]  ;;  %v32_v10 = vld [vmem:[%s4718_s0 + $0x50] sm:$0xff]  ;;  %v33_v11 = vld [vmem:[%s4718_s0 + $0x58] sm:$0xff] }
   0x5   :  { %120 = vmatpush.msra.mxu2 %v40_v6  ;;  %143 = vmatpush.msra.mxu3 %v41_v7  ;;  %v22_v12 = vld [vmem:[%s4718_s0] sm:$0xff]  ;;  %v23_v13 = vld [vmem:[%s4718_s0 + $0x8] sm:$0xff]  ;;  %v24_v14 = vld [vmem:[%s4718_s0 + $0x10] sm:$0xff] }
   0x6   :  { %75 = vmatpush.msra.mxu0 %v30_v8  ;;  %98 = vmatpush.msra.mxu1 %v31_v9  ;;  %v25_v15 = vld [vmem:[%s4718_s0 + $0x18] sm:$0xff]  ;;  %v3026_v16 = vld [vmem:[%s4719_s1] sm:$0xff]  ;;  %v52_v17 = vld [vmem:[%s4718_s0 + $0xf0] sm:$0xff] }
   0x7   :  { %121 = vmatpush.msra.mxu2 %v32_v10  ;;  %144 = vmatpush.msra.mxu3 %v33_v11  ;;  %v50_v18 = vld [vmem:[%s4718_s0 + $0xe0] sm:$0xff]  ;;  %v53_v19 = vld [vmem:[%s4718_s0 + $0xf8] sm:$0xff]  ;;  %v51_v20 = vld [vmem:[%s4718_s0 + $0xe8] sm:$0xff] }
   0x8   :  { %76 = vmatpush.msra.mxu0 %v22_v12  ;;  %99 = vmatpush.msra.mxu1 %v23_v13  ;;  %v44_v21 = vld [vmem:[%s4718_s0 + $0xb0] sm:$0xff]  ;;  %v42_v22 = vld [vmem:[%s4718_s0 + $0xa0] sm:$0xff]  ;;  %v45_v23 = vld [vmem:[%s4718_s0 + $0xb8] sm:$0xff] }
   0x9   :  { %122 = vmatpush.msra.mxu2 %v24_v14  ;;  %145 = vmatpush.msra.mxu3 %v25_v15  ;;  %v43_v24 = vld [vmem:[%s4718_s0 + $0xa8] sm:$0xff]  ;;  %v36_v25 = vld [vmem:[%s4718_s0 + $0x70] sm:$0xff]  ;;  %v34_v26 = vld [vmem:[%s4718_s0 + $0x60] sm:$0xff] }
   0xa   :  { %2562 = vmatmul.msk.f32.vlgmr.msra.gmra.mxu0 %vm54_vm0, %v3026_v16  ;;  %2564 = vmatmul.msk.f32.vlgmr.msra.gmra.mxu1 %vm54_vm0, %v3026_v16  ;;  %v37_v27 = vld [vmem:[%s4718_s0 + $0x78] sm:$0xff]  ;;  %v35_v28 = vld [vmem:[%s4718_s0 + $0x68] sm:$0xff]  ;;  %v28_v30 = vld [vmem:[%s4718_s0 + $0x30] sm:$0xff] }
   0xb   :  { %2566 = vmatmul.msk.f32.vlgmr.msra.gmra.mxu2 %vm54_vm0, %v3026_v16  ;;  %2568 = vmatmul.msk.f32.vlgmr.msra.gmra.mxu3 %vm54_vm0, %v3026_v16  ;;  %v3075_v29 = vld [vmem:[%s4719_s1 + $0x8] sm:$0xff]  ;;  %v26_v31 = vld [vmem:[%s4718_s0 + $0x20] sm:$0xff]  ;;  %v29_v32 = vld [vmem:[%s4718_s0 + $0x38] sm:$0xff] }
   0xc   :  { %211 = vmatpush.msrb.mxu2 %v52_v17  ;;  %165 = vmatpush.msrb.mxu0 %v50_v18  ;;  %v27_v33 = vld [vmem:[%s4718_s0 + $0x28] sm:$0xff]  ;;  %v2748_v34 = vld [vmem:[%s4718_s0 + $0x1d0] sm:$0xff]  ;;  %v2746_v35 = vld [vmem:[%s4718_s0 + $0x1c0] sm:$0xff] }
   0xd   :  { %234 = vmatpush.msrb.mxu3 %v53_v19  ;;  %188 = vmatpush.msrb.mxu1 %v51_v20  ;;  %v2749_v36 = vld [vmem:[%s4718_s0 + $0x1d8] sm:$0xff]  ;;  %v2747_v37 = vld [vmem:[%s4718_s0 + $0x1c8] sm:$0xff]  ;;  %v2740_v38 = vld [vmem:[%s4718_s0 + $0x190] sm:$0xff] }
   0xe   :  { %212 = vmatpush.msrb.mxu2 %v44_v21  ;;  %166 = vmatpush.msrb.mxu0 %v42_v22  ;;  %v2738_v39 = vld [vmem:[%s4718_s0 + $0x180] sm:$0xff]  ;;  %v2741_v40 = vld [vmem:[%s4718_s0 + $0x198] sm:$0xff]  ;;  %v2739_v41 = vld [vmem:[%s4718_s0 + $0x188] sm:$0xff] }
   0xf   :  { %235 = vmatpush.msrb.mxu3 %v45_v23  ;;  %189 = vmatpush.msrb.mxu1 %v43_v24 }
  0x10   :  { %213 = vmatpush.msrb.mxu2 %v36_v25  ;;  %167 = vmatpush.msrb.mxu0 %v34_v26 }
  0x11   :  { %236 = vmatpush.msrb.mxu3 %v37_v27  ;;  %190 = vmatpush.msrb.mxu1 %v35_v28 }
  0x12   :  { %2563 = vmatmul.msk.f32.gmra.mxu0 %vm54_vm0, %v3075_v29  ;;  %2565 = vmatmul.msk.f32.gmra.mxu1 %vm54_vm0, %v3075_v29 }
  0x13   :  { %2567 = vmatmul.msk.f32.gmra.mxu2 %vm54_vm0, %v3075_v29  ;;  %2569 = vmatmul.msk.f32.gmra.mxu3 %vm54_vm0, %v3075_v29 }
  0x14   :  { %214 = vmatpush.msrb.mxu2 %v28_v30  ;;  %168 = vmatpush.msrb.mxu0 %v26_v31 }
  0x15   :  { %237 = vmatpush.msrb.mxu3 %v29_v32  ;;  %191 = vmatpush.msrb.mxu1 %v27_v33 }
  0x16   :  { %1388 = vmatpush.msra.mxu2 %v2748_v34  ;;  %1342 = vmatpush.msra.mxu0 %v2746_v35 }
  0x17   :  { %1411 = vmatpush.msra.mxu3 %v2749_v36  ;;  %1365 = vmatpush.msra.mxu1 %v2747_v37 }
  0x18   :  { %9 = vsyncpa [#allocation3], 0  ;;  %1389 = vmatpush.msra.mxu2 %v2740_v38  ;;  %1343 = vmatpush.msra.mxu0 %v2738_v39  ;;  %v2732_v42 = vld [vmem:[%s4718_s0 + $0x150] sm:$0xff]  ;;  %v2730_v43 = vld [vmem:[%s4718_s0 + $0x140] sm:$0xff]  ;;  %vm1271_vm11 = vcmask 73728   ;;  %s2553_s12 = sshll.u32 %s4722_s4, 4  ;;  %s2554_s12 = int_to_ptr.hbm [resolvable:$true] %s2553_s12 }
  0x19   :  { %1412 = vmatpush.msra.mxu3 %v2741_v40  ;;  %1366 = vmatpush.msra.mxu1 %v2739_v41  ;;  %v2733_v44 = vld [vmem:[%s4718_s0 + $0x158] sm:$0xff]  ;;  %v2731_v45 = vld [vmem:[%s4718_s0 + $0x148] sm:$0xff]  ;;  %v2724_v46 = vld [vmem:[%s4718_s0 + $0x110] sm:$0xff] }
  0x1a   :  { %2570 = vmatmul.msk.f32.vlgmr.msrb.gmra.mxu0 %vm54_vm0, %v3026_v16  ;;  %2572 = vmatmul.msk.f32.vlgmr.msrb.gmra.mxu1 %vm54_vm0, %v3026_v16  ;;  %v2722_v47 = vld [vmem:[%s4718_s0 + $0x100] sm:$0xff]  ;;  %v2725_v48 = vld [vmem:[%s4718_s0 + $0x118] sm:$0xff]  ;;  %v2723_v49 = vld [vmem:[%s4718_s0 + $0x108] sm:$0xff] }
  0x1b   :  { %2574 = vmatmul.msk.f32.vlgmr.msrb.gmra.mxu2 %vm54_vm0, %v3026_v16  ;;  %2576 = vmatmul.msk.f32.vlgmr.msrb.gmra.mxu3 %vm54_vm0, %v3026_v16  ;;  %v2752_v50 = vld [vmem:[%s4718_s0 + $0x1f0] sm:$0xff]  ;;  %v2750_v51 = vld [vmem:[%s4718_s0 + $0x1e0] sm:$0xff]  ;;  %v2753_v52 = vld [vmem:[%s4718_s0 + $0x1f8] sm:$0xff] }
  0x1c   :  { %1390 = vmatpush.msra.mxu2 %v2732_v42  ;;  %1344 = vmatpush.msra.mxu0 %v2730_v43  ;;  %v2751_v53 = vld [vmem:[%s4718_s0 + $0x1e8] sm:$0xff]  ;;  %v2744_v54 = vld [vmem:[%s4718_s0 + $0x1b0] sm:$0xff]  ;;  %v2742_v55 = vld [vmem:[%s4718_s0 + $0x1a0] sm:$0xff] }
  0x1d   :  { %1413 = vmatpush.msra.mxu3 %v2733_v44  ;;  %1367 = vmatpush.msra.mxu1 %v2731_v45  ;;  %v2745_v56 = vld [vmem:[%s4718_s0 + $0x1b8] sm:$0xff]  ;;  %v2743_v57 = vld [vmem:[%s4718_s0 + $0x1a8] sm:$0xff]  ;;  %v2736_v58 = vld [vmem:[%s4718_s0 + $0x170] sm:$0xff] }
  0x1e   :  { %1391 = vmatpush.msra.mxu2 %v2724_v46  ;;  %1345 = vmatpush.msra.mxu0 %v2722_v47  ;;  %v2734_v59 = vld [vmem:[%s4718_s0 + $0x160] sm:$0xff]  ;;  %v2737_v60 = vld [vmem:[%s4718_s0 + $0x178] sm:$0xff]  ;;  %v2735_v61 = vld [vmem:[%s4718_s0 + $0x168] sm:$0xff] }
  0x1f   :  { %1414 = vmatpush.msra.mxu3 %v2725_v48  ;;  %1368 = vmatpush.msra.mxu1 %v2723_v49  ;;  %v2728_v62 = vld [vmem:[%s4718_s0 + $0x130] sm:$0xff]  ;;  %v2726_v63 = vld [vmem:[%s4718_s0 + $0x120] sm:$0xff]  ;;  %v2729_v0 = vld [vmem:[%s4718_s0 + $0x138] sm:$0xff] }
  0x20   :  { %1480 = vmatpush.msrb.mxu2 %v2752_v50  ;;  %1434 = vmatpush.msrb.mxu0 %v2750_v51  ;;  %v2727_v1 = vld [vmem:[%s4718_s0 + $0x128] sm:$0xff]  ;;  %v2594_v6 = vld [vmem:[%s4720_s2 + $0x100] sm:$0xff]  ;;  %v2596_v11 = vld [vmem:[%s4720_s2 + $0x110] sm:$0xff] }
  0x21   :  { %1503 = vmatpush.msrb.mxu3 %v2753_v52  ;;  %1457 = vmatpush.msrb.mxu1 %v2751_v53  ;;  %v2595_v7 = vld [vmem:[%s4720_s2 + $0x108] sm:$0xff]  ;;  %v2578_v8 = vld [vmem:[%s4720_s2 + $0x80] sm:$0xff]  ;;  %v2597_v23 = vld [vmem:[%s4720_s2 + $0x118] sm:$0xff] }
  0x22   :  { %2571 = vmatmul.msk.f32.gmra.mxu0 %vm54_vm0, %v3075_v29  ;;  %2573 = vmatmul.msk.f32.gmra.mxu1 %vm54_vm0, %v3075_v29  ;;  %v2602_v12 = vld [vmem:[%s4720_s2 + $0x140] sm:$0xff]  ;;  %v2579_v13 = vld [vmem:[%s4720_s2 + $0x88] sm:$0xff]  ;;  %v2580_v28 = vld [vmem:[%s4720_s2 + $0x90] sm:$0xff] }
  0x23   :  { %2575 = vmatmul.msk.f32.gmra.mxu2 %vm54_vm0, %v3075_v29  ;;  %2577 = vmatmul.msk.f32.gmra.mxu3 %vm54_vm0, %v3075_v29  ;;  %v2603_v18 = vld [vmem:[%s4720_s2 + $0x148] sm:$0xff]  ;;  %v2586_v19 = vld [vmem:[%s4720_s2 + $0xc0] sm:$0xff]  ;;  %v2581_v33 = vld [vmem:[%s4720_s2 + $0x98] sm:$0xff] }
  0x24   :  { %1481 = vmatpush.msrb.mxu2 %v2744_v54  ;;  %1435 = vmatpush.msrb.mxu0 %v2742_v55  ;;  %v2587_v20 = vld [vmem:[%s4720_s2 + $0xc8] sm:$0xff]  ;;  %v262_v24 = vld [vmem:[%s4720_s2] sm:$0xff]  ;;  %v264_v36 = vld [vmem:[%s4720_s2 + $0x10] sm:$0xff] }
  0x25   :  { %1504 = vmatpush.msrb.mxu3 %v2745_v56  ;;  %1458 = vmatpush.msrb.mxu1 %v2743_v57  ;;  %v263_v25 = vld [vmem:[%s4720_s2 + $0x8] sm:$0xff]  ;;  %v265_v37 = vld [vmem:[%s4720_s2 + $0x18] sm:$0xff]  ;;  %v270_v40 = vld [vmem:[%s4720_s2 + $0x40] sm:$0xff] }
  0x26   :  { %1482 = vmatpush.msrb.mxu2 %v2736_v58  ;;  %1436 = vmatpush.msrb.mxu0 %v2734_v59  ;;  %v271_v41 = vld [vmem:[%s4720_s2 + $0x48] sm:$0xff]  ;;  %v2604_v48 = vld [vmem:[%s4720_s2 + $0x150] sm:$0xff]  ;;  %v2605_v55 = vld [vmem:[%s4720_s2 + $0x158] sm:$0xff] }
  0x27   :  { %1505 = vmatpush.msrb.mxu3 %v2737_v60  ;;  %1459 = vmatpush.msrb.mxu1 %v2735_v61  ;;  %v2588_v58 = vld [vmem:[%s4720_s2 + $0xd0] sm:$0xff]  ;;  %v2589_v59 = vld [vmem:[%s4720_s2 + $0xd8] sm:$0xff] }
  0x28   :  { %1483 = vmatpush.msrb.mxu2 %v2728_v62  ;;  %1437 = vmatpush.msrb.mxu0 %v2726_v63 }
  0x29   :  { %1506 = vmatpush.msrb.mxu3 %v2729_v0  ;;  %1460 = vmatpush.msrb.mxu1 %v2727_v1 }
  0x2a   :  { %2754 = vmatmul.msk.f32.vlgmr.msra.gmra.mxu0 %vm54_vm0, %v3026_v16  ;;  %2756 = vmatmul.msk.f32.vlgmr.msra.gmra.mxu1 %vm54_vm0, %v3026_v16 }
  0x2b   :  { %2758 = vmatmul.msk.f32.vlgmr.msra.gmra.mxu2 %vm54_vm0, %v3026_v16  ;;  %2760 = vmatmul.msk.f32.vlgmr.msra.gmra.mxu3 %vm54_vm0, %v3026_v16 }
  0x32   :  { %2755 = vmatmul.msk.f32.gmra.mxu0 %vm54_vm0, %v3075_v29  ;;  %2757 = vmatmul.msk.f32.gmra.mxu1 %vm54_vm0, %v3075_v29 }
  0x33   :  { %2759 = vmatmul.msk.f32.gmra.mxu2 %vm54_vm0, %v3075_v29  ;;  %2761 = vmatmul.msk.f32.gmra.mxu3 %vm54_vm0, %v3075_v29 }
  0x3a   :  { %2762 = vmatmul.msk.f32.vlgmr.msrb.gmra.mxu0 %vm54_vm0, %v3026_v16  ;;  %2764 = vmatmul.msk.f32.vlgmr.msrb.gmra.mxu1 %vm54_vm0, %v3026_v16 }
  0x3b   :  { %2766 = vmatmul.msk.f32.vlgmr.msrb.gmra.mxu2 %vm54_vm0, %v3026_v16  ;;  %2768 = vmatmul.msk.f32.vlgmr.msrb.gmra.mxu3 %vm54_vm0, %v3026_v16 }
  0x42   :  { %2763 = vmatmul.msk.f32.gmra.mxu0 %vm54_vm0, %v3075_v29  ;;  %2765 = vmatmul.msk.f32.gmra.mxu1 %vm54_vm0, %v3075_v29 }
  0x43   :  { %2767 = vmatmul.msk.f32.gmra.mxu2 %vm54_vm0, %v3075_v29  ;;  %2769 = vmatmul.msk.f32.gmra.mxu3 %vm54_vm0, %v3075_v29 }
  0x87   :  { %v78_v2 = vpop.f32.mrf.mxu0  ;;  %v101_v3 = vpop.f32.mrf.mxu1 }
  0x88   :  { %v3241_v4 = vmax.f32 %v78_v2, 0.0  ;;  %v3243_v5 = vmax.f32 %v101_v3, 0.0  ;;  %v2598_v2 = vld [vmem:[%s4720_s2 + $0x120] sm:$0xff]  ;;  %v2599_v3 = vld [vmem:[%s4720_s2 + $0x128] sm:$0xff] }
  0x8a   :  { %v480_v26 = vmul.f32 %v2594_v6, %v3241_v4  ;;  %v481_v27 = vmul.f32 %v2595_v7, %v3243_v5  ;;  %v379_v29 = vmul.f32 %v2578_v8, %v3241_v4  ;;  %v380_v30 = vmul.f32 %v2579_v13, %v3243_v5  ;;  %v2583_v13 = vld [vmem:[%s4720_s2 + $0xa8] sm:$0xff] }
  0x8b   :  { %v3318_v42 = vmul.f32 %v262_v24, %v3241_v4  ;;  %v3321_v43 = vmul.f32 %v263_v25, %v3243_v5 }
  0x8e   :  { %v124_v9 = vpop.f32.mrf.mxu2  ;;  %v147_v10 = vpop.f32.mrf.mxu3 }
  0x8f   :  { %v3263_v14 = vmax.f32 %v124_v9, 0.0  ;;  %v3265_v15 = vmax.f32 %v147_v10, 0.0  ;;  %v81_v16 = vpop.f32.mrf.mxu0  ;;  %v104_v17 = vpop.f32.mrf.mxu1 }
  0x90   :  { %v3276_v21 = vmax.f32 %v81_v16, 0.0  ;;  %v3278_v22 = vmax.f32 %v104_v17, 0.0 }
  0x91   :  { %v482_v38 = vmul.f32 %v2596_v11, %v3263_v14  ;;  %v483_v39 = vmul.f32 %v2597_v23, %v3265_v15  ;;  %v381_v49 = vmul.f32 %v2580_v28, %v3263_v14  ;;  %v382_v50 = vmul.f32 %v2581_v33, %v3265_v15 }
  0x92   :  { %4742 = vst [vmem:[#allocation5_spill] sm:$0xff] %v3276_v21  ;;  %v488_v31 = vmul.f32 %v2602_v12, %v3276_v21  ;;  %v489_v32 = vmul.f32 %v2603_v18, %v3278_v22  ;;  %v387_v34 = vmul.f32 %v2586_v19, %v3276_v21  ;;  %v388_v35 = vmul.f32 %v2587_v20, %v3278_v22  ;;  %v2582_v12 = vld [vmem:[%s4720_s2 + $0xa0] sm:$0xff] }
  0x93   :  { %4743 = vst [vmem:[#allocation6_spill] sm:$0xff] %v3278_v22  ;;  %v3329_v51 = vmul.f32 %v264_v36, %v3263_v14  ;;  %v3332_v52 = vmul.f32 %v265_v37, %v3265_v15  ;;  %v3344_v60 = vmul.f32 %v270_v40, %v3276_v21  ;;  %v3347_v61 = vmul.f32 %v271_v41, %v3278_v22 }
  0x94   :  { %v496_v44 = vadd.f32 %v488_v31, %v480_v26  ;;  %v503_v45 = vadd.f32 %v489_v32, %v481_v27  ;;  %v395_v46 = vadd.f32 %v387_v34, %v379_v29  ;;  %v402_v47 = vadd.f32 %v388_v35, %v380_v30 }
  0x96   :  { %v127_v53 = vpop.f32.mrf.mxu2  ;;  %v150_v54 = vpop.f32.mrf.mxu3  ;;  %v497_v56 = vrot.slane %v496_v44, 4  ;;  %v504_v57 = vrot.slane %v503_v45, 4  ;;  %v396_v6 = vrot.slane %v395_v46, 4  ;;  %v403_v7 = vrot.slane %v402_v47, 4 }
  0x97   :  { %v3349_v62 = vmax.f32 %v127_v53, 0.0  ;;  %v3351_v63 = vmax.f32 %v150_v54, 0.0  ;;  %v170_v0 = vpop.f32.mrf.mxu0  ;;  %v193_v1 = vpop.f32.mrf.mxu1  ;;  %v2606_v54 = vld [vmem:[%s4720_s2 + $0x160] sm:$0xff] }
  0x98   :  { %v3359_v8 = vmax.f32 %v170_v0, 0.0  ;;  %v3361_v9 = vmax.f32 %v193_v1, 0.0  ;;  %v498_v10 = vadd.f32 %v497_v56, %v496_v44  ;;  %v505_v11 = vadd.f32 %v504_v57, %v503_v45 }
  0x99   :  { %4744 = vst [vmem:[#allocation7_spill] sm:$0xff] %v3349_v62  ;;  %v490_v16 = vmul.f32 %v2604_v48, %v3349_v62  ;;  %v491_v17 = vmul.f32 %v2605_v55, %v3351_v63  ;;  %v389_v18 = vmul.f32 %v2588_v58, %v3349_v62  ;;  %v390_v19 = vmul.f32 %v2589_v59, %v3351_v63  ;;  %v2607_v55 = vld [vmem:[%s4720_s2 + $0x168] sm:$0xff]  ;;  %v2584_v58 = vld [vmem:[%s4720_s2 + $0xb0] sm:$0xff] }
  0x9a   :  { %4745 = vst [vmem:[#allocation8_spill] sm:$0xff] %v3351_v63  ;;  %v484_v20 = vmul.f32 %v2598_v2, %v3359_v8  ;;  %v485_v23 = vmul.f32 %v2599_v3, %v3361_v9  ;;  %v499_v24 = vrot.slane %v498_v10, 2  ;;  %v506_v25 = vrot.slane %v505_v11, 2  ;;  %v2585_v3 = vld [vmem:[%s4720_s2 + $0xb8] sm:$0xff] }
  0x9b   :  { %v510_v26 = vadd.f32 %v490_v16, %v482_v38  ;;  %v517_v27 = vadd.f32 %v491_v17, %v483_v39  ;;  %v3376_v28 = vmul.f32 %v2582_v12, %v3359_v8  ;;  %v3379_v29 = vmul.f32 %v2583_v13, %v3361_v9  ;;  %v2600_v38 = vld [vmem:[%s4720_s2 + $0x130] sm:$0xff]  ;;  %v2601_v39 = vld [vmem:[%s4720_s2 + $0x138] sm:$0xff]  ;;  %v2591_v13 = vld [vmem:[%s4720_s2 + $0xe8] sm:$0xff] }
  0x9c   :  { %v500_v30 = vadd.f32 %v499_v24, %v498_v10  ;;  %v507_v31 = vadd.f32 %v506_v25, %v505_v11  ;;  %v397_v32 = vadd.f32 %v396_v6, %v395_v46  ;;  %v404_v33 = vadd.f32 %v403_v7, %v402_v47  ;;  %v2590_v6 = vld [vmem:[%s4720_s2 + $0xe0] sm:$0xff] }
  0x9d   :  { %v511_v34 = vrot.slane %v510_v26, 4  ;;  %v518_v35 = vrot.slane %v517_v27, 4  ;;  %v3381_v36 = vadd.f32 %v389_v18, %v381_v49  ;;  %v3383_v37 = vadd.f32 %v390_v19, %v382_v50 }
  0x9e   :  { %v216_v40 = vpop.f32.mrf.mxu2  ;;  %v239_v41 = vpop.f32.mrf.mxu3  ;;  %v501_v44 = vrot.slane %v500_v30, 1  ;;  %v508_v45 = vrot.slane %v507_v31, 1  ;;  %v398_v46 = vrot.slane %v397_v32, 2  ;;  %v405_v47 = vrot.slane %v404_v33, 2 }
  0x9f   :  { %v3391_v48 = vmax.f32 %v216_v40, 0.0  ;;  %v3393_v49 = vmax.f32 %v239_v41, 0.0  ;;  %v173_v50 = vpop.f32.mrf.mxu0  ;;  %v196_v53 = vpop.f32.mrf.mxu1  ;;  %v512_v56 = vadd.f32 %v511_v34, %v510_v26  ;;  %v519_v57 = vadd.f32 %v518_v35, %v517_v27  ;;  %v2608_v40 = vld [vmem:[%s4720_s2 + $0x170] sm:$0xff] }
  0xa0   :  { %v3404_v59 = vmax.f32 %v173_v50, 0.0  ;;  %v3406_v0 = vmax.f32 %v196_v53, 0.0  ;;  %v502_v1 = vadd.f32 %v501_v44, %v500_v30  ;;  %v509_v2 = vadd.f32 %v508_v45, %v507_v31 }
  0xa1   :  { %4746 = vst [vmem:[#allocation9_spill] sm:$0xff] %v3391_v48  ;;  %v486_v7 = vmul.f32 %v2600_v38, %v3391_v48  ;;  %v487_v10 = vmul.f32 %v2601_v39, %v3393_v49  ;;  %v513_v11 = vrot.slane %v512_v56, 2  ;;  %v520_v12 = vrot.slane %v519_v57, 2 }
  0xa2   :  { %4747 = vst [vmem:[#allocation10_spill] sm:$0xff] %v3393_v49  ;;  %v492_v16 = vmul.f32 %v2606_v54, %v3404_v59  ;;  %v493_v17 = vmul.f32 %v2607_v55, %v3406_v0  ;;  %v552_v18 = vadd.f32 %v509_v2, %v502_v1  ;;  %v3422_v19 = vmul.f32 %v2584_v58, %v3391_v48  ;;  %v2593_v1 = vld [vmem:[%s4720_s2 + $0xf8] sm:$0xff] }
  0xa3   :  { %4748 = vst [vmem:[#allocation11_spill] sm:$0xff] %v3404_v59  ;;  %v514_v24 = vadd.f32 %v513_v11, %v512_v56  ;;  %v521_v25 = vadd.f32 %v520_v12, %v519_v57  ;;  %v3425_v26 = vmul.f32 %v2585_v3, %v3393_v49  ;;  %v391_v27 = vmul.f32 %v2590_v6, %v3404_v59 }
  0xa4   :  { %4749 = vst [vmem:[#allocation12_spill] sm:$0xff] %v3406_v0  ;;  %v524_v30 = vadd.f32 %v492_v16, %v484_v20  ;;  %v531_v31 = vadd.f32 %v493_v17, %v485_v23  ;;  %v3429_v34 = vmul.f32 %v2591_v13, %v3406_v0  ;;  %v399_v35 = vadd.f32 %v398_v46, %v397_v32  ;;  %v2609_v20 = vld [vmem:[%s4720_s2 + $0x178] sm:$0xff]  ;;  %v2592_v32 = vld [vmem:[%s4720_s2 + $0xf0] sm:$0xff] }
  0xa5   :  { %v515_v41 = vrot.slane %v514_v24, 1  ;;  %v522_v38 = vrot.slane %v521_v25, 1  ;;  %v406_v39 = vadd.f32 %v405_v47, %v404_v33  ;;  %v410_v44 = vrot.slane %v3381_v36, 4 }
  0xa6   :  { %v219_v45 = vpop.f32.mrf.mxu2  ;;  %v242_v50 = vpop.f32.mrf.mxu3  ;;  %v525_v23 = vrot.slane %v524_v30, 4  ;;  %v532_v53 = vrot.slane %v531_v31, 4  ;;  %v400_v46 = vrot.slane %v399_v35, 1  ;;  %v417_v54 = vrot.slane %v3383_v37, 4 }
  0xa7   :  { %v3442_v55 = vmax.f32 %v219_v45, 0.0  ;;  %v3444_v33 = vmax.f32 %v242_v50, 0.0  ;;  %v1347_v47 = vpop.f32.mrf.mxu0  ;;  %v1370_v56 = vpop.f32.mrf.mxu1  ;;  %v516_v57 = vadd.f32 %v515_v41, %v514_v24  ;;  %v523_v58 = vadd.f32 %v522_v38, %v521_v25 }
  0xa8   :  { %v3449_v2 = vmax.f32 %v1347_v47, 0.0  ;;  %v3451_v3 = vmax.f32 %v1370_v56, 0.0  ;;  %v526_v6 = vadd.f32 %v525_v23, %v524_v30  ;;  %v533_v11 = vadd.f32 %v532_v53, %v531_v31 }
  0xa9   :  { %4750 = vst [vmem:[#allocation13_spill] sm:$0xff] %v3442_v55  ;;  %v494_v12 = vmul.f32 %v2608_v40, %v3442_v55  ;;  %v495_v13 = vmul.f32 %v2609_v20, %v3444_v33  ;;  %v553_v16 = vadd.f32 %v552_v18, %v516_v57  ;;  %v393_v17 = vmul.f32 %v2592_v32, %v3442_v55 }
  0xaa   :  { %4751 = vst [vmem:[#allocation14_spill] sm:$0xff] %v3444_v33  ;;  %v527_v45 = vrot.slane %v526_v6, 2  ;;  %v534_v24 = vrot.slane %v533_v11, 2  ;;  %v394_v25 = vmul.f32 %v2593_v1, %v3444_v33  ;;  %v3457_v41 = vadd.f32 %v400_v46, %v399_v35 }
  0xab   :  { %4752 = vst [vmem:[#allocation15_spill] sm:$0xff] %v3451_v3  ;;  %v538_v38 = vadd.f32 %v494_v12, %v486_v7  ;;  %v545_v50 = vadd.f32 %v495_v13, %v487_v10  ;;  %v554_v47 = vadd.f32 %v553_v16, %v523_v58  ;;  %v407_v56 = vrot.slane %v406_v39, 1 }
  0xac   :  { %v528_v3 = vadd.f32 %v527_v45, %v526_v6  ;;  %v535_v30 = vadd.f32 %v534_v24, %v533_v11  ;;  %v411_v31 = vadd.f32 %v410_v44, %v3381_v36  ;;  %v418_v40 = vadd.f32 %v417_v54, %v3383_v37 }
  0xad   :  { %v539_v20 = vrot.slane %v538_v38, 4  ;;  %v546_v18 = vrot.slane %v545_v50, 4  ;;  %v408_v23 = vadd.f32 %v407_v56, %v406_v39  ;;  %v423_v53 = vadd.f32 %v391_v27, %v3376_v28 }
  0xae   :  { %v1393_v32 = vpop.f32.mrf.mxu2  ;;  %v1416_v57 = vpop.f32.mrf.mxu3  ;;  %v529_v1 = vrot.slane %v528_v3, 1  ;;  %v536_v35 = vrot.slane %v535_v30, 1  ;;  %v412_v46 = vrot.slane %v411_v31, 2  ;;  %v419_v7 = vrot.slane %v418_v40, 2 }
  0xaf   :  { %v3462_v10 = vmax.f32 %v1393_v32, 0.0  ;;  %v3464_v58 = vmax.f32 %v1416_v57, 0.0  ;;  %v1350_v6 = vpop.f32.mrf.mxu0  ;;  %v1373_v11 = vpop.f32.mrf.mxu1  ;;  %v540_v36 = vadd.f32 %v539_v20, %v538_v38  ;;  %v547_v44 = vadd.f32 %v546_v18, %v545_v50 }
  0xb0   :  { %v3466_v37 = vmax.f32 %v1350_v6, 0.0  ;;  %v3468_v54 = vmax.f32 %v1373_v11, 0.0  ;;  %v530_v39 = vadd.f32 %v529_v1, %v528_v3  ;;  %v537_v28 = vadd.f32 %v536_v35, %v535_v30 }
  0xb1   :  { %v541_v27 = vrot.slane %v540_v36, 2  ;;  %v548_v12 = vrot.slane %v547_v44, 2  ;;  %v413_v13 = vadd.f32 %v412_v46, %v411_v31  ;;  %v420_v16 = vadd.f32 %v419_v7, %v418_v40 }
  0xb2   :  { %4753 = vst [vmem:[#allocation16_spill] sm:$0xff] %v3466_v37  ;;  %v555_v45 = vadd.f32 %v554_v47, %v530_v39  ;;  %v424_v24 = vrot.slane %v423_v53, 4  ;;  %v430_v56 = vadd.f32 %v3429_v34, %v3379_v29  ;;  %v437_v32 = vadd.f32 %v393_v17, %v3422_v19 }
  0xb3   :  { %4754 = vst [vmem:[#allocation17_spill] sm:$0xff] %v3468_v54  ;;  %v542_v57 = vadd.f32 %v541_v27, %v540_v36  ;;  %v549_v38 = vadd.f32 %v548_v12, %v547_v44  ;;  %v414_v50 = vrot.slane %v413_v13, 1  ;;  %v421_v20 = vrot.slane %v420_v16, 1  ;;  %v267_v27 = vld [vmem:[%s4720_s2 + $0x28] sm:$0xff] }
  0xb4   :  { %v556_v18 = vadd.f32 %v555_v45, %v537_v28  ;;  %v425_v6 = vadd.f32 %v424_v24, %v423_v53  ;;  %v431_v11 = vrot.slane %v430_v56, 4  ;;  %v438_v3 = vrot.slane %v437_v32, 4  ;;  %v266_v28 = vld [vmem:[%s4720_s2 + $0x20] sm:$0xff] }
  0xb5   :  { %v543_v30 = vrot.slane %v542_v57, 1  ;;  %v550_v1 = vrot.slane %v549_v38, 1  ;;  %v415_v35 = vadd.f32 %v414_v50, %v413_v13  ;;  %v422_v31 = vadd.f32 %v421_v20, %v420_v16  ;;  %v272_v20 = vld [vmem:[%s4720_s2 + $0x50] sm:$0xff] }
  0xb6   :  { %v1396_v40 = vpop.f32.mrf.mxu2  ;;  %v1419_v47 = vpop.f32.mrf.mxu3  ;;  %v426_v46 = vrot.slane %v425_v6, 2  ;;  %v432_v7 = vadd.f32 %v431_v11, %v430_v56  ;;  %v439_v39 = vadd.f32 %v438_v3, %v437_v32  ;;  %v444_v29 = vadd.f32 %v394_v25, %v3425_v26  ;;  %v268_v32 = vld [vmem:[%s4720_s2 + $0x30] sm:$0xff] }
  0xb7   :  { %v3474_v19 = vmax.f32 %v1396_v40, 0.0  ;;  %v3476_v34 = vmax.f32 %v1419_v47, 0.0  ;;  %v1439_v17 = vpop.f32.mrf.mxu0  ;;  %v1462_v36 = vpop.f32.mrf.mxu1  ;;  %v544_v53 = vadd.f32 %v543_v30, %v542_v57  ;;  %v551_v44 = vadd.f32 %v550_v1, %v549_v38  ;;  %v269_v57 = vld [vmem:[%s4720_s2 + $0x38] sm:$0xff]  ;;  %v274_v1 = vld [vmem:[%s4720_s2 + $0x60] sm:$0xff]  ;;  %v275_v40 = vld [vmem:[%s4720_s2 + $0x68] sm:$0xff] }
  0xb8   :  { %v3484_v12 = vmax.f32 %v1439_v17, 0.0  ;;  %v3486_v13 = vmax.f32 %v1462_v36, 0.0  ;;  %v427_v26 = vadd.f32 %v426_v46, %v425_v6  ;;  %v433_v25 = vrot.slane %v432_v7, 2  ;;  %v273_v30 = vld [vmem:[%s4720_s2 + $0x58] sm:$0xff] }
  0xb9   :  { %4755 = vst [vmem:[#allocation18_spill] sm:$0xff] %v3474_v19  ;;  %v557_v16 = vadd.f32 %v556_v18, %v544_v53  ;;  %v440_v45 = vrot.slane %v439_v39, 2  ;;  %v445_v24 = vrot.slane %v444_v29, 4  ;;  %v451_v56 = vadd.f32 %v408_v23, %v3457_v41  ;;  %v277_v53 = vld [vmem:[%s4720_s2 + $0x78] sm:$0xff] }
  0xba   :  { %4756 = vst [vmem:[#allocation19_spill] sm:$0xff] %v3476_v34  ;;  %v428_v38 = vrot.slane %v427_v26, 1  ;;  %v434_v50 = vadd.f32 %v433_v25, %v432_v7  ;;  %v282_v18 = vmul.f32 %v266_v28, %v3359_v8  ;;  %v283_v6 = vmul.f32 %v267_v27, %v3361_v9  ;;  %v276_v7 = vld [vmem:[%s4720_s2 + $0x70] sm:$0xff] }
  0xbb   :  { %v558_v11 = vadd.f32 %v557_v16, %v551_v44  ;;  %v441_v41 = vadd.f32 %v440_v45, %v439_v39  ;;  %v446_v23 = vadd.f32 %v445_v24, %v444_v29  ;;  %v452_v3 = vadd.f32 %v451_v56, %v415_v35 }
  0xbc   :  { %v429_v47 = vadd.f32 %v428_v38, %v427_v26  ;;  %v435_v46 = vrot.slane %v434_v50, 1  ;;  %v284_v35 = vmul.f32 %v268_v32, %v3391_v48  ;;  %v285_v39 = vmul.f32 %v269_v57, %v3393_v49 }
  0xbd   :  { %559 = vadd.xlane.f32.xlu2 %v558_v11  ;;  %v442_v29 = vrot.slane %v441_v41, 1  ;;  %v447_v17 = vrot.slane %v446_v23, 2  ;;  %v453_v36 = vadd.f32 %v452_v3, %v422_v31  ;;  %v288_v44 = vmul.f32 %v272_v20, %v3349_v62 }
  0xbe   :  { %v436_v28 = vadd.f32 %v435_v46, %v434_v50  ;;  %v289_v27 = vmul.f32 %v273_v30, %v3351_v63  ;;  %v290_v26 = vmul.f32 %v274_v1, %v3404_v59  ;;  %v291_v25 = vmul.f32 %v275_v40, %v3406_v0 }
  0xbf   :  { %v443_v16 = vadd.f32 %v442_v29, %v441_v41  ;;  %v448_v45 = vadd.f32 %v447_v17, %v446_v23  ;;  %v454_v24 = vadd.f32 %v453_v36, %v429_v47  ;;  %v292_v56 = vmul.f32 %v276_v7, %v3442_v55 }
  0xc0   :  { %v293_v31 = vmul.f32 %v277_v53, %v3444_v33  ;;  %v294_v32 = vadd.f32 %v3344_v60, %v3318_v42  ;;  %v301_v57 = vadd.f32 %v3347_v61, %v3321_v43  ;;  %v308_v38 = vadd.f32 %v288_v44, %v3329_v51 }
  0xc1   :  { %v449_v50 = vrot.slane %v448_v45, 1  ;;  %v455_v20 = vadd.f32 %v454_v24, %v436_v28  ;;  %v315_v11 = vadd.f32 %v289_v27, %v3332_v52  ;;  %v322_v3 = vadd.f32 %v290_v26, %v282_v18 }
  0xc2   :  { %v295_v41 = vrot.slane %v294_v32, 4  ;;  %v302_v23 = vrot.slane %v301_v57, 4  ;;  %v309_v30 = vrot.slane %v308_v38, 4  ;;  %v329_v1 = vadd.f32 %v291_v25, %v283_v6 }
  0xc3   :  { %v450_v40 = vadd.f32 %v449_v50, %v448_v45  ;;  %v456_v47 = vadd.f32 %v455_v20, %v443_v16  ;;  %v316_v46 = vrot.slane %v315_v11, 4  ;;  %v323_v7 = vrot.slane %v322_v3, 4 }
  0xc4   :  { %v296_v29 = vadd.f32 %v295_v41, %v294_v32  ;;  %v303_v42 = vadd.f32 %v302_v23, %v301_v57  ;;  %v310_v60 = vadd.f32 %v309_v30, %v308_v38  ;;  %v330_v17 = vrot.slane %v329_v1, 4 }
  0xc5   :  { %v457_v43 = vadd.f32 %v456_v47, %v450_v40  ;;  %v317_v61 = vadd.f32 %v316_v46, %v315_v11  ;;  %v324_v51 = vadd.f32 %v323_v7, %v322_v3  ;;  %v336_v36 = vadd.f32 %v292_v56, %v284_v35  ;;  %v1442_v46 = vpop.f32.mrf.mxu0  ;;  %v1465_v7 = vpop.f32.mrf.mxu1 }
  0xc6   :  { %v297_v53 = vrot.slane %v296_v29, 2  ;;  %v304_v44 = vrot.slane %v303_v42, 2  ;;  %v311_v52 = vrot.slane %v310_v60, 2  ;;  %v331_v18 = vadd.f32 %v330_v17, %v329_v1  ;;  %v1485_v1 = vpop.f32.mrf.mxu2 }
  0xc7   :  { %458 = vadd.xlane.f32.xlu1 %v457_v43  ;;  %v318_v28 = vrot.slane %v317_v61, 2  ;;  %v325_v27 = vrot.slane %v324_v51, 2  ;;  %v337_v6 = vrot.slane %v336_v36, 4  ;;  %v343_v26 = vadd.f32 %v293_v31, %v285_v39  ;;  %v1508_v43 = vpop.f32.mrf.mxu3 }
  0xc8   :  { %v298_v25 = vadd.f32 %v297_v53, %v296_v29  ;;  %v305_v16 = vadd.f32 %v304_v44, %v303_v42  ;;  %v312_v45 = vadd.f32 %v311_v52, %v310_v60  ;;  %v332_v24 = vrot.slane %v331_v18, 2 }
  0xc9   :  { %v319_v32 = vadd.f32 %v318_v28, %v317_v61  ;;  %v326_v57 = vadd.f32 %v325_v27, %v324_v51  ;;  %v338_v38 = vadd.f32 %v337_v6, %v336_v36  ;;  %v344_v50 = vrot.slane %v343_v26, 4  ;;  %v2626_v61 = vld [vmem:[%s4720_s2 + $0x200] sm:$0xff]  ;;  %v2627_v51 = vld [vmem:[%s4720_s2 + $0x208] sm:$0xff]  ;;  %v2628_v36 = vld [vmem:[%s4720_s2 + $0x210] sm:$0xff] }
  0xca   :  { %v299_v20 = vrot.slane %v298_v25, 1  ;;  %v306_v11 = vrot.slane %v305_v16, 1  ;;  %v313_v35 = vrot.slane %v312_v45, 1  ;;  %v333_v56 = vadd.f32 %v332_v24, %v331_v18  ;;  %v2629_v28 = vld [vmem:[%s4720_s2 + $0x218] sm:$0xff]  ;;  %v2630_v27 = vld [vmem:[%s4720_s2 + $0x220] sm:$0xff]  ;;  %v2632_v24 = vld [vmem:[%s4720_s2 + $0x230] sm:$0xff] }
  0xcb   :  { %v320_v3 = vrot.slane %v319_v32, 1  ;;  %v327_v41 = vrot.slane %v326_v57, 1  ;;  %v339_v23 = vrot.slane %v338_v38, 2  ;;  %v345_v30 = vadd.f32 %v344_v50, %v343_v26  ;;  %v2635_v50 = vld [vmem:[%s4720_s2 + $0x248] sm:$0xff] }
  0xcc   :  { %v300_v40 = vadd.f32 %v299_v20, %v298_v25  ;;  %v307_v47 = vadd.f32 %v306_v11, %v305_v16  ;;  %v314_v39 = vadd.f32 %v313_v35, %v312_v45  ;;  %v334_v31 = vrot.slane %v333_v56, 1  ;;  %v2631_v45 = vld [vmem:[%s4720_s2 + $0x228] sm:$0xff]  ;;  %v2636_v20 = vld [vmem:[%s4720_s2 + $0x250] sm:$0xff] }
  0xcd   :  { %v321_v29 = vadd.f32 %v320_v3, %v319_v32  ;;  %v328_v42 = vadd.f32 %v327_v41, %v326_v57  ;;  %v340_v60 = vadd.f32 %v339_v23, %v338_v38  ;;  %v346_v17 = vrot.slane %v345_v30, 2  ;;  %v2633_v32 = vld [vmem:[%s4720_s2 + $0x238] sm:$0xff]  ;;  %v2634_v38 = vld [vmem:[%s4720_s2 + $0x240] sm:$0xff] }
  0xce   :  { %v335_v53 = vadd.f32 %v334_v31, %v333_v56  ;;  %v350_v44 = vadd.f32 %v307_v47, %v300_v40  ;;  %v3538_v52 = vmax.f32 %v1485_v1, 0.0  ;;  %v3540_v18 = vmax.f32 %v1508_v43, 0.0  ;;  %v2637_v23 = vld [vmem:[%s4720_s2 + $0x258] sm:$0xff]  ;;  %v2639_v1 = vld [vmem:[%s4720_s2 + $0x268] sm:$0xff]  ;;  %v2640_v31 = vld [vmem:[%s4720_s2 + $0x270] sm:$0xff] }
  0xcf   :  { %v341_v6 = vrot.slane %v340_v60, 1  ;;  %v347_v26 = vadd.f32 %v346_v17, %v345_v30  ;;  %v3548_v25 = vmax.f32 %v1442_v46, 0.0  ;;  %v3550_v16 = vmax.f32 %v1465_v7, 0.0  ;;  %v2638_v30 = vld [vmem:[%s4720_s2 + $0x260] sm:$0xff]  ;;  %v2641_v46 = vld [vmem:[%s4720_s2 + $0x278] sm:$0xff] }
  0xd0   :  { %4757 = vst [vmem:[#allocation20_spill] sm:$0xff] %v3540_v18  ;;  %v351_v57 = vadd.f32 %v350_v44, %v314_v39  ;;  %v682_v11 = vmul.f32 %v2626_v61, %v3241_v4  ;;  %v683_v35 = vmul.f32 %v2627_v51, %v3243_v5  ;;  %v684_v56 = vmul.f32 %v2628_v36, %v3263_v14 }
  0xd1   :  { %4758 = vst [vmem:[#allocation21_spill] sm:$0xff] %v3548_v25  ;;  %v342_v3 = vadd.f32 %v341_v6, %v340_v60  ;;  %v348_v41 = vrot.slane %v347_v26, 1  ;;  %v685_v40 = vmul.f32 %v2629_v28, %v3265_v15  ;;  %v686_v47 = vmul.f32 %v2630_v27, %v3359_v8 }
  0xd2   :  { %4759 = vst [vmem:[#allocation22_spill] sm:$0xff] %v3550_v16  ;;  %v352_v39 = vadd.f32 %v351_v57, %v321_v29  ;;  %v687_v7 = vmul.f32 %v2631_v45, %v3361_v9  ;;  %v688_v60 = vmul.f32 %v2632_v24, %v3391_v48  ;;  %v689_v17 = vmul.f32 %v2633_v32, %v3393_v49 }
  0xd3   :  { %v349_v43 = vadd.f32 %v348_v41, %v347_v26  ;;  %v690_v61 = vmul.f32 %v2634_v38, %v3276_v21  ;;  %v691_v51 = vmul.f32 %v2635_v50, %v3278_v22  ;;  %v692_v29 = vmul.f32 %v2636_v20, %v3349_v62 }
  0xd4   :  { %v353_v36 = vadd.f32 %v352_v39, %v328_v42  ;;  %v693_v44 = vmul.f32 %v2637_v23, %v3351_v63  ;;  %v694_v28 = vmul.f32 %v2638_v30, %v3404_v59  ;;  %v695_v27 = vmul.f32 %v2639_v1, %v3406_v0 }
  0xd5   :  { %v696_v6 = vmul.f32 %v2640_v31, %v3442_v55  ;;  %v697_v45 = vmul.f32 %v2641_v46, %v3444_v33  ;;  %v698_v24 = vadd.f32 %v690_v61, %v682_v11  ;;  %v705_v32 = vadd.f32 %v691_v51, %v683_v35 }
  0xd6   :  { %v354_v26 = vadd.f32 %v353_v36, %v335_v53  ;;  %v712_v57 = vadd.f32 %v692_v29, %v684_v56  ;;  %v719_v38 = vadd.f32 %v693_v44, %v685_v40  ;;  %v726_v41 = vadd.f32 %v694_v28, %v686_v47 }
  0xd7   :  { %v699_v50 = vrot.slane %v698_v24, 4  ;;  %v706_v16 = vrot.slane %v705_v32, 4  ;;  %v733_v20 = vadd.f32 %v695_v27, %v687_v7  ;;  %v740_v42 = vadd.f32 %v696_v6, %v688_v60 }
  0xd8   :  { %v355_v39 = vadd.f32 %v354_v26, %v342_v3  ;;  %v713_v23 = vrot.slane %v712_v57, 4  ;;  %v720_v25 = vrot.slane %v719_v38, 4  ;;  %v727_v30 = vrot.slane %v726_v41, 4 }
  0xd9   :  { %v700_v34 = vadd.f32 %v699_v50, %v698_v24  ;;  %v707_v1 = vadd.f32 %v706_v16, %v705_v32  ;;  %v734_v19 = vrot.slane %v733_v20, 4  ;;  %v741_v31 = vrot.slane %v740_v42, 4  ;;  %v2643_v50 = vld [vmem:[%s4720_s2 + $0x288] sm:$0xff] }
  0xda   :  { %v356_v54 = vadd.f32 %v355_v39, %v349_v43  ;;  %v714_v46 = vadd.f32 %v713_v23, %v712_v57  ;;  %v721_v11 = vadd.f32 %v720_v25, %v719_v38  ;;  %v728_v35 = vadd.f32 %v727_v30, %v726_v41 }
  0xdb   :  { %v701_v53 = vrot.slane %v700_v34, 2  ;;  %v708_v56 = vrot.slane %v707_v1, 2  ;;  %v735_v40 = vadd.f32 %v734_v19, %v733_v20  ;;  %v742_v47 = vadd.f32 %v741_v31, %v740_v42  ;;  %v2644_v20 = vld [vmem:[%s4720_s2 + $0x290] sm:$0xff]  ;;  %v2645_v42 = vld [vmem:[%s4720_s2 + $0x298] sm:$0xff]  ;;  %v2646_v31 = vld [vmem:[%s4720_s2 + $0x2a0] sm:$0xff] }
  0xdc   :  { %357 = vadd.xlane.f32.xlu0 %v356_v54  ;;  %v715_v61 = vrot.slane %v714_v46, 2  ;;  %v722_v7 = vrot.slane %v721_v11, 2  ;;  %v729_v60 = vrot.slane %v728_v35, 2  ;;  %v747_v3 = vadd.f32 %v697_v45, %v689_v17  ;;  %v2642_v17 = vld [vmem:[%s4720_s2 + $0x280] sm:$0xff] }
  0xdd   :  { %v702_v51 = vadd.f32 %v701_v53, %v700_v34  ;;  %v709_v29 = vadd.f32 %v708_v56, %v707_v1  ;;  %v736_v36 = vrot.slane %v735_v40, 2  ;;  %v743_v44 = vrot.slane %v742_v47, 2 }
  0xde   :  { %v716_v16 = vadd.f32 %v715_v61, %v714_v46  ;;  %v723_v28 = vadd.f32 %v722_v7, %v721_v11  ;;  %v730_v27 = vadd.f32 %v729_v60, %v728_v35  ;;  %v748_v43 = vrot.slane %v747_v3, 4  ;;  %v2647_v46 = vld [vmem:[%s4720_s2 + $0x2a8] sm:$0xff]  ;;  %v2648_v11 = vld [vmem:[%s4720_s2 + $0x2b0] sm:$0xff] }
  0xdf   :  { %v703_v6 = vrot.slane %v702_v51, 1  ;;  %v710_v25 = vrot.slane %v709_v29, 1  ;;  %v737_v24 = vadd.f32 %v736_v36, %v735_v40  ;;  %v744_v32 = vadd.f32 %v743_v44, %v742_v47  ;;  %v2649_v40 = vld [vmem:[%s4720_s2 + $0x2b8] sm:$0xff]  ;;  %v2650_v47 = vld [vmem:[%s4720_s2 + $0x2c0] sm:$0xff]  ;;  %v2651_v61 = vld [vmem:[%s4720_s2 + $0x2c8] sm:$0xff] }
  0xe0   :  { %v717_v26 = vrot.slane %v716_v16, 1  ;;  %v724_v19 = vrot.slane %v723_v28, 1  ;;  %v731_v57 = vrot.slane %v730_v27, 1  ;;  %v749_v54 = vadd.f32 %v748_v43, %v747_v3  ;;  %v2652_v3 = vld [vmem:[%s4720_s2 + $0x2d0] sm:$0xff] }
  0xe1   :  { %v704_v34 = vadd.f32 %v703_v6, %v702_v51  ;;  %v711_v45 = vadd.f32 %v710_v25, %v709_v29  ;;  %v738_v38 = vrot.slane %v737_v24, 1  ;;  %v745_v41 = vrot.slane %v744_v32, 1  ;;  %v2653_v51 = vld [vmem:[%s4720_s2 + $0x2d8] sm:$0xff]  ;;  %v2654_v29 = vld [vmem:[%s4720_s2 + $0x2e0] sm:$0xff]  ;;  %v2656_v43 = vld [vmem:[%s4720_s2 + $0x2f0] sm:$0xff] }
  0xe2   :  { %v718_v39 = vadd.f32 %v717_v26, %v716_v16  ;;  %v725_v23 = vadd.f32 %v724_v19, %v723_v28  ;;  %v732_v30 = vadd.f32 %v731_v57, %v730_v27  ;;  %v750_v1 = vrot.slane %v749_v54, 2  ;;  %v2655_v27 = vld [vmem:[%s4720_s2 + $0x2e8] sm:$0xff]  ;;  %v2657_v6 = vld [vmem:[%s4720_s2 + $0x2f8] sm:$0xff] }
  0xe3   :  { %v739_v35 = vadd.f32 %v738_v38, %v737_v24  ;;  %v746_v53 = vadd.f32 %v745_v41, %v744_v32  ;;  %v754_v56 = vadd.f32 %v711_v45, %v704_v34  ;;  %v783_v7 = vmul.f32 %v2642_v17, %v3241_v4 }
  0xe4   :  { %v751_v60 = vadd.f32 %v750_v1, %v749_v54  ;;  %v784_v36 = vmul.f32 %v2643_v50, %v3243_v5  ;;  %v785_v44 = vmul.f32 %v2644_v20, %v3263_v14  ;;  %v786_v16 = vmul.f32 %v2645_v42, %v3265_v15 }
  0xe5   :  { %v755_v28 = vadd.f32 %v754_v56, %v718_v39  ;;  %v787_v25 = vmul.f32 %v2646_v31, %v3359_v8  ;;  %v788_v24 = vmul.f32 %v2647_v46, %v3361_v9  ;;  %v789_v32 = vmul.f32 %v2648_v11, %v3391_v48 }
  0xe6   :  { %v752_v26 = vrot.slane %v751_v60, 1  ;;  %v790_v19 = vmul.f32 %v2649_v40, %v3393_v49  ;;  %v791_v57 = vmul.f32 %v2650_v47, %v3276_v21  ;;  %v792_v54 = vmul.f32 %v2651_v61, %v3278_v22 }
  0xe7   :  { %v756_v17 = vadd.f32 %v755_v28, %v725_v23  ;;  %v793_v34 = vmul.f32 %v2652_v3, %v3349_v62  ;;  %v794_v45 = vmul.f32 %v2653_v51, %v3351_v63  ;;  %v795_v38 = vmul.f32 %v2654_v29, %v3404_v59 }
  0xe8   :  { %v753_v41 = vadd.f32 %v752_v26, %v751_v60  ;;  %v796_v50 = vmul.f32 %v2655_v27, %v3406_v0  ;;  %v797_v20 = vmul.f32 %v2656_v43, %v3442_v55  ;;  %v798_v42 = vmul.f32 %v2657_v6, %v3444_v33 }
  0xe9   :  { %v757_v39 = vadd.f32 %v756_v17, %v732_v30  ;;  %v799_v1 = vadd.f32 %v791_v57, %v783_v7  ;;  %v806_v31 = vadd.f32 %v792_v54, %v784_v36  ;;  %v813_v46 = vadd.f32 %v793_v34, %v785_v44 }
  0xea   :  { %v820_v11 = vadd.f32 %v794_v45, %v786_v16  ;;  %v827_v56 = vadd.f32 %v795_v38, %v787_v25  ;;  %v834_v23 = vadd.f32 %v796_v50, %v788_v24  ;;  %v841_v40 = vadd.f32 %v797_v20, %v789_v32 }
  0xeb   :  { %v758_v47 = vadd.f32 %v757_v39, %v739_v35  ;;  %v800_v61 = vrot.slane %v799_v1, 4  ;;  %v807_v3 = vrot.slane %v806_v31, 4  ;;  %v814_v51 = vrot.slane %v813_v46, 4 }
  0xec   :  { %v821_v29 = vrot.slane %v820_v11, 4  ;;  %v828_v60 = vrot.slane %v827_v56, 4  ;;  %v835_v28 = vrot.slane %v834_v23, 4  ;;  %v842_v27 = vrot.slane %v841_v40, 4 }
  0xed   :  { %v759_v26 = vadd.f32 %v758_v47, %v746_v53  ;;  %v801_v43 = vadd.f32 %v800_v61, %v799_v1  ;;  %v808_v37 = vadd.f32 %v807_v3, %v806_v31  ;;  %v815_v6 = vadd.f32 %v814_v51, %v813_v46 }
  0xee   :  { %v822_v30 = vadd.f32 %v821_v29, %v820_v11  ;;  %v829_v7 = vadd.f32 %v828_v60, %v827_v56  ;;  %v836_v36 = vadd.f32 %v835_v28, %v834_v23  ;;  %v843_v44 = vadd.f32 %v842_v27, %v841_v40  ;;  %v2610_v56 = vld [vmem:[%s4720_s2 + $0x180] sm:$0xff]  ;;  %v2613_v60 = vld [vmem:[%s4720_s2 + $0x198] sm:$0xff]  ;;  %v2615_v27 = vld [vmem:[%s4720_s2 + $0x1a8] sm:$0xff] }
  0xef   :  { %v760_v16 = vadd.f32 %v759_v26, %v753_v41  ;;  %v802_v25 = vrot.slane %v801_v43, 2  ;;  %v809_v24 = vrot.slane %v808_v37, 2  ;;  %v816_v32 = vrot.slane %v815_v6, 2  ;;  %v2614_v28 = vld [vmem:[%s4720_s2 + $0x1a0] sm:$0xff] }
  0xf0   :  { %v823_v35 = vrot.slane %v822_v30, 2  ;;  %v830_v57 = vrot.slane %v829_v7, 2  ;;  %v837_v54 = vrot.slane %v836_v36, 2  ;;  %v844_v17 = vrot.slane %v843_v44, 2 }
  0xf1   :  { %761 = vadd.xlane.f32.xlu2 %v760_v16  ;;  %v803_v34 = vadd.f32 %v802_v25, %v801_v43  ;;  %v810_v45 = vadd.f32 %v809_v24, %v808_v37  ;;  %v817_v38 = vadd.f32 %v816_v32, %v815_v6  ;;  %v848_v53 = vadd.f32 %v798_v42, %v790_v19  ;;  %v2611_v37 = vld [vmem:[%s4720_s2 + $0x188] sm:$0xff]  ;;  %v2612_v19 = vld [vmem:[%s4720_s2 + $0x190] sm:$0xff] }
  0xf2   :  { %v824_v50 = vadd.f32 %v823_v35, %v822_v30  ;;  %v831_v20 = vadd.f32 %v830_v57, %v829_v7  ;;  %v838_v39 = vadd.f32 %v837_v54, %v836_v36  ;;  %v845_v1 = vadd.f32 %v844_v17, %v843_v44  ;;  %v2616_v7 = vld [vmem:[%s4720_s2 + $0x1b0] sm:$0xff]  ;;  %v2617_v36 = vld [vmem:[%s4720_s2 + $0x1b8] sm:$0xff]  ;;  %v2618_v44 = vld [vmem:[%s4720_s2 + $0x1c0] sm:$0xff] }
  0xf3   :  { %v804_v31 = vrot.slane %v803_v34, 1  ;;  %v811_v46 = vrot.slane %v810_v45, 1  ;;  %v818_v11 = vrot.slane %v817_v38, 1  ;;  %v849_v41 = vrot.slane %v848_v53, 4  ;;  %v2619_v24 = vld [vmem:[%s4720_s2 + $0x1c8] sm:$0xff]  ;;  %v2620_v32 = vld [vmem:[%s4720_s2 + $0x1d0] sm:$0xff] }
  0xf4   :  { %v825_v23 = vrot.slane %v824_v50, 1  ;;  %v832_v40 = vrot.slane %v831_v20, 1  ;;  %v839_v47 = vrot.slane %v838_v39, 1  ;;  %v846_v61 = vrot.slane %v845_v1, 1  ;;  %v2621_v35 = vld [vmem:[%s4720_s2 + $0x1d8] sm:$0xff]  ;;  %v2622_v17 = vld [vmem:[%s4720_s2 + $0x1e0] sm:$0xff] }
  0xf5   :  { %v805_v42 = vadd.f32 %v804_v31, %v803_v34  ;;  %v812_v3 = vadd.f32 %v811_v46, %v810_v45  ;;  %v819_v51 = vadd.f32 %v818_v11, %v817_v38  ;;  %v850_v29 = vadd.f32 %v849_v41, %v848_v53  ;;  %v2623_v34 = vld [vmem:[%s4720_s2 + $0x1e8] sm:$0xff]  ;;  %v2625_v31 = vld [vmem:[%s4720_s2 + $0x1f8] sm:$0xff] }
  0xf6   :  { %v826_v26 = vadd.f32 %v825_v23, %v824_v50  ;;  %v833_v43 = vadd.f32 %v832_v40, %v831_v20  ;;  %v840_v6 = vadd.f32 %v839_v47, %v838_v39  ;;  %v847_v30 = vadd.f32 %v846_v61, %v845_v1  ;;  %v2624_v1 = vld [vmem:[%s4720_s2 + $0x1f0] sm:$0xff] }
  0xf7   :  { %v851_v16 = vrot.slane %v850_v29, 2  ;;  %v855_v25 = vadd.f32 %v812_v3, %v805_v42  ;;  %v581_v57 = vmul.f32 %v2610_v56, %v3241_v4  ;;  %v582_v54 = vmul.f32 %v2611_v37, %v3243_v5 }
  0xf8   :  { %v583_v45 = vmul.f32 %v2612_v19, %v3263_v14  ;;  %v584_v38 = vmul.f32 %v2613_v60, %v3265_v15  ;;  %v585_v53 = vmul.f32 %v2614_v28, %v3359_v8  ;;  %v586_v50 = vmul.f32 %v2615_v27, %v3361_v9 }
  0xf9   :  { %v852_v20 = vadd.f32 %v851_v16, %v850_v29  ;;  %v856_v39 = vadd.f32 %v855_v25, %v819_v51  ;;  %v587_v46 = vmul.f32 %v2616_v7, %v3391_v48  ;;  %v588_v11 = vmul.f32 %v2617_v36, %v3393_v49 }
  0xfa   :  { %v589_v41 = vmul.f32 %v2618_v44, %v3276_v21  ;;  %v590_v56 = vmul.f32 %v2619_v24, %v3278_v22  ;;  %v591_v23 = vmul.f32 %v2620_v32, %v3349_v62  ;;  %v592_v40 = vmul.f32 %v2621_v35, %v3351_v63 }
  0xfb   :  { %v853_v47 = vrot.slane %v852_v20, 1  ;;  %v857_v61 = vadd.f32 %v856_v39, %v826_v26  ;;  %v593_v37 = vmul.f32 %v2622_v17, %v3404_v59  ;;  %v594_v19 = vmul.f32 %v2623_v34, %v3406_v0 }
  0xfc   :  { %v595_v42 = vmul.f32 %v2624_v1, %v3442_v55  ;;  %v596_v3 = vmul.f32 %v2625_v31, %v3444_v33  ;;  %v597_v51 = vadd.f32 %v589_v41, %v581_v57  ;;  %v604_v29 = vadd.f32 %v590_v56, %v582_v54 }
  0xfd   :  { %v854_v60 = vadd.f32 %v853_v47, %v852_v20  ;;  %v858_v28 = vadd.f32 %v857_v61, %v833_v43  ;;  %v611_v27 = vadd.f32 %v591_v23, %v583_v45  ;;  %v618_v7 = vadd.f32 %v592_v40, %v584_v38 }
  0xfe   :  { %v598_v36 = vrot.slane %v597_v51, 4  ;;  %v605_v44 = vrot.slane %v604_v29, 4  ;;  %v625_v16 = vadd.f32 %v593_v37, %v585_v53  ;;  %v632_v25 = vadd.f32 %v594_v19, %v586_v50 }
  0xff   :  { %v859_v24 = vadd.f32 %v858_v28, %v840_v6  ;;  %v612_v26 = vrot.slane %v611_v27, 4  ;;  %v619_v32 = vrot.slane %v618_v7, 4  ;;  %v639_v35 = vadd.f32 %v595_v42, %v587_v46 }
 0x100   :  { %v599_v17 = vadd.f32 %v598_v36, %v597_v51  ;;  %v606_v34 = vadd.f32 %v605_v44, %v604_v29  ;;  %v626_v39 = vrot.slane %v625_v16, 4  ;;  %v633_v1 = vrot.slane %v632_v25, 4 }
 0x101   :  { %v860_v18 = vadd.f32 %v859_v24, %v847_v30  ;;  %v613_v31 = vadd.f32 %v612_v26, %v611_v27  ;;  %v620_v57 = vadd.f32 %v619_v32, %v618_v7  ;;  %v640_v54 = vrot.slane %v639_v35, 4  ;;  %v1511_v24 = vpop.f32.mrf.mxu3  ;;  %v2674_v26 = vld [vmem:[%s4720_s2 + $0x380] sm:$0xff] }
 0x102   :  { %v600_v20 = vrot.slane %v599_v17, 2  ;;  %v607_v43 = vrot.slane %v606_v34, 2  ;;  %v627_v45 = vadd.f32 %v626_v39, %v625_v16  ;;  %v634_v38 = vadd.f32 %v633_v1, %v632_v25  ;;  %v2677_v39 = vld [vmem:[%s4720_s2 + $0x398] sm:$0xff] }
 0x103   :  { %v861_v41 = vadd.f32 %v860_v18, %v854_v60  ;;  %v614_v56 = vrot.slane %v613_v31, 2  ;;  %v621_v53 = vrot.slane %v620_v57, 2  ;;  %v641_v50 = vadd.f32 %v640_v54, %v639_v35  ;;  %v1488_v60 = vpop.f32.mrf.mxu2 }
 0x104   :  { %v601_v6 = vadd.f32 %v600_v20, %v599_v17  ;;  %v608_v23 = vadd.f32 %v607_v43, %v606_v34  ;;  %v628_v40 = vrot.slane %v627_v45, 2  ;;  %v635_v46 = vrot.slane %v634_v38, 2  ;;  %v2675_v17 = vld [vmem:[%s4720_s2 + $0x388] sm:$0xff]  ;;  %v2676_v34 = vld [vmem:[%s4720_s2 + $0x390] sm:$0xff]  ;;  %v2678_v20 = vld [vmem:[%s4720_s2 + $0x3a0] sm:$0xff] }
 0x105   :  { %862 = vadd.xlane.f32.xlu1 %v861_v41  ;;  %v615_v47 = vadd.f32 %v614_v56, %v613_v31  ;;  %v622_v61 = vadd.f32 %v621_v53, %v620_v57  ;;  %v642_v37 = vrot.slane %v641_v50, 2  ;;  %v646_v30 = vadd.f32 %v596_v3, %v588_v11  ;;  %v2679_v43 = vld [vmem:[%s4720_s2 + $0x3a8] sm:$0xff]  ;;  %v2681_v53 = vld [vmem:[%s4720_s2 + $0x3b8] sm:$0xff] }
 0x106   :  { %v602_v19 = vrot.slane %v601_v6, 1  ;;  %v609_v42 = vrot.slane %v608_v23, 1  ;;  %v629_v51 = vadd.f32 %v628_v40, %v627_v45  ;;  %v636_v29 = vadd.f32 %v635_v46, %v634_v38  ;;  %v2680_v45 = vld [vmem:[%s4720_s2 + $0x3b0] sm:$0xff] }
 0x107   :  { %v616_v28 = vrot.slane %v615_v47, 1  ;;  %v623_v27 = vrot.slane %v622_v61, 1  ;;  %v643_v7 = vadd.f32 %v642_v37, %v641_v50  ;;  %v647_v18 = vrot.slane %v646_v30, 4  ;;  %v2682_v50 = vld [vmem:[%s4720_s2 + $0x3c0] sm:$0xff]  ;;  %v2684_v46 = vld [vmem:[%s4720_s2 + $0x3d0] sm:$0xff] }
 0x108   :  { %v603_v36 = vadd.f32 %v602_v19, %v601_v6  ;;  %v610_v44 = vadd.f32 %v609_v42, %v608_v23  ;;  %v630_v16 = vrot.slane %v629_v51, 1  ;;  %v637_v25 = vrot.slane %v636_v29, 1  ;;  %v2683_v6 = vld [vmem:[%s4720_s2 + $0x3c8] sm:$0xff] }
 0x109   :  { %v617_v32 = vadd.f32 %v616_v28, %v615_v47  ;;  %v624_v11 = vadd.f32 %v623_v27, %v622_v61  ;;  %v644_v3 = vrot.slane %v643_v7, 1  ;;  %v648_v35 = vadd.f32 %v647_v18, %v646_v30  ;;  %v2685_v47 = vld [vmem:[%s4720_s2 + $0x3d8] sm:$0xff]  ;;  %v2686_v61 = vld [vmem:[%s4720_s2 + $0x3e0] sm:$0xff] }
 0x10a   :  { %v631_v1 = vadd.f32 %v630_v16, %v629_v51  ;;  %v638_v31 = vadd.f32 %v637_v25, %v636_v29  ;;  %v653_v57 = vadd.f32 %v610_v44, %v603_v36  ;;  %v3741_v54 = vmax.f32 %v1488_v60, 0.0  ;;  %v2687_v51 = vld [vmem:[%s4720_s2 + $0x3e8] sm:$0xff]  ;;  %v2688_v29 = vld [vmem:[%s4720_s2 + $0x3f0] sm:$0xff]  ;;  %v2689_v28 = vld [vmem:[%s4720_s2 + $0x3f8] sm:$0xff] }
 0x10b   :  { %v645_v38 = vadd.f32 %v644_v3, %v643_v7  ;;  %v649_v41 = vrot.slane %v648_v35, 2  ;;  %v3752_v56 = vmax.f32 %v1511_v24, 0.0  ;;  %v985_v23 = vmul.f32 %v2674_v26, %v3241_v4 }
 0x10c   :  { %v654_v40 = vadd.f32 %v653_v57, %v617_v32  ;;  %v986_v37 = vmul.f32 %v2675_v17, %v3243_v5  ;;  %v987_v30 = vmul.f32 %v2676_v34, %v3263_v14  ;;  %v988_v19 = vmul.f32 %v2677_v39, %v3265_v15 }
 0x10d   :  { %4760 = vst [vmem:[#allocation23_spill] sm:$0xff] %v3752_v56  ;;  %v650_v42 = vadd.f32 %v649_v41, %v648_v35  ;;  %v989_v27 = vmul.f32 %v2678_v20, %v3359_v8  ;;  %v990_v7 = vmul.f32 %v2679_v43, %v3361_v9  ;;  %v991_v18 = vmul.f32 %v2680_v45, %v3391_v48 }
 0x10e   :  { %v655_v60 = vadd.f32 %v654_v40, %v624_v11  ;;  %v992_v36 = vmul.f32 %v2681_v53, %v3393_v49  ;;  %v993_v44 = vmul.f32 %v2682_v50, %v3276_v21  ;;  %v994_v16 = vmul.f32 %v2683_v6, %v3278_v22 }
 0x10f   :  { %v651_v25 = vrot.slane %v650_v42, 1  ;;  %v995_v24 = vmul.f32 %v2684_v46, %v3349_v62  ;;  %v996_v26 = vmul.f32 %v2685_v47, %v3351_v63  ;;  %v997_v32 = vmul.f32 %v2686_v61, %v3404_v59 }
 0x110   :  { %v656_v3 = vadd.f32 %v655_v60, %v631_v1  ;;  %v998_v35 = vmul.f32 %v2687_v51, %v3406_v0  ;;  %v999_v17 = vmul.f32 %v2688_v29, %v3442_v55  ;;  %v1000_v11 = vmul.f32 %v2689_v28, %v3444_v33 }
 0x111   :  { %v652_v34 = vadd.f32 %v651_v25, %v650_v42  ;;  %v1001_v39 = vadd.f32 %v993_v44, %v985_v23  ;;  %v1008_v57 = vadd.f32 %v994_v16, %v986_v37  ;;  %v1015_v20 = vadd.f32 %v995_v24, %v987_v30 }
 0x112   :  { %v657_v43 = vadd.f32 %v656_v3, %v638_v31  ;;  %v1022_v45 = vadd.f32 %v996_v26, %v988_v19  ;;  %v1029_v41 = vadd.f32 %v997_v32, %v989_v27  ;;  %v1036_v53 = vadd.f32 %v998_v35, %v990_v7 }
 0x113   :  { %v1002_v50 = vrot.slane %v1001_v39, 4  ;;  %v1009_v6 = vrot.slane %v1008_v57, 4  ;;  %v1016_v40 = vrot.slane %v1015_v20, 4  ;;  %v1043_v46 = vadd.f32 %v999_v17, %v991_v18 }
 0x114   :  { %v658_v47 = vadd.f32 %v657_v43, %v645_v38  ;;  %v1023_v1 = vrot.slane %v1022_v45, 4  ;;  %v1030_v61 = vrot.slane %v1029_v41, 4  ;;  %v1037_v51 = vrot.slane %v1036_v53, 4 }
 0x115   :  { %v1003_v60 = vadd.f32 %v1002_v50, %v1001_v39  ;;  %v1010_v29 = vadd.f32 %v1009_v6, %v1008_v57  ;;  %v1017_v56 = vadd.f32 %v1016_v40, %v1015_v20  ;;  %v1044_v28 = vrot.slane %v1043_v46, 4 }
 0x116   :  { %v659_v42 = vadd.f32 %v658_v47, %v652_v34  ;;  %v1024_v23 = vadd.f32 %v1023_v1, %v1022_v45  ;;  %v1031_v37 = vadd.f32 %v1030_v61, %v1029_v41  ;;  %v1038_v30 = vadd.f32 %v1037_v51, %v1036_v53  ;;  %v2692_v47 = vld [vmem:[%s4720_s2 + $0x410] sm:$0xff]  ;;  %v2693_v1 = vld [vmem:[%s4720_s2 + $0x418] sm:$0xff]  ;;  %v2694_v61 = vld [vmem:[%s4720_s2 + $0x420] sm:$0xff] }
 0x117   :  { %v1004_v31 = vrot.slane %v1003_v60, 2  ;;  %v1011_v19 = vrot.slane %v1010_v29, 2  ;;  %v1018_v27 = vrot.slane %v1017_v56, 2  ;;  %v1045_v7 = vadd.f32 %v1044_v28, %v1043_v46 }
 0x118   :  { %660 = vadd.xlane.f32.xlu0 %v659_v42  ;;  %v1025_v44 = vrot.slane %v1024_v23, 2  ;;  %v1032_v16 = vrot.slane %v1031_v37, 2  ;;  %v1039_v18 = vrot.slane %v1038_v30, 2  ;;  %v1050_v38 = vadd.f32 %v1000_v11, %v992_v36  ;;  %v2690_v36 = vld [vmem:[%s4720_s2 + $0x400] sm:$0xff]  ;;  %v2695_v42 = vld [vmem:[%s4720_s2 + $0x428] sm:$0xff] }
 0x119   :  { %v1005_v25 = vadd.f32 %v1004_v31, %v1003_v60  ;;  %v1012_v24 = vadd.f32 %v1011_v19, %v1010_v29  ;;  %v1019_v26 = vadd.f32 %v1018_v27, %v1017_v56  ;;  %v1046_v32 = vrot.slane %v1045_v7, 2  ;;  %v2691_v56 = vld [vmem:[%s4720_s2 + $0x408] sm:$0xff]  ;;  %v2698_v19 = vld [vmem:[%s4720_s2 + $0x440] sm:$0xff] }
 0x11a   :  { %v1026_v3 = vadd.f32 %v1025_v44, %v1024_v23  ;;  %v1033_v35 = vadd.f32 %v1032_v16, %v1031_v37  ;;  %v1040_v17 = vadd.f32 %v1039_v18, %v1038_v30  ;;  %v1051_v34 = vrot.slane %v1050_v38, 4  ;;  %v2696_v23 = vld [vmem:[%s4720_s2 + $0x430] sm:$0xff]  ;;  %v2697_v37 = vld [vmem:[%s4720_s2 + $0x438] sm:$0xff]  ;;  %v2699_v27 = vld [vmem:[%s4720_s2 + $0x448] sm:$0xff] }
 0x11b   :  { %v1006_v39 = vrot.slane %v1005_v25, 1  ;;  %v1013_v57 = vrot.slane %v1012_v24, 1  ;;  %v1020_v20 = vrot.slane %v1019_v26, 1  ;;  %v1047_v43 = vadd.f32 %v1046_v32, %v1045_v7  ;;  %v2700_v7 = vld [vmem:[%s4720_s2 + $0x450] sm:$0xff] }
 0x11c   :  { %v1027_v45 = vrot.slane %v1026_v3, 1  ;;  %v1034_v41 = vrot.slane %v1033_v35, 1  ;;  %v1041_v53 = vrot.slane %v1040_v17, 1  ;;  %v1052_v50 = vadd.f32 %v1051_v34, %v1050_v38  ;;  %v2701_v38 = vld [vmem:[%s4720_s2 + $0x458] sm:$0xff] }
 0x11d   :  { %v1007_v11 = vadd.f32 %v1006_v39, %v1005_v25  ;;  %v1014_v6 = vadd.f32 %v1013_v57, %v1012_v24  ;;  %v1021_v40 = vadd.f32 %v1020_v20, %v1019_v26  ;;  %v1048_v46 = vrot.slane %v1047_v43, 1  ;;  %v2702_v25 = vld [vmem:[%s4720_s2 + $0x460] sm:$0xff]  ;;  %v2703_v24 = vld [vmem:[%s4720_s2 + $0x468] sm:$0xff]  ;;  %v2705_v34 = vld [vmem:[%s4720_s2 + $0x478] sm:$0xff] }
 0x11e   :  { %v1028_v51 = vadd.f32 %v1027_v45, %v1026_v3  ;;  %v1035_v60 = vadd.f32 %v1034_v41, %v1033_v35  ;;  %v1042_v29 = vadd.f32 %v1041_v53, %v1040_v17  ;;  %v1053_v28 = vrot.slane %v1052_v50, 2  ;;  %v2704_v17 = vld [vmem:[%s4720_s2 + $0x470] sm:$0xff] }
 0x11f   :  { %v1049_v30 = vadd.f32 %v1048_v46, %v1047_v43  ;;  %v1057_v31 = vadd.f32 %v1014_v6, %v1007_v11  ;;  %v1086_v44 = vmul.f32 %v2690_v36, %v3241_v4  ;;  %v1087_v16 = vmul.f32 %v2691_v56, %v3243_v5 }
 0x120   :  { %v1054_v18 = vadd.f32 %v1053_v28, %v1052_v50  ;;  %v1088_v26 = vmul.f32 %v2692_v47, %v3263_v14  ;;  %v1089_v32 = vmul.f32 %v2693_v1, %v3265_v15  ;;  %v1090_v3 = vmul.f32 %v2694_v61, %v3359_v8 }
 0x121   :  { %v1058_v35 = vadd.f32 %v1057_v31, %v1021_v40  ;;  %v1091_v39 = vmul.f32 %v2695_v42, %v3361_v9  ;;  %v1092_v57 = vmul.f32 %v2696_v23, %v3391_v48  ;;  %v1093_v20 = vmul.f32 %v2697_v37, %v3393_v49 }
 0x122   :  { %v1055_v43 = vrot.slane %v1054_v18, 1  ;;  %v1094_v45 = vmul.f32 %v2698_v19, %v3276_v21  ;;  %v1095_v41 = vmul.f32 %v2699_v27, %v3278_v22  ;;  %v1096_v53 = vmul.f32 %v2700_v7, %v3349_v62 }
 0x123   :  { %v1059_v50 = vadd.f32 %v1058_v35, %v1028_v51  ;;  %v1097_v36 = vmul.f32 %v2701_v38, %v3351_v63  ;;  %v1098_v56 = vmul.f32 %v2702_v25, %v3404_v59  ;;  %v1099_v11 = vmul.f32 %v2703_v24, %v3406_v0 }
 0x124   :  { %v1056_v6 = vadd.f32 %v1055_v43, %v1054_v18  ;;  %v1100_v40 = vmul.f32 %v2704_v17, %v3442_v55  ;;  %v1101_v46 = vmul.f32 %v2705_v34, %v3444_v33  ;;  %v1102_v47 = vadd.f32 %v1094_v45, %v1086_v44 }
 0x125   :  { %v1060_v1 = vadd.f32 %v1059_v50, %v1035_v60  ;;  %v1109_v61 = vadd.f32 %v1095_v41, %v1087_v16  ;;  %v1116_v28 = vadd.f32 %v1096_v53, %v1088_v26  ;;  %v1123_v42 = vadd.f32 %v1097_v36, %v1089_v32 }
 0x126   :  { %v1103_v23 = vrot.slane %v1102_v47, 4  ;;  %v1130_v37 = vadd.f32 %v1098_v56, %v1090_v3  ;;  %v1137_v31 = vadd.f32 %v1099_v11, %v1091_v39  ;;  %v1144_v51 = vadd.f32 %v1100_v40, %v1092_v57 }
 0x127   :  { %v1061_v19 = vadd.f32 %v1060_v1, %v1042_v29  ;;  %v1110_v27 = vrot.slane %v1109_v61, 4  ;;  %v1117_v7 = vrot.slane %v1116_v28, 4  ;;  %v1124_v38 = vrot.slane %v1123_v42, 4 }
 0x128   :  { %v1104_v25 = vadd.f32 %v1103_v23, %v1102_v47  ;;  %v1131_v24 = vrot.slane %v1130_v37, 4  ;;  %v1138_v18 = vrot.slane %v1137_v31, 4  ;;  %v1145_v35 = vrot.slane %v1144_v51, 4 }
 0x129   :  { %v1062_v17 = vadd.f32 %v1061_v19, %v1049_v30  ;;  %v1111_v43 = vadd.f32 %v1110_v27, %v1109_v61  ;;  %v1118_v34 = vadd.f32 %v1117_v7, %v1116_v28  ;;  %v1125_v44 = vadd.f32 %v1124_v38, %v1123_v42  ;;  %v2661_v7 = vld [vmem:[%s4720_s2 + $0x318] sm:$0xff] }
 0x12a   :  { %v1105_v60 = vrot.slane %v1104_v25, 2  ;;  %v1132_v16 = vadd.f32 %v1131_v24, %v1130_v37  ;;  %v1139_v26 = vadd.f32 %v1138_v18, %v1137_v31  ;;  %v1146_v32 = vadd.f32 %v1145_v35, %v1144_v51  ;;  %v2658_v37 = vld [vmem:[%s4720_s2 + $0x300] sm:$0xff] }
 0x12b   :  { %v1063_v45 = vadd.f32 %v1062_v17, %v1056_v6  ;;  %v1112_v3 = vrot.slane %v1111_v43, 2  ;;  %v1119_v39 = vrot.slane %v1118_v34, 2  ;;  %v1126_v57 = vrot.slane %v1125_v44, 2  ;;  %v2662_v35 = vld [vmem:[%s4720_s2 + $0x320] sm:$0xff]  ;;  %v2663_v17 = vld [vmem:[%s4720_s2 + $0x328] sm:$0xff] }
 0x12c   :  { %v1106_v29 = vadd.f32 %v1105_v60, %v1104_v25  ;;  %v1133_v41 = vrot.slane %v1132_v16, 2  ;;  %v1140_v53 = vrot.slane %v1139_v26, 2  ;;  %v1147_v50 = vrot.slane %v1146_v32, 2 }
 0x12d   :  { %1064 = vadd.xlane.f32.xlu2 %v1063_v45  ;;  %v1113_v36 = vadd.f32 %v1112_v3, %v1111_v43  ;;  %v1120_v56 = vadd.f32 %v1119_v39, %v1118_v34  ;;  %v1127_v11 = vadd.f32 %v1126_v57, %v1125_v44  ;;  %v1151_v30 = vadd.f32 %v1101_v46, %v1093_v20  ;;  %v2659_v20 = vld [vmem:[%s4720_s2 + $0x308] sm:$0xff]  ;;  %v2660_v46 = vld [vmem:[%s4720_s2 + $0x310] sm:$0xff] }
 0x12e   :  { %v1107_v40 = vrot.slane %v1106_v29, 1  ;;  %v1134_v47 = vadd.f32 %v1133_v41, %v1132_v16  ;;  %v1141_v1 = vadd.f32 %v1140_v53, %v1139_v26  ;;  %v1148_v61 = vadd.f32 %v1147_v50, %v1146_v32  ;;  %v2664_v43 = vld [vmem:[%s4720_s2 + $0x330] sm:$0xff]  ;;  %v2665_v16 = vld [vmem:[%s4720_s2 + $0x338] sm:$0xff]  ;;  %v2666_v26 = vld [vmem:[%s4720_s2 + $0x340] sm:$0xff] }
 0x12f   :  { %v1114_v28 = vrot.slane %v1113_v36, 1  ;;  %v1121_v42 = vrot.slane %v1120_v56, 1  ;;  %v1128_v23 = vrot.slane %v1127_v11, 1  ;;  %v1152_v6 = vrot.slane %v1151_v30, 4  ;;  %v2667_v32 = vld [vmem:[%s4720_s2 + $0x348] sm:$0xff]  ;;  %v2668_v57 = vld [vmem:[%s4720_s2 + $0x350] sm:$0xff] }
 0x130   :  { %v1108_v31 = vadd.f32 %v1107_v40, %v1106_v29  ;;  %v1135_v51 = vrot.slane %v1134_v47, 1  ;;  %v1142_v19 = vrot.slane %v1141_v1, 1  ;;  %v1149_v27 = vrot.slane %v1148_v61, 1  ;;  %v2669_v29 = vld [vmem:[%s4720_s2 + $0x358] sm:$0xff]  ;;  %v2670_v41 = vld [vmem:[%s4720_s2 + $0x360] sm:$0xff] }
 0x131   :  { %v1115_v38 = vadd.f32 %v1114_v28, %v1113_v36  ;;  %v1122_v25 = vadd.f32 %v1121_v42, %v1120_v56  ;;  %v1129_v24 = vadd.f32 %v1128_v23, %v1127_v11  ;;  %v1153_v18 = vadd.f32 %v1152_v6, %v1151_v30  ;;  %v2671_v36 = vld [vmem:[%s4720_s2 + $0x368] sm:$0xff]  ;;  %v2672_v56 = vld [vmem:[%s4720_s2 + $0x370] sm:$0xff]  ;;  %v2673_v28 = vld [vmem:[%s4720_s2 + $0x378] sm:$0xff] }
 0x132   :  { %v1136_v34 = vadd.f32 %v1135_v51, %v1134_v47  ;;  %v1143_v44 = vadd.f32 %v1142_v19, %v1141_v1  ;;  %v1150_v60 = vadd.f32 %v1149_v27, %v1148_v61  ;;  %v884_v45 = vmul.f32 %v2658_v37, %v3241_v4 }
 0x133   :  { %v1154_v3 = vrot.slane %v1153_v18, 2  ;;  %v1158_v39 = vadd.f32 %v1115_v38, %v1108_v31  ;;  %v885_v53 = vmul.f32 %v2659_v20, %v3243_v5  ;;  %v886_v50 = vmul.f32 %v2660_v46, %v3263_v14 }
 0x134   :  { %v887_v11 = vmul.f32 %v2661_v7, %v3265_v15  ;;  %v888_v30 = vmul.f32 %v2662_v35, %v3359_v8  ;;  %v889_v40 = vmul.f32 %v2663_v17, %v3361_v9  ;;  %v890_v47 = vmul.f32 %v2664_v43, %v3391_v48 }
 0x135   :  { %v1155_v1 = vadd.f32 %v1154_v3, %v1153_v18  ;;  %v1159_v61 = vadd.f32 %v1158_v39, %v1122_v25  ;;  %v891_v42 = vmul.f32 %v2665_v16, %v3393_v49  ;;  %v892_v23 = vmul.f32 %v2666_v26, %v3276_v21 }
 0x136   :  { %v893_v6 = vmul.f32 %v2667_v32, %v3278_v22  ;;  %v894_v37 = vmul.f32 %v2668_v57, %v3349_v62  ;;  %v895_v31 = vmul.f32 %v2669_v29, %v3351_v63  ;;  %v896_v51 = vmul.f32 %v2670_v41, %v3404_v59 }
 0x137   :  { %v1156_v19 = vrot.slane %v1155_v1, 1  ;;  %v1160_v27 = vadd.f32 %v1159_v61, %v1129_v24  ;;  %v897_v20 = vmul.f32 %v2671_v36, %v3406_v0  ;;  %v898_v46 = vmul.f32 %v2672_v56, %v3442_v55 }
 0x138   :  { %v899_v7 = vmul.f32 %v2673_v28, %v3444_v33  ;;  %v900_v38 = vadd.f32 %v892_v23, %v884_v45  ;;  %v907_v25 = vadd.f32 %v893_v6, %v885_v53  ;;  %v914_v18 = vadd.f32 %v894_v37, %v886_v50 }
 0x139   :  { %v1157_v35 = vadd.f32 %v1156_v19, %v1155_v1  ;;  %v1161_v17 = vadd.f32 %v1160_v27, %v1136_v34  ;;  %v921_v43 = vadd.f32 %v895_v31, %v887_v11  ;;  %v928_v16 = vadd.f32 %v896_v51, %v888_v30 }
 0x13a   :  { %v901_v26 = vrot.slane %v900_v38, 4  ;;  %v908_v32 = vrot.slane %v907_v25, 4  ;;  %v915_v3 = vrot.slane %v914_v18, 4  ;;  %v935_v39 = vadd.f32 %v897_v20, %v889_v40 }
 0x13b   :  { %v1162_v57 = vadd.f32 %v1161_v17, %v1143_v44  ;;  %v922_v29 = vrot.slane %v921_v43, 4  ;;  %v929_v24 = vrot.slane %v928_v16, 4  ;;  %v942_v41 = vadd.f32 %v898_v46, %v890_v47 }
 0x13c   :  { %v902_v36 = vadd.f32 %v901_v26, %v900_v38  ;;  %v909_v61 = vadd.f32 %v908_v32, %v907_v25  ;;  %v916_v56 = vadd.f32 %v915_v3, %v914_v18  ;;  %v936_v55 = vrot.slane %v935_v39, 4  ;;  %v2787_v26 = vld [vmem:[%s4720_s2 + $0x108] sm:$0xff] }
 0x13d   :  { %v1163_v28 = vadd.f32 %v1162_v57, %v1150_v60  ;;  %v923_v45 = vadd.f32 %v922_v29, %v921_v43  ;;  %v930_v53 = vadd.f32 %v929_v24, %v928_v16  ;;  %v943_v50 = vrot.slane %v942_v41, 4  ;;  %v2786_v16 = vld [vmem:[%s4720_s2 + $0x100] sm:$0xff]  ;;  %v2789_v57 = vld [vmem:[%s4720_s2 + $0x118] sm:$0xff] }
 0x13e   :  { %v903_v1 = vrot.slane %v902_v36, 2  ;;  %v910_v34 = vrot.slane %v909_v61, 2  ;;  %v917_v11 = vrot.slane %v916_v56, 2  ;;  %v937_v30 = vadd.f32 %v936_v55, %v935_v39 }
 0x13f   :  { %v1164_v23 = vadd.f32 %v1163_v28, %v1157_v35  ;;  %v924_v6 = vrot.slane %v923_v45, 2  ;;  %v931_v37 = vrot.slane %v930_v53, 2  ;;  %v944_v40 = vadd.f32 %v943_v50, %v942_v41  ;;  %v2792_v28 = vld [vmem:[%s4720_s2 + $0x130] sm:$0xff]  ;;  %v2793_v50 = vld [vmem:[%s4720_s2 + $0x138] sm:$0xff] }
 0x140   :  { %v904_v44 = vadd.f32 %v903_v1, %v902_v36  ;;  %v911_v31 = vadd.f32 %v910_v34, %v909_v61  ;;  %v918_v51 = vadd.f32 %v917_v11, %v916_v56  ;;  %v938_v47 = vrot.slane %v937_v30, 2  ;;  %v2790_v61 = vld [vmem:[%s4720_s2 + $0x120] sm:$0xff]  ;;  %v2791_v56 = vld [vmem:[%s4720_s2 + $0x128] sm:$0xff] }
 0x141   :  { %1165 = vadd.xlane.f32.xlu1 %v1164_v23  ;;  %v925_v19 = vadd.f32 %v924_v6, %v923_v45  ;;  %v932_v27 = vadd.f32 %v931_v37, %v930_v53  ;;  %v945_v20 = vrot.slane %v944_v40, 2  ;;  %v949_v60 = vadd.f32 %v899_v7, %v891_v42  ;;  %v2788_v7 = vld [vmem:[%s4720_s2 + $0x110] sm:$0xff]  ;;  %v2794_v1 = vld [vmem:[%s4720_s2 + $0x140] sm:$0xff]  ;;  %v2795_v34 = vld [vmem:[%s4720_s2 + $0x148] sm:$0xff] }
 0x142   :  { %v905_v46 = vrot.slane %v904_v44, 1  ;;  %v912_v38 = vrot.slane %v911_v31, 1  ;;  %v919_v25 = vrot.slane %v918_v51, 1  ;;  %v939_v18 = vadd.f32 %v938_v47, %v937_v30  ;;  %v4761_v30 = vld [vmem:[#allocation15_spill] sm:$0xff] }
 0x143   :  { %v926_v17 = vrot.slane %v925_v19, 1  ;;  %v933_v43 = vrot.slane %v932_v27, 1  ;;  %v946_v55 = vadd.f32 %v945_v20, %v944_v40  ;;  %v950_v35 = vrot.slane %v949_v60, 4  ;;  %v2796_v40 = vld [vmem:[%s4720_s2 + $0x150] sm:$0xff] }
 0x144   :  { %v906_v32 = vadd.f32 %v905_v46, %v904_v44  ;;  %v913_v3 = vadd.f32 %v912_v38, %v911_v31  ;;  %v920_v39 = vadd.f32 %v919_v25, %v918_v51  ;;  %v940_v42 = vrot.slane %v939_v18, 1  ;;  %v2797_v44 = vld [vmem:[%s4720_s2 + $0x158] sm:$0xff]  ;;  %v2798_v31 = vld [vmem:[%s4720_s2 + $0x160] sm:$0xff]  ;;  %v2800_v20 = vld [vmem:[%s4720_s2 + $0x170] sm:$0xff] }
 0x145   :  { %v927_v29 = vadd.f32 %v926_v17, %v925_v19  ;;  %v934_v24 = vadd.f32 %v933_v43, %v932_v27  ;;  %v947_v41 = vrot.slane %v946_v55, 1  ;;  %v951_v36 = vadd.f32 %v950_v35, %v949_v60  ;;  %v2799_v27 = vld [vmem:[%s4720_s2 + $0x168] sm:$0xff]  ;;  %v2801_v60 = vld [vmem:[%s4720_s2 + $0x178] sm:$0xff] }
 0x146   :  { %v941_v45 = vadd.f32 %v940_v42, %v939_v18  ;;  %v956_v53 = vadd.f32 %v913_v3, %v906_v32  ;;  %v1745_v11 = vmul.f32 %v2786_v16, %v3449_v2  ;;  %v1746_v23 = vmul.f32 %v2787_v26, %v4761_v30  ;;  %v4762_v17 = vld [vmem:[#allocation20_spill] sm:$0xff]  ;;  %v4764_v16 = vld [vmem:[#allocation17_spill] sm:$0xff]  ;;  %v4765_v3 = vld [vmem:[#allocation18_spill] sm:$0xff] }
 0x147   :  { %v948_v6 = vadd.f32 %v947_v41, %v946_v55  ;;  %v952_v37 = vrot.slane %v951_v36, 2  ;;  %v1747_v51 = vmul.f32 %v2788_v7, %v3462_v10  ;;  %v1748_v47 = vmul.f32 %v2789_v57, %v3464_v58  ;;  %v4763_v55 = vld [vmem:[#allocation16_spill] sm:$0xff]  ;;  %v4766_v42 = vld [vmem:[#allocation19_spill] sm:$0xff]  ;;  %v4767_v57 = vld [vmem:[#allocation21_spill] sm:$0xff] }
 0x148   :  { %v957_v19 = vadd.f32 %v956_v53, %v920_v39  ;;  %v1749_v46 = vmul.f32 %v2790_v61, %v3484_v12  ;;  %v1750_v38 = vmul.f32 %v2791_v56, %v3486_v13  ;;  %v1751_v25 = vmul.f32 %v2792_v28, %v3538_v52  ;;  %v4768_v61 = vld [vmem:[#allocation22_spill] sm:$0xff]  ;;  %v4769_v28 = vld [vmem:[#allocation23_spill] sm:$0xff] }
 0x149   :  { %v953_v18 = vadd.f32 %v952_v37, %v951_v36  ;;  %v1752_v43 = vmul.f32 %v2793_v50, %v4762_v17  ;;  %v1753_v35 = vmul.f32 %v2794_v1, %v4763_v55  ;;  %v1754_v26 = vmul.f32 %v2795_v34, %v4764_v16 }
 0x14a   :  { %v958_v32 = vadd.f32 %v957_v19, %v927_v29  ;;  %v1755_v39 = vmul.f32 %v2796_v40, %v4765_v3  ;;  %v1756_v7 = vmul.f32 %v2797_v44, %v4766_v42  ;;  %v1757_v41 = vmul.f32 %v2798_v31, %v4767_v57 }
 0x14b   :  { %v954_v53 = vrot.slane %v953_v18, 1  ;;  %v1758_v33 = vmul.f32 %v2799_v27, %v4768_v61  ;;  %v1759_v56 = vmul.f32 %v2800_v20, %v3741_v54  ;;  %v1760_v36 = vmul.f32 %v2801_v60, %v4769_v28 }
 0x14c   :  { %v959_v37 = vadd.f32 %v958_v32, %v934_v24  ;;  %v1761_v50 = vadd.f32 %v1753_v35, %v1745_v11  ;;  %v1768_v0 = vadd.f32 %v1754_v26, %v1746_v23  ;;  %v1775_v1 = vadd.f32 %v1755_v39, %v1747_v51 }
 0x14d   :  { %v955_v59 = vadd.f32 %v954_v53, %v953_v18  ;;  %v1782_v34 = vadd.f32 %v1756_v7, %v1748_v47  ;;  %v1789_v29 = vadd.f32 %v1757_v41, %v1749_v46  ;;  %v1796_v19 = vadd.f32 %v1758_v33, %v1750_v38 }
 0x14e   :  { %v960_v40 = vadd.f32 %v959_v37, %v941_v45  ;;  %v1762_v63 = vrot.slane %v1761_v50, 4  ;;  %v1769_v44 = vrot.slane %v1768_v0, 4  ;;  %v1776_v62 = vrot.slane %v1775_v1, 4 }
 0x14f   :  { %v1783_v31 = vrot.slane %v1782_v34, 4  ;;  %v1790_v22 = vrot.slane %v1789_v29, 4  ;;  %v1797_v21 = vrot.slane %v1796_v19, 4  ;;  %v1803_v27 = vadd.f32 %v1759_v56, %v1751_v25 }
 0x150   :  { %v961_v49 = vadd.f32 %v960_v40, %v948_v6  ;;  %v1763_v20 = vadd.f32 %v1762_v63, %v1761_v50  ;;  %v1770_v48 = vadd.f32 %v1769_v44, %v1768_v0  ;;  %v1777_v60 = vadd.f32 %v1776_v62, %v1775_v1  ;;  %v2770_v50 = vld [vmem:[%s4720_s2 + $0x80] sm:$0xff] }
 0x151   :  { %v1784_v24 = vadd.f32 %v1783_v31, %v1782_v34  ;;  %v1791_v11 = vadd.f32 %v1790_v22, %v1789_v29  ;;  %v1798_v23 = vadd.f32 %v1797_v21, %v1796_v19  ;;  %v1804_v51 = vrot.slane %v1803_v27, 4  ;;  %v2772_v29 = vld [vmem:[%s4720_s2 + $0x90] sm:$0xff]  ;;  %v2773_v19 = vld [vmem:[%s4720_s2 + $0x98] sm:$0xff]  ;;  %v2774_v40 = vld [vmem:[%s4720_s2 + $0xa0] sm:$0xff] }
 0x152   :  { %v962_v18 = vadd.f32 %v961_v49, %v955_v59  ;;  %v1764_v47 = vrot.slane %v1763_v20, 2  ;;  %v1771_v46 = vrot.slane %v1770_v48, 2  ;;  %v1778_v33 = vrot.slane %v1777_v60, 2 }
 0x153   :  { %v1785_v45 = vrot.slane %v1784_v24, 2  ;;  %v1792_v38 = vrot.slane %v1791_v11, 2  ;;  %v1799_v35 = vrot.slane %v1798_v23, 2  ;;  %v1805_v26 = vadd.f32 %v1804_v51, %v1803_v27 }
 0x154   :  { %963 = vadd.xlane.f32.xlu0 %v962_v18  ;;  %v1765_v32 = vadd.f32 %v1764_v47, %v1763_v20  ;;  %v1772_v39 = vadd.f32 %v1771_v46, %v1770_v48  ;;  %v1779_v25 = vadd.f32 %v1778_v33, %v1777_v60  ;;  %v1810_v6 = vadd.f32 %v1760_v36, %v1752_v43  ;;  %v2771_v48 = vld [vmem:[%s4720_s2 + $0x88] sm:$0xff]  ;;  %v2777_v18 = vld [vmem:[%s4720_s2 + $0xb8] sm:$0xff]  ;;  %v2780_v46 = vld [vmem:[%s4720_s2 + $0xd0] sm:$0xff] }
 0x155   :  { %v1786_v63 = vadd.f32 %v1785_v45, %v1784_v24  ;;  %v1793_v0 = vadd.f32 %v1792_v38, %v1791_v11  ;;  %v1800_v62 = vadd.f32 %v1799_v35, %v1798_v23  ;;  %v1806_v7 = vrot.slane %v1805_v26, 2  ;;  %v2775_v60 = vld [vmem:[%s4720_s2 + $0xa8] sm:$0xff]  ;;  %v2776_v24 = vld [vmem:[%s4720_s2 + $0xb0] sm:$0xff]  ;;  %v2778_v11 = vld [vmem:[%s4720_s2 + $0xc0] sm:$0xff] }
 0x156   :  { %v1766_v22 = vrot.slane %v1765_v32, 1  ;;  %v1773_v21 = vrot.slane %v1772_v39, 1  ;;  %v1780_v41 = vrot.slane %v1779_v25, 1  ;;  %v1811_v49 = vrot.slane %v1810_v6, 4  ;;  %v2779_v47 = vld [vmem:[%s4720_s2 + $0xc8] sm:$0xff]  ;;  %v2781_v35 = vld [vmem:[%s4720_s2 + $0xd8] sm:$0xff] }
 0x157   :  { %v1787_v59 = vrot.slane %v1786_v63, 1  ;;  %v1794_v53 = vrot.slane %v1793_v0, 1  ;;  %v1801_v56 = vrot.slane %v1800_v62, 1  ;;  %v1807_v37 = vadd.f32 %v1806_v7, %v1805_v26  ;;  %v2782_v26 = vld [vmem:[%s4720_s2 + $0xe0] sm:$0xff]  ;;  %v2785_v7 = vld [vmem:[%s4720_s2 + $0xf8] sm:$0xff] }
 0x158   :  { %v1767_v43 = vadd.f32 %v1766_v22, %v1765_v32  ;;  %v1774_v36 = vadd.f32 %v1773_v21, %v1772_v39  ;;  %v1781_v1 = vadd.f32 %v1780_v41, %v1779_v25  ;;  %v1812_v34 = vadd.f32 %v1811_v49, %v1810_v6 }
 0x159   :  { %v1788_v44 = vadd.f32 %v1787_v59, %v1786_v63  ;;  %v1795_v31 = vadd.f32 %v1794_v53, %v1793_v0  ;;  %v1802_v27 = vadd.f32 %v1801_v56, %v1800_v62  ;;  %v1808_v20 = vrot.slane %v1807_v37, 1  ;;  %v2783_v0 = vld [vmem:[%s4720_s2 + $0xe8] sm:$0xff]  ;;  %v2784_v62 = vld [vmem:[%s4720_s2 + $0xf0] sm:$0xff] }
 0x15a   :  { %v1813_v23 = vrot.slane %v1812_v34, 2  ;;  %v1817_v51 = vadd.f32 %v1774_v36, %v1767_v43  ;;  %v1646_v33 = vmul.f32 %v2770_v50, %v3449_v2  ;;  %v1647_v45 = vmul.f32 %v2771_v48, %v4761_v30 }
 0x15b   :  { %v1809_v38 = vadd.f32 %v1808_v20, %v1807_v37  ;;  %v1648_v32 = vmul.f32 %v2772_v29, %v3462_v10  ;;  %v1649_v39 = vmul.f32 %v2773_v19, %v3464_v58  ;;  %v1650_v25 = vmul.f32 %v2774_v40, %v3484_v12 }
 0x15c   :  { %v1814_v6 = vadd.f32 %v1813_v23, %v1812_v34  ;;  %v1818_v63 = vadd.f32 %v1817_v51, %v1781_v1  ;;  %v1651_v22 = vmul.f32 %v2775_v60, %v3486_v13  ;;  %v1652_v21 = vmul.f32 %v2776_v24, %v3538_v52 }
 0x15d   :  { %v1653_v41 = vmul.f32 %v2777_v18, %v4762_v17  ;;  %v1654_v49 = vmul.f32 %v2778_v11, %v4763_v55  ;;  %v1655_v59 = vmul.f32 %v2779_v47, %v4764_v16  ;;  %v1656_v53 = vmul.f32 %v2780_v46, %v4765_v3 }
 0x15e   :  { %v1815_v56 = vrot.slane %v1814_v6, 1  ;;  %v1819_v37 = vadd.f32 %v1818_v63, %v1788_v44  ;;  %v1657_v50 = vmul.f32 %v2781_v35, %v4766_v42  ;;  %v1658_v48 = vmul.f32 %v2782_v26, %v4767_v57 }
 0x15f   :  { %v1659_v43 = vmul.f32 %v2783_v0, %v4768_v61  ;;  %v1660_v36 = vmul.f32 %v2784_v62, %v3741_v54  ;;  %v1661_v1 = vmul.f32 %v2785_v7, %v4769_v28  ;;  %v1662_v34 = vadd.f32 %v1654_v49, %v1646_v33 }
 0x160   :  { %v1816_v29 = vadd.f32 %v1815_v56, %v1814_v6  ;;  %v1820_v19 = vadd.f32 %v1819_v37, %v1795_v31  ;;  %v1669_v40 = vadd.f32 %v1655_v59, %v1647_v45  ;;  %v1676_v20 = vadd.f32 %v1656_v53, %v1648_v32 }
 0x161   :  { %v1663_v60 = vrot.slane %v1662_v34, 4  ;;  %v1683_v24 = vadd.f32 %v1657_v50, %v1649_v39  ;;  %v1690_v11 = vadd.f32 %v1658_v48, %v1650_v25  ;;  %v1697_v23 = vadd.f32 %v1659_v43, %v1651_v22 }
 0x162   :  { %v1821_v44 = vadd.f32 %v1820_v19, %v1802_v27  ;;  %v1670_v51 = vrot.slane %v1669_v40, 4  ;;  %v1677_v18 = vrot.slane %v1676_v20, 4  ;;  %v1704_v47 = vadd.f32 %v1660_v36, %v1652_v21 }
 0x163   :  { %v1664_v46 = vadd.f32 %v1663_v60, %v1662_v34  ;;  %v1684_v35 = vrot.slane %v1683_v24, 4  ;;  %v1691_v26 = vrot.slane %v1690_v11, 4  ;;  %v1698_v63 = vrot.slane %v1697_v23, 4  ;;  %v1531_v60 = vld [vmem:[%s4720_s2] sm:$0xff] }
 0x164   :  { %v1822_v0 = vadd.f32 %v1821_v44, %v1809_v38  ;;  %v1671_v62 = vadd.f32 %v1670_v51, %v1669_v40  ;;  %v1678_v7 = vadd.f32 %v1677_v18, %v1676_v20  ;;  %v1705_v33 = vrot.slane %v1704_v47, 4 }
 0x165   :  { %v1665_v6 = vrot.slane %v1664_v46, 2  ;;  %v1685_v31 = vadd.f32 %v1684_v35, %v1683_v24  ;;  %v1692_v45 = vadd.f32 %v1691_v26, %v1690_v11  ;;  %v1699_v32 = vadd.f32 %v1698_v63, %v1697_v23  ;;  %v1534_v35 = vld [vmem:[%s4720_s2 + $0x18] sm:$0xff]  ;;  %v1535_v26 = vld [vmem:[%s4720_s2 + $0x20] sm:$0xff]  ;;  %v1536_v63 = vld [vmem:[%s4720_s2 + $0x28] sm:$0xff] }
 0x166   :  { %v1823_v49 = vadd.f32 %v1822_v0, %v1816_v29  ;;  %v1672_v39 = vrot.slane %v1671_v62, 2  ;;  %v1679_v25 = vrot.slane %v1678_v7, 2  ;;  %v1706_v22 = vadd.f32 %v1705_v33, %v1704_v47  ;;  %v1537_v33 = vld [vmem:[%s4720_s2 + $0x30] sm:$0xff] }
 0x167   :  { %v1666_v27 = vadd.f32 %v1665_v6, %v1664_v46  ;;  %v1686_v59 = vrot.slane %v1685_v31, 2  ;;  %v1693_v53 = vrot.slane %v1692_v45, 2  ;;  %v1700_v21 = vrot.slane %v1699_v32, 2  ;;  %v1538_v6 = vld [vmem:[%s4720_s2 + $0x38] sm:$0xff] }
 0x168   :  { %1824 = vadd.xlane.f32.xlu2 %v1823_v49  ;;  %v1673_v56 = vadd.f32 %v1672_v39, %v1671_v62  ;;  %v1680_v37 = vadd.f32 %v1679_v25, %v1678_v7  ;;  %v1707_v50 = vrot.slane %v1706_v22, 2  ;;  %v1711_v38 = vadd.f32 %v1661_v1, %v1653_v41  ;;  %v1532_v41 = vld [vmem:[%s4720_s2 + $0x8] sm:$0xff]  ;;  %v1533_v1 = vld [vmem:[%s4720_s2 + $0x10] sm:$0xff] }
 0x169   :  { %v1667_v48 = vrot.slane %v1666_v27, 1  ;;  %v1687_v43 = vadd.f32 %v1686_v59, %v1685_v31  ;;  %v1694_v36 = vadd.f32 %v1693_v53, %v1692_v45  ;;  %v1701_v34 = vadd.f32 %v1700_v21, %v1699_v32  ;;  %v1539_v31 = vld [vmem:[%s4720_s2 + $0x40] sm:$0xff]  ;;  %v1540_v25 = vld [vmem:[%s4720_s2 + $0x48] sm:$0xff] }
 0x16a   :  { %v1674_v19 = vrot.slane %v1673_v56, 1  ;;  %v1681_v40 = vrot.slane %v1680_v37, 1  ;;  %v1708_v20 = vadd.f32 %v1707_v50, %v1706_v22  ;;  %v1712_v29 = vrot.slane %v1711_v38, 4  ;;  %v1541_v22 = vld [vmem:[%s4720_s2 + $0x50] sm:$0xff]  ;;  %v1543_v53 = vld [vmem:[%s4720_s2 + $0x60] sm:$0xff]  ;;  %v1544_v21 = vld [vmem:[%s4720_s2 + $0x68] sm:$0xff] }
 0x16b   :  { %v1668_v24 = vadd.f32 %v1667_v48, %v1666_v27  ;;  %v1688_v11 = vrot.slane %v1687_v43, 1  ;;  %v1695_v23 = vrot.slane %v1694_v36, 1  ;;  %v1702_v44 = vrot.slane %v1701_v34, 1  ;;  %v1542_v27 = vld [vmem:[%s4720_s2 + $0x58] sm:$0xff] }
 0x16c   :  { %v1675_v51 = vadd.f32 %v1674_v19, %v1673_v56  ;;  %v1682_v18 = vadd.f32 %v1681_v40, %v1680_v37  ;;  %v1709_v47 = vrot.slane %v1708_v20, 1  ;;  %v1713_v46 = vadd.f32 %v1712_v29, %v1711_v38 }
 0x16d   :  { %v1689_v0 = vadd.f32 %v1688_v11, %v1687_v43  ;;  %v1696_v62 = vadd.f32 %v1695_v23, %v1694_v36  ;;  %v1703_v7 = vadd.f32 %v1702_v44, %v1701_v34  ;;  %v1547_v45 = vmul.f32 %v1531_v60, %v3449_v2  ;;  %v1545_v36 = vld [vmem:[%s4720_s2 + $0x70] sm:$0xff]  ;;  %v1546_v34 = vld [vmem:[%s4720_s2 + $0x78] sm:$0xff] }
 0x16e   :  { %v1710_v32 = vadd.f32 %v1709_v47, %v1708_v20  ;;  %v1714_v49 = vrot.slane %v1713_v46, 2  ;;  %v1718_v39 = vadd.f32 %v1675_v51, %v1668_v24  ;;  %v1548_v59 = vmul.f32 %v1532_v41, %v4761_v30 }
 0x16f   :  { %v1549_v56 = vmul.f32 %v1533_v1, %v3462_v10  ;;  %v1550_v37 = vmul.f32 %v1534_v35, %v3464_v58  ;;  %v1551_v50 = vmul.f32 %v1535_v26, %v3484_v12  ;;  %v1552_v38 = vmul.f32 %v1536_v63, %v3486_v13 }
 0x170   :  { %v1715_v48 = vadd.f32 %v1714_v49, %v1713_v46  ;;  %v1719_v43 = vadd.f32 %v1718_v39, %v1682_v18  ;;  %v1553_v19 = vmul.f32 %v1537_v33, %v3538_v52  ;;  %v1554_v40 = vmul.f32 %v1538_v6, %v4762_v17 }
 0x171   :  { %v1555_v20 = vmul.f32 %v1539_v31, %v4763_v55  ;;  %v1556_v29 = vmul.f32 %v1540_v25, %v4764_v16  ;;  %v1557_v60 = vmul.f32 %v1541_v22, %v4765_v3  ;;  %v1558_v24 = vmul.f32 %v1542_v27, %v4766_v42 }
 0x172   :  { %v1716_v11 = vrot.slane %v1715_v48, 1  ;;  %v1720_v23 = vadd.f32 %v1719_v43, %v1689_v0  ;;  %v1559_v44 = vmul.f32 %v1543_v53, %v4767_v57  ;;  %v1560_v41 = vmul.f32 %v1544_v21, %v4768_v61 }
 0x173   :  { %v1561_v1 = vmul.f32 %v1545_v36, %v3741_v54  ;;  %v1562_v51 = vmul.f32 %v1546_v34, %v4769_v28  ;;  %v1563_v18 = vadd.f32 %v1555_v20, %v1547_v45  ;;  %v1570_v47 = vadd.f32 %v1556_v29, %v1548_v59 }
 0x174   :  { %v1717_v46 = vadd.f32 %v1716_v11, %v1715_v48  ;;  %v1721_v35 = vadd.f32 %v1720_v23, %v1696_v62  ;;  %v1577_v26 = vadd.f32 %v1557_v60, %v1549_v56  ;;  %v1584_v63 = vadd.f32 %v1558_v24, %v1550_v37 }
 0x175   :  { %v1564_v33 = vrot.slane %v1563_v18, 4  ;;  %v1571_v6 = vrot.slane %v1570_v47, 4  ;;  %v1591_v31 = vadd.f32 %v1559_v44, %v1551_v50  ;;  %v1598_v49 = vadd.f32 %v1560_v41, %v1552_v38 }
 0x176   :  { %v1722_v39 = vadd.f32 %v1721_v35, %v1703_v7  ;;  %v1578_v0 = vrot.slane %v1577_v26, 4  ;;  %v1585_v25 = vrot.slane %v1584_v63, 4  ;;  %v1605_v22 = vadd.f32 %v1561_v1, %v1553_v19 }
 0x177   :  { %v1565_v27 = vadd.f32 %v1564_v33, %v1563_v18  ;;  %v1572_v53 = vadd.f32 %v1571_v6, %v1570_v47  ;;  %v1592_v21 = vrot.slane %v1591_v31, 4  ;;  %v1599_v43 = vrot.slane %v1598_v49, 4  ;;  %v2834_v33 = vld [vmem:[%s4720_s2 + $0x280] sm:$0xff] }
 0x178   :  { %v1723_v36 = vadd.f32 %v1722_v39, %v1710_v32  ;;  %v1579_v34 = vadd.f32 %v1578_v0, %v1577_v26  ;;  %v1586_v45 = vadd.f32 %v1585_v25, %v1584_v63  ;;  %v1606_v59 = vrot.slane %v1605_v22, 4 }
 0x179   :  { %v1566_v48 = vrot.slane %v1565_v27, 2  ;;  %v1573_v62 = vrot.slane %v1572_v53, 2  ;;  %v1593_v56 = vadd.f32 %v1592_v21, %v1591_v31  ;;  %v1600_v37 = vadd.f32 %v1599_v43, %v1598_v49  ;;  %v2838_v21 = vld [vmem:[%s4720_s2 + $0x2a0] sm:$0xff]  ;;  %v2839_v43 = vld [vmem:[%s4720_s2 + $0x2a8] sm:$0xff] }
 0x17a   :  { %v1724_v20 = vadd.f32 %v1723_v36, %v1717_v46  ;;  %v1580_v29 = vrot.slane %v1579_v34, 2  ;;  %v1587_v50 = vrot.slane %v1586_v45, 2  ;;  %v1607_v38 = vadd.f32 %v1606_v59, %v1605_v22  ;;  %v2840_v59 = vld [vmem:[%s4720_s2 + $0x2b0] sm:$0xff] }
 0x17b   :  { %v1567_v7 = vadd.f32 %v1566_v48, %v1565_v27  ;;  %v1574_v60 = vadd.f32 %v1573_v62, %v1572_v53  ;;  %v1594_v24 = vrot.slane %v1593_v56, 2  ;;  %v1601_v19 = vrot.slane %v1600_v37, 2  ;;  %v2837_v53 = vld [vmem:[%s4720_s2 + $0x298] sm:$0xff]  ;;  %v2842_v62 = vld [vmem:[%s4720_s2 + $0x2c0] sm:$0xff] }
 0x17c   :  { %1725 = vadd.xlane.f32.xlu1 %v1724_v20  ;;  %v1581_v11 = vadd.f32 %v1580_v29, %v1579_v34  ;;  %v1588_v23 = vadd.f32 %v1587_v50, %v1586_v45  ;;  %v1608_v44 = vrot.slane %v1607_v38, 2  ;;  %v1612_v32 = vadd.f32 %v1562_v51, %v1554_v40  ;;  %v2835_v40 = vld [vmem:[%s4720_s2 + $0x288] sm:$0xff]  ;;  %v2836_v51 = vld [vmem:[%s4720_s2 + $0x290] sm:$0xff]  ;;  %v2841_v48 = vld [vmem:[%s4720_s2 + $0x2b8] sm:$0xff] }
 0x17d   :  { %v1568_v41 = vrot.slane %v1567_v7, 1  ;;  %v1575_v1 = vrot.slane %v1574_v60, 1  ;;  %v1595_v18 = vadd.f32 %v1594_v24, %v1593_v56  ;;  %v1602_v47 = vadd.f32 %v1601_v19, %v1600_v37  ;;  %v2843_v29 = vld [vmem:[%s4720_s2 + $0x2c8] sm:$0xff]  ;;  %v2844_v50 = vld [vmem:[%s4720_s2 + $0x2d0] sm:$0xff]  ;;  %v2846_v19 = vld [vmem:[%s4720_s2 + $0x2e0] sm:$0xff] }
 0x17e   :  { %v1582_v35 = vrot.slane %v1581_v11, 1  ;;  %v1589_v26 = vrot.slane %v1588_v23, 1  ;;  %v1609_v63 = vadd.f32 %v1608_v44, %v1607_v38  ;;  %v1613_v46 = vrot.slane %v1612_v32, 4  ;;  %v2845_v38 = vld [vmem:[%s4720_s2 + $0x2d8] sm:$0xff] }
 0x17f   :  { %v1569_v6 = vadd.f32 %v1568_v41, %v1567_v7  ;;  %v1576_v31 = vadd.f32 %v1575_v1, %v1574_v60  ;;  %v1596_v49 = vrot.slane %v1595_v18, 1  ;;  %v1603_v39 = vrot.slane %v1602_v47, 1 }
 0x180   :  { %v1583_v0 = vadd.f32 %v1582_v35, %v1581_v11  ;;  %v1590_v25 = vadd.f32 %v1589_v26, %v1588_v23  ;;  %v1610_v22 = vrot.slane %v1609_v63, 1  ;;  %v1614_v27 = vadd.f32 %v1613_v46, %v1612_v32  ;;  %v2847_v11 = vld [vmem:[%s4720_s2 + $0x2e8] sm:$0xff]  ;;  %v2848_v23 = vld [vmem:[%s4720_s2 + $0x2f0] sm:$0xff] }
 0x181   :  { %v1597_v36 = vadd.f32 %v1596_v49, %v1595_v18  ;;  %v1604_v34 = vadd.f32 %v1603_v39, %v1602_v47  ;;  %v1619_v45 = vadd.f32 %v1576_v31, %v1569_v6  ;;  %v2042_v56 = vmul.f32 %v2834_v33, %v3449_v2  ;;  %v2849_v18 = vld [vmem:[%s4720_s2 + $0x2f8] sm:$0xff] }
 0x182   :  { %v1611_v37 = vadd.f32 %v1610_v22, %v1609_v63  ;;  %v1615_v20 = vrot.slane %v1614_v27, 2  ;;  %v2043_v7 = vmul.f32 %v2835_v40, %v4761_v30  ;;  %v2044_v60 = vmul.f32 %v2836_v51, %v3462_v10 }
 0x183   :  { %v1620_v24 = vadd.f32 %v1619_v45, %v1583_v0  ;;  %v2045_v44 = vmul.f32 %v2837_v53, %v3464_v58  ;;  %v2046_v32 = vmul.f32 %v2838_v21, %v3484_v12  ;;  %v2047_v41 = vmul.f32 %v2839_v43, %v3486_v13 }
 0x184   :  { %v1616_v1 = vadd.f32 %v1615_v20, %v1614_v27  ;;  %v2048_v47 = vmul.f32 %v2840_v59, %v3538_v52  ;;  %v2049_v35 = vmul.f32 %v2841_v48, %v4762_v17  ;;  %v2050_v26 = vmul.f32 %v2842_v62, %v4763_v55 }
 0x185   :  { %v1621_v63 = vadd.f32 %v1620_v24, %v1590_v25  ;;  %v2051_v46 = vmul.f32 %v2843_v29, %v4764_v16  ;;  %v2052_v33 = vmul.f32 %v2844_v50, %v4765_v3  ;;  %v2053_v6 = vmul.f32 %v2845_v38, %v4766_v42 }
 0x186   :  { %v1617_v31 = vrot.slane %v1616_v1, 1  ;;  %v2054_v49 = vmul.f32 %v2846_v19, %v4767_v57  ;;  %v2055_v39 = vmul.f32 %v2847_v11, %v4768_v61  ;;  %v2056_v40 = vmul.f32 %v2848_v23, %v3741_v54 }
 0x187   :  { %v1622_v51 = vadd.f32 %v1621_v63, %v1597_v36  ;;  %v2057_v0 = vmul.f32 %v2849_v18, %v4769_v28  ;;  %v2058_v22 = vadd.f32 %v2050_v26, %v2042_v56  ;;  %v2065_v27 = vadd.f32 %v2051_v46, %v2043_v7 }
 0x188   :  { %v1618_v53 = vadd.f32 %v1617_v31, %v1616_v1  ;;  %v2072_v25 = vadd.f32 %v2052_v33, %v2044_v60  ;;  %v2079_v21 = vadd.f32 %v2053_v6, %v2045_v44  ;;  %v2086_v43 = vadd.f32 %v2054_v49, %v2046_v32 }
 0x189   :  { %v1623_v45 = vadd.f32 %v1622_v51, %v1604_v34  ;;  %v2059_v59 = vrot.slane %v2058_v22, 4  ;;  %v2066_v48 = vrot.slane %v2065_v27, 4  ;;  %v2093_v62 = vadd.f32 %v2055_v39, %v2047_v41 }
 0x18a   :  { %v2073_v20 = vrot.slane %v2072_v25, 4  ;;  %v2080_v29 = vrot.slane %v2079_v21, 4  ;;  %v2087_v50 = vrot.slane %v2086_v43, 4  ;;  %v2100_v38 = vadd.f32 %v2056_v40, %v2048_v47 }
 0x18b   :  { %v1624_v24 = vadd.f32 %v1623_v45, %v1611_v37  ;;  %v2060_v19 = vadd.f32 %v2059_v59, %v2058_v22  ;;  %v2067_v11 = vadd.f32 %v2066_v48, %v2065_v27  ;;  %v2094_v36 = vrot.slane %v2093_v62, 4  ;;  %v2802_v45 = vld [vmem:[%s4720_s2 + $0x180] sm:$0xff] }
 0x18c   :  { %v2074_v23 = vadd.f32 %v2073_v20, %v2072_v25  ;;  %v2081_v18 = vadd.f32 %v2080_v29, %v2079_v21  ;;  %v2088_v56 = vadd.f32 %v2087_v50, %v2086_v43  ;;  %v2101_v7 = vrot.slane %v2100_v38, 4  ;;  %v2804_v20 = vld [vmem:[%s4720_s2 + $0x190] sm:$0xff]  ;;  %v2805_v29 = vld [vmem:[%s4720_s2 + $0x198] sm:$0xff] }
 0x18d   :  { %v1625_v1 = vadd.f32 %v1624_v24, %v1618_v53  ;;  %v2061_v60 = vrot.slane %v2060_v19, 2  ;;  %v2068_v44 = vrot.slane %v2067_v11, 2  ;;  %v2095_v32 = vadd.f32 %v2094_v36, %v2093_v62  ;;  %v2807_v36 = vld [vmem:[%s4720_s2 + $0x1a8] sm:$0xff] }
 0x18e   :  { %v2075_v34 = vrot.slane %v2074_v23, 2  ;;  %v2082_v26 = vrot.slane %v2081_v18, 2  ;;  %v2089_v63 = vrot.slane %v2088_v56, 2  ;;  %v2102_v41 = vadd.f32 %v2101_v7, %v2100_v38 }
 0x18f   :  { %1626 = vadd.xlane.f32.xlu0 %v1625_v1  ;;  %v2062_v46 = vadd.f32 %v2061_v60, %v2060_v19  ;;  %v2069_v33 = vadd.f32 %v2068_v44, %v2067_v11  ;;  %v2096_v47 = vrot.slane %v2095_v32, 2  ;;  %v2107_v37 = vadd.f32 %v2057_v0, %v2049_v35  ;;  %v2803_v0 = vld [vmem:[%s4720_s2 + $0x188] sm:$0xff]  ;;  %v2806_v11 = vld [vmem:[%s4720_s2 + $0x1a0] sm:$0xff]  ;;  %v2808_v1 = vld [vmem:[%s4720_s2 + $0x1b0] sm:$0xff] }
 0x190   :  { %v2076_v6 = vadd.f32 %v2075_v34, %v2074_v23  ;;  %v2083_v31 = vadd.f32 %v2082_v26, %v2081_v18  ;;  %v2090_v49 = vadd.f32 %v2089_v63, %v2088_v56  ;;  %v2103_v39 = vrot.slane %v2102_v41, 2  ;;  %v2810_v23 = vld [vmem:[%s4720_s2 + $0x1c0] sm:$0xff]  ;;  %v2809_v60 = vld [vmem:[%s4720_s2 + $0x1b8] sm:$0xff]  ;;  %v2811_v44 = vld [vmem:[%s4720_s2 + $0x1c8] sm:$0xff] }
 0x191   :  { %v2063_v40 = vrot.slane %v2062_v46, 1  ;;  %v2070_v51 = vrot.slane %v2069_v33, 1  ;;  %v2097_v22 = vadd.f32 %v2096_v47, %v2095_v32  ;;  %v2108_v27 = vrot.slane %v2107_v37, 4  ;;  %v2812_v26 = vld [vmem:[%s4720_s2 + $0x1d0] sm:$0xff]  ;;  %v2813_v63 = vld [vmem:[%s4720_s2 + $0x1d8] sm:$0xff] }
 0x192   :  { %v2077_v53 = vrot.slane %v2076_v6, 1  ;;  %v2084_v25 = vrot.slane %v2083_v31, 1  ;;  %v2091_v21 = vrot.slane %v2090_v49, 1  ;;  %v2104_v43 = vadd.f32 %v2103_v39, %v2102_v41  ;;  %v2814_v41 = vld [vmem:[%s4720_s2 + $0x1e0] sm:$0xff]  ;;  %v2817_v39 = vld [vmem:[%s4720_s2 + $0x1f8] sm:$0xff] }
 0x193   :  { %v2064_v59 = vadd.f32 %v2063_v40, %v2062_v46  ;;  %v2071_v48 = vadd.f32 %v2070_v51, %v2069_v33  ;;  %v2098_v62 = vrot.slane %v2097_v22, 1  ;;  %v2109_v35 = vadd.f32 %v2108_v27, %v2107_v37 }
 0x194   :  { %v2078_v50 = vadd.f32 %v2077_v53, %v2076_v6  ;;  %v2085_v38 = vadd.f32 %v2084_v25, %v2083_v31  ;;  %v2092_v24 = vadd.f32 %v2091_v21, %v2090_v49  ;;  %v2105_v19 = vrot.slane %v2104_v43, 1  ;;  %v2815_v31 = vld [vmem:[%s4720_s2 + $0x1e8] sm:$0xff]  ;;  %v2816_v49 = vld [vmem:[%s4720_s2 + $0x1f0] sm:$0xff] }
 0x195   :  { %v2099_v18 = vadd.f32 %v2098_v62, %v2097_v22  ;;  %v2110_v56 = vrot.slane %v2109_v35, 2  ;;  %v2114_v7 = vadd.f32 %v2071_v48, %v2064_v59  ;;  %v1844_v32 = vmul.f32 %v2802_v45, %v3449_v2 }
 0x196   :  { %v2106_v34 = vadd.f32 %v2105_v19, %v2104_v43  ;;  %v1845_v46 = vmul.f32 %v2803_v0, %v4761_v30  ;;  %v1846_v33 = vmul.f32 %v2804_v20, %v3462_v10  ;;  %v1847_v47 = vmul.f32 %v2805_v29, %v3464_v58 }
 0x197   :  { %v2111_v37 = vadd.f32 %v2110_v56, %v2109_v35  ;;  %v2115_v6 = vadd.f32 %v2114_v7, %v2078_v50  ;;  %v1848_v40 = vmul.f32 %v2806_v11, %v3484_v12  ;;  %v1849_v51 = vmul.f32 %v2807_v36, %v3486_v13 }
 0x198   :  { %v1850_v22 = vmul.f32 %v2808_v1, %v3538_v52  ;;  %v1851_v27 = vmul.f32 %v2809_v60, %v4762_v17  ;;  %v1852_v53 = vmul.f32 %v2810_v23, %v4763_v55  ;;  %v1853_v25 = vmul.f32 %v2811_v44, %v4764_v16 }
 0x199   :  { %v2112_v21 = vrot.slane %v2111_v37, 1  ;;  %v2116_v43 = vadd.f32 %v2115_v6, %v2085_v38  ;;  %v1854_v45 = vmul.f32 %v2812_v26, %v4765_v3  ;;  %v1855_v59 = vmul.f32 %v2813_v63, %v4766_v42 }
 0x19a   :  { %v1856_v48 = vmul.f32 %v2814_v41, %v4767_v57  ;;  %v1857_v62 = vmul.f32 %v2815_v31, %v4768_v61  ;;  %v1858_v35 = vmul.f32 %v2816_v49, %v3741_v54  ;;  %v1859_v0 = vmul.f32 %v2817_v39, %v4769_v28 }
 0x19b   :  { %v2113_v20 = vadd.f32 %v2112_v21, %v2111_v37  ;;  %v2117_v29 = vadd.f32 %v2116_v43, %v2092_v24  ;;  %v1860_v50 = vadd.f32 %v1852_v53, %v1844_v32  ;;  %v1867_v19 = vadd.f32 %v1853_v25, %v1845_v46 }
 0x19c   :  { %v1874_v11 = vadd.f32 %v1854_v45, %v1846_v33  ;;  %v1881_v36 = vadd.f32 %v1855_v59, %v1847_v47  ;;  %v1888_v23 = vadd.f32 %v1856_v48, %v1848_v40  ;;  %v1895_v38 = vadd.f32 %v1857_v62, %v1849_v51 }
 0x19d   :  { %v2118_v56 = vadd.f32 %v2117_v29, %v2099_v18  ;;  %v1861_v7 = vrot.slane %v1860_v50, 4  ;;  %v1868_v1 = vrot.slane %v1867_v19, 4  ;;  %v1902_v60 = vadd.f32 %v1858_v35, %v1850_v22 }
 0x19e   :  { %v1875_v44 = vrot.slane %v1874_v11, 4  ;;  %v1882_v26 = vrot.slane %v1881_v36, 4  ;;  %v1889_v63 = vrot.slane %v1888_v23, 4  ;;  %v1896_v41 = vrot.slane %v1895_v38, 4 }
 0x19f   :  { %v2119_v6 = vadd.f32 %v2118_v56, %v2106_v34  ;;  %v1862_v31 = vadd.f32 %v1861_v7, %v1860_v50  ;;  %v1869_v49 = vadd.f32 %v1868_v1, %v1867_v19  ;;  %v1903_v39 = vrot.slane %v1902_v60, 4  ;;  %v2818_v56 = vld [vmem:[%s4720_s2 + $0x200] sm:$0xff] }
 0x1a0   :  { %v1876_v37 = vadd.f32 %v1875_v44, %v1874_v11  ;;  %v1883_v24 = vadd.f32 %v1882_v26, %v1881_v36  ;;  %v1890_v32 = vadd.f32 %v1889_v63, %v1888_v23  ;;  %v1897_v46 = vadd.f32 %v1896_v41, %v1895_v38  ;;  %v2820_v44 = vld [vmem:[%s4720_s2 + $0x210] sm:$0xff]  ;;  %v2821_v26 = vld [vmem:[%s4720_s2 + $0x218] sm:$0xff]  ;;  %v2822_v63 = vld [vmem:[%s4720_s2 + $0x220] sm:$0xff] }
 0x1a1   :  { %v2120_v33 = vadd.f32 %v2119_v6, %v2113_v20  ;;  %v1863_v47 = vrot.slane %v1862_v31, 2  ;;  %v1870_v40 = vrot.slane %v1869_v49, 2  ;;  %v1904_v51 = vadd.f32 %v1903_v39, %v1902_v60  ;;  %v2823_v39 = vld [vmem:[%s4720_s2 + $0x228] sm:$0xff] }
 0x1a2   :  { %v1877_v18 = vrot.slane %v1876_v37, 2  ;;  %v1884_v53 = vrot.slane %v1883_v24, 2  ;;  %v1891_v25 = vrot.slane %v1890_v32, 2  ;;  %v1898_v22 = vrot.slane %v1897_v46, 2 }
 0x1a3   :  { %2121 = vadd.xlane.f32.xlu2 %v2120_v33  ;;  %v1864_v21 = vadd.f32 %v1863_v47, %v1862_v31  ;;  %v1871_v43 = vadd.f32 %v1870_v40, %v1869_v49  ;;  %v1905_v45 = vrot.slane %v1904_v51, 2  ;;  %v1909_v34 = vadd.f32 %v1859_v0, %v1851_v27  ;;  %v2819_v27 = vld [vmem:[%s4720_s2 + $0x208] sm:$0xff]  ;;  %v2825_v47 = vld [vmem:[%s4720_s2 + $0x238] sm:$0xff] }
 0x1a4   :  { %v1878_v59 = vadd.f32 %v1877_v18, %v1876_v37  ;;  %v1885_v48 = vadd.f32 %v1884_v53, %v1883_v24  ;;  %v1892_v62 = vadd.f32 %v1891_v25, %v1890_v32  ;;  %v1899_v35 = vadd.f32 %v1898_v22, %v1897_v46  ;;  %v2824_v37 = vld [vmem:[%s4720_s2 + $0x230] sm:$0xff]  ;;  %v2826_v24 = vld [vmem:[%s4720_s2 + $0x240] sm:$0xff]  ;;  %v2827_v40 = vld [vmem:[%s4720_s2 + $0x248] sm:$0xff] }
 0x1a5   :  { %v1865_v29 = vrot.slane %v1864_v21, 1  ;;  %v1872_v50 = vrot.slane %v1871_v43, 1  ;;  %v1906_v19 = vadd.f32 %v1905_v45, %v1904_v51  ;;  %v1910_v20 = vrot.slane %v1909_v34, 4  ;;  %v2828_v51 = vld [vmem:[%s4720_s2 + $0x250] sm:$0xff]  ;;  %v2829_v53 = vld [vmem:[%s4720_s2 + $0x258] sm:$0xff]  ;;  %v2830_v25 = vld [vmem:[%s4720_s2 + $0x260] sm:$0xff] }
 0x1a6   :  { %v1879_v11 = vrot.slane %v1878_v59, 1  ;;  %v1886_v36 = vrot.slane %v1885_v48, 1  ;;  %v1893_v23 = vrot.slane %v1892_v62, 1  ;;  %v1900_v38 = vrot.slane %v1899_v35, 1 }
 0x1a7   :  { %v1866_v0 = vadd.f32 %v1865_v29, %v1864_v21  ;;  %v1873_v7 = vadd.f32 %v1872_v50, %v1871_v43  ;;  %v1907_v1 = vrot.slane %v1906_v19, 1  ;;  %v1911_v60 = vadd.f32 %v1910_v20, %v1909_v34 }
 0x1a8   :  { %v1880_v41 = vadd.f32 %v1879_v11, %v1878_v59  ;;  %v1887_v6 = vadd.f32 %v1886_v36, %v1885_v48  ;;  %v1894_v31 = vadd.f32 %v1893_v23, %v1892_v62  ;;  %v1901_v49 = vadd.f32 %v1900_v38, %v1899_v35  ;;  %v2831_v48 = vld [vmem:[%s4720_s2 + $0x268] sm:$0xff]  ;;  %v2832_v62 = vld [vmem:[%s4720_s2 + $0x270] sm:$0xff]  ;;  %v2833_v35 = vld [vmem:[%s4720_s2 + $0x278] sm:$0xff] }
 0x1a9   :  { %v1908_v32 = vadd.f32 %v1907_v1, %v1906_v19  ;;  %v1912_v46 = vrot.slane %v1911_v60, 2  ;;  %v1916_v33 = vadd.f32 %v1873_v7, %v1866_v0  ;;  %v1943_v18 = vmul.f32 %v2818_v56, %v3449_v2 }
 0x1aa   :  { %v1944_v22 = vmul.f32 %v2819_v27, %v4761_v30  ;;  %v1945_v21 = vmul.f32 %v2820_v44, %v3462_v10  ;;  %v1946_v43 = vmul.f32 %v2821_v26, %v3464_v58  ;;  %v1947_v45 = vmul.f32 %v2822_v63, %v3484_v12 }
 0x1ab   :  { %v1913_v34 = vadd.f32 %v1912_v46, %v1911_v60  ;;  %v1917_v59 = vadd.f32 %v1916_v33, %v1880_v41  ;;  %v1948_v29 = vmul.f32 %v2823_v39, %v3486_v13  ;;  %v1949_v50 = vmul.f32 %v2824_v37, %v3538_v52 }
 0x1ac   :  { %v1950_v19 = vmul.f32 %v2825_v47, %v4762_v17  ;;  %v1951_v20 = vmul.f32 %v2826_v24, %v4763_v55  ;;  %v1952_v11 = vmul.f32 %v2827_v40, %v4764_v16  ;;  %v1953_v36 = vmul.f32 %v2828_v51, %v4765_v3 }
 0x1ad   :  { %v1914_v23 = vrot.slane %v1913_v34, 1  ;;  %v1918_v38 = vadd.f32 %v1917_v59, %v1887_v6  ;;  %v1954_v56 = vmul.f32 %v2829_v53, %v4766_v42  ;;  %v1955_v27 = vmul.f32 %v2830_v25, %v4767_v57 }
 0x1ae   :  { %v1956_v0 = vmul.f32 %v2831_v48, %v4768_v61  ;;  %v1957_v7 = vmul.f32 %v2832_v62, %v3741_v54  ;;  %v1958_v1 = vmul.f32 %v2833_v35, %v4769_v28  ;;  %v1959_v60 = vadd.f32 %v1951_v20, %v1943_v18 }
 0x1af   :  { %v1915_v44 = vadd.f32 %v1914_v23, %v1913_v34  ;;  %v1919_v26 = vadd.f32 %v1918_v38, %v1894_v31  ;;  %v1966_v63 = vadd.f32 %v1952_v11, %v1944_v22  ;;  %v1973_v41 = vadd.f32 %v1953_v36, %v1945_v21 }
 0x1b0   :  { %v1960_v39 = vrot.slane %v1959_v60, 4  ;;  %v1980_v37 = vadd.f32 %v1954_v56, %v1946_v43  ;;  %v1987_v24 = vadd.f32 %v1955_v27, %v1947_v45  ;;  %v1994_v46 = vadd.f32 %v1956_v0, %v1948_v29 }
 0x1b1   :  { %v1920_v6 = vadd.f32 %v1919_v26, %v1901_v49  ;;  %v1967_v33 = vrot.slane %v1966_v63, 4  ;;  %v1974_v47 = vrot.slane %v1973_v41, 4  ;;  %v2001_v40 = vadd.f32 %v1957_v7, %v1949_v50 }
 0x1b2   :  { %v1961_v51 = vadd.f32 %v1960_v39, %v1959_v60  ;;  %v1981_v53 = vrot.slane %v1980_v37, 4  ;;  %v1988_v25 = vrot.slane %v1987_v24, 4  ;;  %v1995_v59 = vrot.slane %v1994_v46, 4  ;;  %v2882_v39 = vld [vmem:[%s4720_s2 + $0x400] sm:$0xff] }
 0x1b3   :  { %v1921_v48 = vadd.f32 %v1920_v6, %v1908_v32  ;;  %v1968_v62 = vadd.f32 %v1967_v33, %v1966_v63  ;;  %v1975_v35 = vadd.f32 %v1974_v47, %v1973_v41  ;;  %v2002_v18 = vrot.slane %v2001_v40, 4 }
 0x1b4   :  { %v1962_v34 = vrot.slane %v1961_v51, 2  ;;  %v1982_v31 = vadd.f32 %v1981_v53, %v1980_v37  ;;  %v1989_v22 = vadd.f32 %v1988_v25, %v1987_v24  ;;  %v1996_v21 = vadd.f32 %v1995_v59, %v1994_v46  ;;  %v2885_v53 = vld [vmem:[%s4720_s2 + $0x418] sm:$0xff]  ;;  %v2886_v25 = vld [vmem:[%s4720_s2 + $0x420] sm:$0xff]  ;;  %v2887_v59 = vld [vmem:[%s4720_s2 + $0x428] sm:$0xff] }
 0x1b5   :  { %v1922_v20 = vadd.f32 %v1921_v48, %v1915_v44  ;;  %v1969_v43 = vrot.slane %v1968_v62, 2  ;;  %v1976_v45 = vrot.slane %v1975_v35, 2  ;;  %v2003_v29 = vadd.f32 %v2002_v18, %v2001_v40  ;;  %v2888_v18 = vld [vmem:[%s4720_s2 + $0x430] sm:$0xff] }
 0x1b6   :  { %v1963_v49 = vadd.f32 %v1962_v34, %v1961_v51  ;;  %v1983_v11 = vrot.slane %v1982_v31, 2  ;;  %v1990_v36 = vrot.slane %v1989_v22, 2  ;;  %v1997_v50 = vrot.slane %v1996_v21, 2  ;;  %v2889_v34 = vld [vmem:[%s4720_s2 + $0x438] sm:$0xff] }
 0x1b7   :  { %1923 = vadd.xlane.f32.xlu1 %v1922_v20  ;;  %v1970_v23 = vadd.f32 %v1969_v43, %v1968_v62  ;;  %v1977_v38 = vadd.f32 %v1976_v45, %v1975_v35  ;;  %v2004_v56 = vrot.slane %v2003_v29, 2  ;;  %v2008_v32 = vadd.f32 %v1958_v1, %v1950_v19  ;;  %v2883_v19 = vld [vmem:[%s4720_s2 + $0x408] sm:$0xff]  ;;  %v2884_v1 = vld [vmem:[%s4720_s2 + $0x410] sm:$0xff] }
 0x1b8   :  { %v1964_v27 = vrot.slane %v1963_v49, 1  ;;  %v1984_v0 = vadd.f32 %v1983_v11, %v1982_v31  ;;  %v1991_v7 = vadd.f32 %v1990_v36, %v1989_v22  ;;  %v1998_v60 = vadd.f32 %v1997_v50, %v1996_v21  ;;  %v2890_v31 = vld [vmem:[%s4720_s2 + $0x440] sm:$0xff]  ;;  %v2891_v45 = vld [vmem:[%s4720_s2 + $0x448] sm:$0xff] }
 0x1b9   :  { %v1971_v26 = vrot.slane %v1970_v23, 1  ;;  %v1978_v63 = vrot.slane %v1977_v38, 1  ;;  %v2005_v41 = vadd.f32 %v2004_v56, %v2003_v29  ;;  %v2009_v44 = vrot.slane %v2008_v32, 4  ;;  %v2892_v29 = vld [vmem:[%s4720_s2 + $0x450] sm:$0xff]  ;;  %v2894_v36 = vld [vmem:[%s4720_s2 + $0x460] sm:$0xff]  ;;  %v2895_v50 = vld [vmem:[%s4720_s2 + $0x468] sm:$0xff] }
 0x1ba   :  { %v1965_v37 = vadd.f32 %v1964_v27, %v1963_v49  ;;  %v1985_v24 = vrot.slane %v1984_v0, 1  ;;  %v1992_v46 = vrot.slane %v1991_v7, 1  ;;  %v1999_v6 = vrot.slane %v1998_v60, 1  ;;  %v2893_v49 = vld [vmem:[%s4720_s2 + $0x458] sm:$0xff] }
 0x1bb   :  { %v1972_v33 = vadd.f32 %v1971_v26, %v1970_v23  ;;  %v1979_v47 = vadd.f32 %v1978_v63, %v1977_v38  ;;  %v2006_v40 = vrot.slane %v2005_v41, 1  ;;  %v2010_v51 = vadd.f32 %v2009_v44, %v2008_v32 }
 0x1bc   :  { %v1986_v48 = vadd.f32 %v1985_v24, %v1984_v0  ;;  %v1993_v62 = vadd.f32 %v1992_v46, %v1991_v7  ;;  %v2000_v35 = vadd.f32 %v1999_v6, %v1998_v60  ;;  %v2339_v22 = vmul.f32 %v2882_v39, %v3449_v2  ;;  %v2896_v7 = vld [vmem:[%s4720_s2 + $0x470] sm:$0xff]  ;;  %v2897_v60 = vld [vmem:[%s4720_s2 + $0x478] sm:$0xff] }
 0x1bd   :  { %v2007_v21 = vadd.f32 %v2006_v40, %v2005_v41  ;;  %v2011_v20 = vrot.slane %v2010_v51, 2  ;;  %v2015_v43 = vadd.f32 %v1972_v33, %v1965_v37  ;;  %v2340_v11 = vmul.f32 %v2883_v19, %v4761_v30 }
 0x1be   :  { %v2341_v23 = vmul.f32 %v2884_v1, %v3462_v10  ;;  %v2342_v38 = vmul.f32 %v2885_v53, %v3464_v58  ;;  %v2343_v56 = vmul.f32 %v2886_v25, %v3484_v12  ;;  %v2344_v32 = vmul.f32 %v2887_v59, %v3486_v13 }
 0x1bf   :  { %v2012_v27 = vadd.f32 %v2011_v20, %v2010_v51  ;;  %v2016_v0 = vadd.f32 %v2015_v43, %v1979_v47  ;;  %v2345_v26 = vmul.f32 %v2888_v18, %v3538_v52  ;;  %v2346_v63 = vmul.f32 %v2889_v34, %v4762_v17 }
 0x1c0   :  { %v2347_v41 = vmul.f32 %v2890_v31, %v4763_v55  ;;  %v2348_v44 = vmul.f32 %v2891_v45, %v4764_v16  ;;  %v2349_v39 = vmul.f32 %v2892_v29, %v4765_v3  ;;  %v2350_v37 = vmul.f32 %v2893_v49, %v4766_v42 }
 0x1c1   :  { %v2013_v24 = vrot.slane %v2012_v27, 1  ;;  %v2017_v46 = vadd.f32 %v2016_v0, %v1986_v48  ;;  %v2351_v6 = vmul.f32 %v2894_v36, %v4767_v57  ;;  %v2352_v19 = vmul.f32 %v2895_v50, %v4768_v61 }
 0x1c2   :  { %v2353_v1 = vmul.f32 %v2896_v7, %v3741_v54  ;;  %v2354_v33 = vmul.f32 %v2897_v60, %v4769_v28  ;;  %v2355_v47 = vadd.f32 %v2347_v41, %v2339_v22  ;;  %v2362_v40 = vadd.f32 %v2348_v44, %v2340_v11 }
 0x1c3   :  { %v2014_v51 = vadd.f32 %v2013_v24, %v2012_v27  ;;  %v2018_v53 = vadd.f32 %v2017_v46, %v1993_v62  ;;  %v2369_v25 = vadd.f32 %v2349_v39, %v2341_v23  ;;  %v2376_v59 = vadd.f32 %v2350_v37, %v2342_v38 }
 0x1c4   :  { %v2356_v18 = vrot.slane %v2355_v47, 4  ;;  %v2363_v34 = vrot.slane %v2362_v40, 4  ;;  %v2383_v31 = vadd.f32 %v2351_v6, %v2343_v56  ;;  %v2390_v20 = vadd.f32 %v2352_v19, %v2344_v32 }
 0x1c5   :  { %v2019_v43 = vadd.f32 %v2018_v53, %v2000_v35  ;;  %v2370_v48 = vrot.slane %v2369_v25, 4  ;;  %v2377_v45 = vrot.slane %v2376_v59, 4  ;;  %v2397_v29 = vadd.f32 %v2353_v1, %v2345_v26 }
 0x1c6   :  { %v2357_v49 = vadd.f32 %v2356_v18, %v2355_v47  ;;  %v2364_v36 = vadd.f32 %v2363_v34, %v2362_v40  ;;  %v2384_v50 = vrot.slane %v2383_v31, 4  ;;  %v2391_v0 = vrot.slane %v2390_v20, 4  ;;  %v2850_v18 = vld [vmem:[%s4720_s2 + $0x300] sm:$0xff] }
 0x1c7   :  { %v2020_v7 = vadd.f32 %v2019_v43, %v2007_v21  ;;  %v2371_v60 = vadd.f32 %v2370_v48, %v2369_v25  ;;  %v2378_v22 = vadd.f32 %v2377_v45, %v2376_v59  ;;  %v2398_v11 = vrot.slane %v2397_v29, 4 }
 0x1c8   :  { %v2358_v27 = vrot.slane %v2357_v49, 2  ;;  %v2365_v62 = vrot.slane %v2364_v36, 2  ;;  %v2385_v23 = vadd.f32 %v2384_v50, %v2383_v31  ;;  %v2392_v38 = vadd.f32 %v2391_v0, %v2390_v20  ;;  %v2854_v50 = vld [vmem:[%s4720_s2 + $0x320] sm:$0xff]  ;;  %v2855_v0 = vld [vmem:[%s4720_s2 + $0x328] sm:$0xff] }
 0x1c9   :  { %v2021_v41 = vadd.f32 %v2020_v7, %v2014_v51  ;;  %v2372_v44 = vrot.slane %v2371_v60, 2  ;;  %v2379_v56 = vrot.slane %v2378_v22, 2  ;;  %v2399_v32 = vadd.f32 %v2398_v11, %v2397_v29  ;;  %v2856_v11 = vld [vmem:[%s4720_s2 + $0x330] sm:$0xff] }
 0x1ca   :  { %v2359_v35 = vadd.f32 %v2358_v27, %v2357_v49  ;;  %v2366_v39 = vadd.f32 %v2365_v62, %v2364_v36  ;;  %v2386_v37 = vrot.slane %v2385_v23, 2  ;;  %v2393_v26 = vrot.slane %v2392_v38, 2  ;;  %v2853_v36 = vld [vmem:[%s4720_s2 + $0x318] sm:$0xff]  ;;  %v2858_v62 = vld [vmem:[%s4720_s2 + $0x340] sm:$0xff] }
 0x1cb   :  { %2022 = vadd.xlane.f32.xlu0 %v2021_v41  ;;  %v2373_v24 = vadd.f32 %v2372_v44, %v2371_v60  ;;  %v2380_v46 = vadd.f32 %v2379_v56, %v2378_v22  ;;  %v2400_v6 = vrot.slane %v2399_v32, 2  ;;  %v2404_v21 = vadd.f32 %v2354_v33, %v2346_v63  ;;  %v2851_v63 = vld [vmem:[%s4720_s2 + $0x308] sm:$0xff]  ;;  %v2852_v33 = vld [vmem:[%s4720_s2 + $0x310] sm:$0xff]  ;;  %v2857_v27 = vld [vmem:[%s4720_s2 + $0x338] sm:$0xff] }
 0x1cc   :  { %v2360_v19 = vrot.slane %v2359_v35, 1  ;;  %v2367_v1 = vrot.slane %v2366_v39, 1  ;;  %v2387_v47 = vadd.f32 %v2386_v37, %v2385_v23  ;;  %v2394_v40 = vadd.f32 %v2393_v26, %v2392_v38  ;;  %v2859_v44 = vld [vmem:[%s4720_s2 + $0x348] sm:$0xff]  ;;  %v2860_v56 = vld [vmem:[%s4720_s2 + $0x350] sm:$0xff]  ;;  %v2862_v26 = vld [vmem:[%s4720_s2 + $0x360] sm:$0xff] }
 0x1cd   :  { %v2374_v53 = vrot.slane %v2373_v24, 1  ;;  %v2381_v25 = vrot.slane %v2380_v46, 1  ;;  %v2401_v59 = vadd.f32 %v2400_v6, %v2399_v32  ;;  %v2405_v51 = vrot.slane %v2404_v21, 4  ;;  %v2861_v32 = vld [vmem:[%s4720_s2 + $0x358] sm:$0xff] }
 0x1ce   :  { %v2361_v34 = vadd.f32 %v2360_v19, %v2359_v35  ;;  %v2368_v31 = vadd.f32 %v2367_v1, %v2366_v39  ;;  %v2388_v20 = vrot.slane %v2387_v47, 1  ;;  %v2395_v43 = vrot.slane %v2394_v40, 1 }
 0x1cf   :  { %v2375_v48 = vadd.f32 %v2374_v53, %v2373_v24  ;;  %v2382_v45 = vadd.f32 %v2381_v25, %v2380_v46  ;;  %v2402_v29 = vrot.slane %v2401_v59, 1  ;;  %v2406_v49 = vadd.f32 %v2405_v51, %v2404_v21  ;;  %v2863_v24 = vld [vmem:[%s4720_s2 + $0x368] sm:$0xff]  ;;  %v2864_v46 = vld [vmem:[%s4720_s2 + $0x370] sm:$0xff] }
 0x1d0   :  { %v2389_v7 = vadd.f32 %v2388_v20, %v2387_v47  ;;  %v2396_v60 = vadd.f32 %v2395_v43, %v2394_v40  ;;  %v2411_v22 = vadd.f32 %v2368_v31, %v2361_v34  ;;  %v2141_v23 = vmul.f32 %v2850_v18, %v3449_v2  ;;  %v2865_v47 = vld [vmem:[%s4720_s2 + $0x378] sm:$0xff] }
 0x1d1   :  { %v2403_v38 = vadd.f32 %v2402_v29, %v2401_v59  ;;  %v2407_v41 = vrot.slane %v2406_v49, 2  ;;  %v2142_v35 = vmul.f32 %v2851_v63, %v4761_v30  ;;  %v2143_v39 = vmul.f32 %v2852_v33, %v3462_v10 }
 0x1d2   :  { %v2412_v37 = vadd.f32 %v2411_v22, %v2375_v48  ;;  %v2144_v6 = vmul.f32 %v2853_v36, %v3464_v58  ;;  %v2145_v21 = vmul.f32 %v2854_v50, %v3484_v12  ;;  %v2146_v19 = vmul.f32 %v2855_v0, %v3486_v13 }
 0x1d3   :  { %v2408_v1 = vadd.f32 %v2407_v41, %v2406_v49  ;;  %v2147_v40 = vmul.f32 %v2856_v11, %v3538_v52  ;;  %v2148_v53 = vmul.f32 %v2857_v27, %v4762_v17  ;;  %v2149_v25 = vmul.f32 %v2858_v62, %v4763_v55 }
 0x1d4   :  { %v2413_v59 = vadd.f32 %v2412_v37, %v2382_v45  ;;  %v2150_v51 = vmul.f32 %v2859_v44, %v4764_v16  ;;  %v2151_v18 = vmul.f32 %v2860_v56, %v4765_v3  ;;  %v2152_v34 = vmul.f32 %v2861_v32, %v4766_v42 }
 0x1d5   :  { %v2409_v31 = vrot.slane %v2408_v1, 1  ;;  %v2153_v20 = vmul.f32 %v2862_v26, %v4767_v57  ;;  %v2154_v43 = vmul.f32 %v2863_v24, %v4768_v61  ;;  %v2155_v63 = vmul.f32 %v2864_v46, %v3741_v54 }
 0x1d6   :  { %v2414_v33 = vadd.f32 %v2413_v59, %v2389_v7  ;;  %v2156_v48 = vmul.f32 %v2865_v47, %v4769_v28  ;;  %v2157_v29 = vadd.f32 %v2149_v25, %v2141_v23  ;;  %v2164_v49 = vadd.f32 %v2150_v51, %v2142_v35 }
 0x1d7   :  { %v2410_v36 = vadd.f32 %v2409_v31, %v2408_v1  ;;  %v2171_v45 = vadd.f32 %v2151_v18, %v2143_v39  ;;  %v2178_v50 = vadd.f32 %v2152_v34, %v2144_v6  ;;  %v2185_v0 = vadd.f32 %v2153_v20, %v2145_v21 }
 0x1d8   :  { %v2415_v22 = vadd.f32 %v2414_v33, %v2396_v60  ;;  %v2158_v11 = vrot.slane %v2157_v29, 4  ;;  %v2165_v27 = vrot.slane %v2164_v49, 4  ;;  %v2192_v62 = vadd.f32 %v2154_v43, %v2146_v19 }
 0x1d9   :  { %v2172_v41 = vrot.slane %v2171_v45, 4  ;;  %v2179_v44 = vrot.slane %v2178_v50, 4  ;;  %v2186_v56 = vrot.slane %v2185_v0, 4  ;;  %v2199_v32 = vadd.f32 %v2155_v63, %v2147_v40 }
 0x1da   :  { %v2416_v37 = vadd.f32 %v2415_v22, %v2403_v38  ;;  %v2159_v26 = vadd.f32 %v2158_v11, %v2157_v29  ;;  %v2166_v24 = vadd.f32 %v2165_v27, %v2164_v49  ;;  %v2193_v7 = vrot.slane %v2192_v62, 4  ;;  %v2866_v22 = vld [vmem:[%s4720_s2 + $0x380] sm:$0xff] }
 0x1db   :  { %v2173_v46 = vadd.f32 %v2172_v41, %v2171_v45  ;;  %v2180_v47 = vadd.f32 %v2179_v44, %v2178_v50  ;;  %v2187_v23 = vadd.f32 %v2186_v56, %v2185_v0  ;;  %v2200_v35 = vrot.slane %v2199_v32, 4  ;;  %v2868_v41 = vld [vmem:[%s4720_s2 + $0x390] sm:$0xff]  ;;  %v2869_v44 = vld [vmem:[%s4720_s2 + $0x398] sm:$0xff] }
 0x1dc   :  { %v2417_v1 = vadd.f32 %v2416_v37, %v2410_v36  ;;  %v2160_v39 = vrot.slane %v2159_v26, 2  ;;  %v2167_v6 = vrot.slane %v2166_v24, 2  ;;  %v2194_v21 = vadd.f32 %v2193_v7, %v2192_v62  ;;  %v2871_v7 = vld [vmem:[%s4720_s2 + $0x3a8] sm:$0xff] }
 0x1dd   :  { %v2174_v60 = vrot.slane %v2173_v46, 2  ;;  %v2181_v25 = vrot.slane %v2180_v47, 2  ;;  %v2188_v59 = vrot.slane %v2187_v23, 2  ;;  %v2201_v19 = vadd.f32 %v2200_v35, %v2199_v32 }
 0x1de   :  { %2418 = vadd.xlane.f32.xlu2 %v2417_v1  ;;  %v2161_v51 = vadd.f32 %v2160_v39, %v2159_v26  ;;  %v2168_v18 = vadd.f32 %v2167_v6, %v2166_v24  ;;  %v2195_v40 = vrot.slane %v2194_v21, 2  ;;  %v2206_v38 = vadd.f32 %v2156_v48, %v2148_v53  ;;  %v2867_v48 = vld [vmem:[%s4720_s2 + $0x388] sm:$0xff]  ;;  %v2870_v24 = vld [vmem:[%s4720_s2 + $0x3a0] sm:$0xff]  ;;  %v2872_v1 = vld [vmem:[%s4720_s2 + $0x3b0] sm:$0xff] }
 0x1df   :  { %v2175_v34 = vadd.f32 %v2174_v60, %v2173_v46  ;;  %v2182_v31 = vadd.f32 %v2181_v25, %v2180_v47  ;;  %v2189_v20 = vadd.f32 %v2188_v59, %v2187_v23  ;;  %v2202_v43 = vrot.slane %v2201_v19, 2  ;;  %v2874_v46 = vld [vmem:[%s4720_s2 + $0x3c0] sm:$0xff]  ;;  %v2873_v39 = vld [vmem:[%s4720_s2 + $0x3b8] sm:$0xff]  ;;  %v2875_v6 = vld [vmem:[%s4720_s2 + $0x3c8] sm:$0xff] }
 0x1e0   :  { %v2162_v63 = vrot.slane %v2161_v51, 1  ;;  %v2169_v33 = vrot.slane %v2168_v18, 1  ;;  %v2196_v29 = vadd.f32 %v2195_v40, %v2194_v21  ;;  %v2207_v49 = vrot.slane %v2206_v38, 4  ;;  %v2876_v25 = vld [vmem:[%s4720_s2 + $0x3d0] sm:$0xff]  ;;  %v2877_v59 = vld [vmem:[%s4720_s2 + $0x3d8] sm:$0xff] }
 0x1e1   :  { %v2176_v36 = vrot.slane %v2175_v34, 1  ;;  %v2183_v45 = vrot.slane %v2182_v31, 1  ;;  %v2190_v50 = vrot.slane %v2189_v20, 1  ;;  %v2203_v0 = vadd.f32 %v2202_v43, %v2201_v19  ;;  %v2878_v19 = vld [vmem:[%s4720_s2 + $0x3e0] sm:$0xff]  ;;  %v2881_v43 = vld [vmem:[%s4720_s2 + $0x3f8] sm:$0xff] }
 0x1e2   :  { %v2163_v11 = vadd.f32 %v2162_v63, %v2161_v51  ;;  %v2170_v27 = vadd.f32 %v2169_v33, %v2168_v18  ;;  %v2197_v62 = vrot.slane %v2196_v29, 1  ;;  %v2208_v53 = vadd.f32 %v2207_v49, %v2206_v38 }
 0x1e3   :  { %v2177_v56 = vadd.f32 %v2176_v36, %v2175_v34  ;;  %v2184_v32 = vadd.f32 %v2183_v45, %v2182_v31  ;;  %v2191_v37 = vadd.f32 %v2190_v50, %v2189_v20  ;;  %v2204_v26 = vrot.slane %v2203_v0, 1  ;;  %v2879_v31 = vld [vmem:[%s4720_s2 + $0x3e8] sm:$0xff]  ;;  %v2880_v20 = vld [vmem:[%s4720_s2 + $0x3f0] sm:$0xff] }
 0x1e4   :  { %v2198_v47 = vadd.f32 %v2197_v62, %v2196_v29  ;;  %v2209_v23 = vrot.slane %v2208_v53, 2  ;;  %v2213_v35 = vadd.f32 %v2170_v27, %v2163_v11  ;;  %v2240_v21 = vmul.f32 %v2866_v22, %v3449_v2 }
 0x1e5   :  { %v2205_v60 = vadd.f32 %v2204_v26, %v2203_v0  ;;  %v2241_v51 = vmul.f32 %v2867_v48, %v4761_v30  ;;  %v2242_v18 = vmul.f32 %v2868_v41, %v3462_v10  ;;  %v2243_v40 = vmul.f32 %v2869_v44, %v3464_v58 }
 0x1e6   :  { %v2210_v38 = vadd.f32 %v2209_v23, %v2208_v53  ;;  %v2214_v34 = vadd.f32 %v2213_v35, %v2177_v56  ;;  %v2244_v63 = vmul.f32 %v2870_v24, %v3484_v12  ;;  %v2245_v33 = vmul.f32 %v2871_v7, %v3486_v13 }
 0x1e7   :  { %v2246_v29 = vmul.f32 %v2872_v1, %v3538_v52  ;;  %v2247_v49 = vmul.f32 %v2873_v39, %v4762_v17  ;;  %v2248_v36 = vmul.f32 %v2874_v46, %v4763_v55  ;;  %v2249_v45 = vmul.f32 %v2875_v6, %v4764_v16 }
 0x1e8   :  { %v2211_v50 = vrot.slane %v2210_v38, 1  ;;  %v2215_v0 = vadd.f32 %v2214_v34, %v2184_v32  ;;  %v2250_v22 = vmul.f32 %v2876_v25, %v4765_v3  ;;  %v2251_v11 = vmul.f32 %v2877_v59, %v4766_v42 }
 0x1e9   :  { %v2252_v27 = vmul.f32 %v2878_v19, %v4767_v57  ;;  %v2253_v62 = vmul.f32 %v2879_v31, %v4768_v61  ;;  %v2254_v53 = vmul.f32 %v2880_v20, %v3741_v54  ;;  %v2255_v48 = vmul.f32 %v2881_v43, %v4769_v28 }
 0x1ea   :  { %v2212_v41 = vadd.f32 %v2211_v50, %v2210_v38  ;;  %v2216_v44 = vadd.f32 %v2215_v0, %v2191_v37  ;;  %v2256_v56 = vadd.f32 %v2248_v36, %v2240_v21  ;;  %v2263_v26 = vadd.f32 %v2249_v45, %v2241_v51 }
 0x1eb   :  { %v2270_v24 = vadd.f32 %v2250_v22, %v2242_v18  ;;  %v2277_v7 = vadd.f32 %v2251_v11, %v2243_v40  ;;  %v2284_v46 = vadd.f32 %v2252_v27, %v2244_v63  ;;  %v2291_v32 = vadd.f32 %v2253_v62, %v2245_v33 }
 0x1ec   :  { %v2217_v23 = vadd.f32 %v2216_v44, %v2198_v47  ;;  %v2257_v35 = vrot.slane %v2256_v56, 4  ;;  %v2264_v1 = vrot.slane %v2263_v26, 4  ;;  %v2298_v39 = vadd.f32 %v2254_v53, %v2246_v29 }
 0x1ed   :  { %v2271_v6 = vrot.slane %v2270_v24, 4  ;;  %v2278_v25 = vrot.slane %v2277_v7, 4  ;;  %v2285_v59 = vrot.slane %v2284_v46, 4  ;;  %v2292_v19 = vrot.slane %v2291_v32, 4 }
 0x1ee   :  { %v2218_v34 = vadd.f32 %v2217_v23, %v2205_v60  ;;  %v2258_v31 = vadd.f32 %v2257_v35, %v2256_v56  ;;  %v2265_v20 = vadd.f32 %v2264_v1, %v2263_v26  ;;  %v2299_v43 = vrot.slane %v2298_v39, 4 }
 0x1ef   :  { %v2272_v38 = vadd.f32 %v2271_v6, %v2270_v24  ;;  %v2279_v37 = vadd.f32 %v2278_v25, %v2277_v7  ;;  %v2286_v21 = vadd.f32 %v2285_v59, %v2284_v46  ;;  %v2293_v51 = vadd.f32 %v2292_v19, %v2291_v32  ;;  %v4509_v19 = vld [vmem:[%s4720_s2 + $0x488] sm:$0xff] }
 0x1f0   :  { %v2219_v18 = vadd.f32 %v2218_v34, %v2212_v41  ;;  %v2259_v40 = vrot.slane %v2258_v31, 2  ;;  %v2266_v63 = vrot.slane %v2265_v20, 2  ;;  %v2300_v33 = vadd.f32 %v2299_v43, %v2298_v39  ;;  %v4514_v43 = vld [vmem:[%s4720_s2 + $0x490] sm:$0xff] }
 0x1f1   :  { %v2273_v47 = vrot.slane %v2272_v38, 2  ;;  %v2280_v36 = vrot.slane %v2279_v37, 2  ;;  %v2287_v45 = vrot.slane %v2286_v21, 2  ;;  %v2294_v29 = vrot.slane %v2293_v51, 2 }
 0x1f2   :  { %2220 = vadd.xlane.f32.xlu1 %v2219_v18  ;;  %v2260_v50 = vadd.f32 %v2259_v40, %v2258_v31  ;;  %v2267_v0 = vadd.f32 %v2266_v63, %v2265_v20  ;;  %v2301_v22 = vrot.slane %v2300_v33, 2  ;;  %v2305_v60 = vadd.f32 %v2255_v48, %v2247_v49  ;;  %v4504_v48 = vld [vmem:[%s4720_s2 + $0x480] sm:$0xff]  ;;  %v4536_v18 = vld [vmem:[%s4720_s2 + $0x4b0] sm:$0xff] }
 0x1f3   :  { %v2274_v11 = vadd.f32 %v2273_v47, %v2272_v38  ;;  %v2281_v27 = vadd.f32 %v2280_v36, %v2279_v37  ;;  %v2288_v62 = vadd.f32 %v2287_v45, %v2286_v21  ;;  %v2295_v53 = vadd.f32 %v2294_v29, %v2293_v51  ;;  %v4519_v38 = vld [vmem:[%s4720_s2 + $0x498] sm:$0xff]  ;;  %v4524_v37 = vld [vmem:[%s4720_s2 + $0x4a0] sm:$0xff]  ;;  %v4531_v51 = vld [vmem:[%s4720_s2 + $0x4a8] sm:$0xff] }
 0x1f4   :  { %v2261_v44 = vrot.slane %v2260_v50, 1  ;;  %v2268_v56 = vrot.slane %v2267_v0, 1  ;;  %v2302_v26 = vadd.f32 %v2301_v22, %v2300_v33  ;;  %v2306_v41 = vrot.slane %v2305_v60, 4  ;;  %v4541_v40 = vld [vmem:[%s4720_s2 + $0x4c0] sm:$0xff]  ;;  %v4554_v29 = vld [vmem:[%s4720_s2 + $0x4b8] sm:$0xff] }
 0x1f5   :  { %v2275_v24 = vrot.slane %v2274_v11, 1  ;;  %v2282_v7 = vrot.slane %v2281_v27, 1  ;;  %v2289_v46 = vrot.slane %v2288_v62, 1  ;;  %v2296_v32 = vrot.slane %v2295_v53, 1 }
 0x1f6   :  { %v2262_v23 = vadd.f32 %v2261_v44, %v2260_v50  ;;  %v2269_v35 = vadd.f32 %v2268_v56, %v2267_v0  ;;  %v2303_v1 = vrot.slane %v2302_v26, 1  ;;  %v2307_v39 = vadd.f32 %v2306_v41, %v2305_v60  ;;  %v4573_v50 = vld [vmem:[%s4720_s2 + $0x4d8] sm:$0xff]  ;;  %v4578_v0 = vld [vmem:[%s4720_s2 + $0x4e0] sm:$0xff] }
 0x1f7   :  { %v2276_v6 = vadd.f32 %v2275_v24, %v2274_v11  ;;  %v2283_v25 = vadd.f32 %v2282_v7, %v2281_v27  ;;  %v2290_v59 = vadd.f32 %v2289_v46, %v2288_v62  ;;  %v2297_v49 = vadd.f32 %v2296_v32, %v2295_v53  ;;  %v4591_v62 = vld [vmem:[%s4720_s2 + $0x4e8] sm:$0xff] }
 0x1f8   :  { %v2304_v34 = vadd.f32 %v2303_v1, %v2302_v26  ;;  %v2308_v31 = vrot.slane %v2307_v39, 2  ;;  %v2312_v20 = vadd.f32 %v2269_v35, %v2262_v23  ;;  %v2438_v21 = vmul.f32 %v4504_v48, %v3449_v2 }
 0x1f9   :  { %v2439_v63 = vmul.f32 %v4509_v19, %v4761_v30  ;;  %v2440_v2 = vmul.f32 %v4514_v43, %v3462_v10  ;;  %v2441_v33 = vmul.f32 %v4519_v38, %v3464_v58  ;;  %v2442_v47 = vmul.f32 %v4524_v37, %v3484_v12  ;;  %v4559_v30 = vld [vmem:[%s4720_s2 + $0x4c8] sm:$0xff]  ;;  %v4564_v10 = vld [vmem:[%s4720_s2 + $0x4d0] sm:$0xff] }
 0x1fa   :  { %v2309_v36 = vadd.f32 %v2308_v31, %v2307_v39  ;;  %v2313_v45 = vadd.f32 %v2312_v20, %v2276_v6  ;;  %v2443_v58 = vmul.f32 %v4531_v51, %v3486_v13  ;;  %v2444_v12 = vmul.f32 %v4536_v18, %v3538_v52 }
 0x1fb   :  { %v2445_v22 = vmul.f32 %v4554_v29, %v4762_v17  ;;  %v2446_v60 = vmul.f32 %v4541_v40, %v4763_v55  ;;  %v2447_v13 = vmul.f32 %v4559_v30, %v4764_v16  ;;  %v2448_v52 = vmul.f32 %v4564_v10, %v4765_v3  ;;  %v4596_v17 = vld [vmem:[%s4720_s2 + $0x4f0] sm:$0xff]  ;;  %v4601_v55 = vld [vmem:[%s4720_s2 + $0x4f8] sm:$0xff] }
 0x1fc   :  { %v2310_v11 = vrot.slane %v2309_v36, 1  ;;  %v2314_v27 = vadd.f32 %v2313_v45, %v2283_v25  ;;  %v2449_v16 = vmul.f32 %v4573_v50, %v4766_v42  ;;  %v2450_v3 = vmul.f32 %v4578_v0, %v4767_v57 }
 0x1fd   :  { %v2451_v53 = vmul.f32 %v4591_v62, %v4768_v61  ;;  %v2452_v44 = vmul.f32 %v4596_v17, %v3741_v54  ;;  %v2453_v56 = vmul.f32 %v4601_v55, %v4769_v28  ;;  %v2454_v26 = vadd.f32 %v2446_v60, %v2438_v21 }
 0x1fe   :  { %v2311_v41 = vadd.f32 %v2310_v11, %v2309_v36  ;;  %v2315_v24 = vadd.f32 %v2314_v27, %v2290_v59  ;;  %v2461_v7 = vadd.f32 %v2447_v13, %v2439_v63  ;;  %v2468_v46 = vadd.f32 %v2448_v52, %v2440_v2 }
 0x1ff   :  { %v2455_v32 = vrot.slane %v2454_v26, 4  ;;  %v2475_v23 = vadd.f32 %v2449_v16, %v2441_v33  ;;  %v2482_v42 = vadd.f32 %v2450_v3, %v2442_v47  ;;  %v2489_v35 = vadd.f32 %v2451_v53, %v2443_v58 }
 0x200   :  { %v2316_v1 = vadd.f32 %v2315_v24, %v2297_v49  ;;  %v2462_v57 = vrot.slane %v2461_v7, 4  ;;  %v2469_v39 = vrot.slane %v2468_v46, 4  ;;  %v2496_v6 = vadd.f32 %v2452_v44, %v2444_v12 }
 0x201   :  { %v2456_v61 = vadd.f32 %v2455_v32, %v2454_v26  ;;  %v2476_v25 = vrot.slane %v2475_v23, 4  ;;  %v2483_v31 = vrot.slane %v2482_v42, 4  ;;  %v2490_v54 = vrot.slane %v2489_v35, 4 }
 0x202   :  { %v2317_v20 = vadd.f32 %v2316_v1, %v2304_v34  ;;  %v2463_v45 = vadd.f32 %v2462_v57, %v2461_v7  ;;  %v2470_v28 = vadd.f32 %v2469_v39, %v2468_v46  ;;  %v2497_v21 = vrot.slane %v2496_v6, 4 }
 0x203   :  { %v2457_v36 = vrot.slane %v2456_v61, 2  ;;  %v2477_v59 = vadd.f32 %v2476_v25, %v2475_v23  ;;  %v2484_v63 = vadd.f32 %v2483_v31, %v2482_v42  ;;  %v2491_v2 = vadd.f32 %v2490_v54, %v2489_v35 }
 0x204   :  { %v2318_v60 = vadd.f32 %v2317_v20, %v2311_v41  ;;  %v2464_v33 = vrot.slane %v2463_v45, 2  ;;  %v2471_v47 = vrot.slane %v2470_v28, 2  ;;  %v2498_v58 = vadd.f32 %v2497_v21, %v2496_v6 }
 0x205   :  { %v2458_v49 = vadd.f32 %v2457_v36, %v2456_v61  ;;  %v2478_v13 = vrot.slane %v2477_v59, 2  ;;  %v2485_v52 = vrot.slane %v2484_v63, 2  ;;  %v2492_v12 = vrot.slane %v2491_v2, 2 }
 0x206   :  { %2319 = vadd.xlane.f32.xlu0 %v2318_v60  ;;  %v2465_v11 = vadd.f32 %v2464_v33, %v2463_v45  ;;  %v2472_v27 = vadd.f32 %v2471_v47, %v2470_v28  ;;  %v2499_v16 = vrot.slane %v2498_v58, 2  ;;  %v2503_v34 = vadd.f32 %v2453_v56, %v2445_v22  ;;  %v4771_v60 = vld [vmem:[#allocation10_spill] sm:$0xff]  ;;  %v4776_v47 = vld [vmem:[#allocation11_spill] sm:$0xff] }
 0x207   :  { %v2459_v3 = vrot.slane %v2458_v49, 1  ;;  %v2479_v53 = vadd.f32 %v2478_v13, %v2477_v59  ;;  %v2486_v44 = vadd.f32 %v2485_v52, %v2484_v63  ;;  %v2493_v26 = vadd.f32 %v2492_v12, %v2491_v2  ;;  %v4779_v13 = vld [vmem:[#allocation14_spill] sm:$0xff] }
 0x208   :  { %v2466_v24 = vrot.slane %v2465_v11, 1  ;;  %v2473_v7 = vrot.slane %v2472_v27, 1  ;;  %v2500_v46 = vadd.f32 %v2499_v16, %v2498_v58  ;;  %v2504_v41 = vrot.slane %v2503_v34, 4  ;;  %v4777_v58 = vld [vmem:[#allocation12_spill] sm:$0xff] }
 0x209   :  { %v2460_v32 = vadd.f32 %v2459_v3, %v2458_v49  ;;  %v2480_v23 = vrot.slane %v2479_v53, 1  ;;  %v2487_v42 = vrot.slane %v2486_v44, 1  ;;  %v2494_v35 = vrot.slane %v2493_v26, 1  ;;  %v4778_v49 = vld [vmem:[#allocation13_spill] sm:$0xff] }
 0x20a   :  { %v2467_v1 = vadd.f32 %v2466_v24, %v2465_v11  ;;  %v2474_v57 = vadd.f32 %v2473_v7, %v2472_v27  ;;  %v2501_v39 = vrot.slane %v2500_v46, 1  ;;  %v2505_v6 = vadd.f32 %v2504_v41, %v2503_v34 }
 0x20b   :  { %v2481_v61 = vadd.f32 %v2480_v23, %v2479_v53  ;;  %v2488_v25 = vadd.f32 %v2487_v42, %v2486_v44  ;;  %v2495_v31 = vadd.f32 %v2494_v35, %v2493_v26  ;;  %v1187_v22 = vmul.f32 %v4504_v48, %v3241_v4  ;;  %v4770_v48 = vld [vmem:[#allocation9_spill] sm:$0xff] }
 0x20c   :  { %v2502_v56 = vadd.f32 %v2501_v39, %v2500_v46  ;;  %v2506_v54 = vrot.slane %v2505_v6, 2  ;;  %v2510_v20 = vadd.f32 %v2467_v1, %v2460_v32  ;;  %v1188_v45 = vmul.f32 %v4509_v19, %v3243_v5  ;;  %v4772_v19 = vld [vmem:[#allocation5_spill] sm:$0xff] }
 0x20d   :  { %v1189_v28 = vmul.f32 %v4514_v43, %v3263_v14  ;;  %v1190_v21 = vmul.f32 %v4519_v38, %v3265_v15  ;;  %v1191_v36 = vmul.f32 %v4524_v37, %v3359_v8  ;;  %v1192_v59 = vmul.f32 %v4531_v51, %v3361_v9  ;;  %v4773_v43 = vld [vmem:[#allocation6_spill] sm:$0xff]  ;;  %v4774_v38 = vld [vmem:[#allocation7_spill] sm:$0xff]  ;;  %v4775_v37 = vld [vmem:[#allocation8_spill] sm:$0xff] }
 0x20e   :  { %v2507_v63 = vadd.f32 %v2506_v54, %v2505_v6  ;;  %v2511_v4 = vadd.f32 %v2510_v20, %v2474_v57  ;;  %v1193_v2 = vmul.f32 %v4536_v18, %v4770_v48  ;;  %v1194_v5 = vmul.f32 %v4554_v29, %v4771_v60 }
 0x20f   :  { %v1195_v14 = vmul.f32 %v4541_v40, %v4772_v19  ;;  %v1196_v15 = vmul.f32 %v4559_v30, %v4773_v43  ;;  %v1197_v8 = vmul.f32 %v4564_v10, %v4774_v38  ;;  %v1198_v9 = vmul.f32 %v4573_v50, %v4775_v37 }
 0x210   :  { %v2508_v51 = vrot.slane %v2507_v63, 1  ;;  %v2512_v33 = vadd.f32 %v2511_v4, %v2481_v61  ;;  %v1199_v18 = vmul.f32 %v4578_v0, %v4776_v47  ;;  %v1200_v29 = vmul.f32 %v4591_v62, %v4777_v58 }
 0x211   :  { %v1201_v40 = vmul.f32 %v4596_v17, %v4778_v49  ;;  %v1202_v30 = vmul.f32 %v4601_v55, %v4779_v13  ;;  %v1203_v52 = vadd.f32 %v1195_v14, %v1187_v22  ;;  %v1210_v12 = vadd.f32 %v1196_v15, %v1188_v45 }
 0x212   :  { %v2509_v10 = vadd.f32 %v2508_v51, %v2507_v63  ;;  %v2513_v11 = vadd.f32 %v2512_v33, %v2488_v25  ;;  %v1217_v27 = vadd.f32 %v1197_v8, %v1189_v28  ;;  %v1224_v50 = vadd.f32 %v1198_v9, %v1190_v21 }
 0x213   :  { %v1204_v16 = vrot.slane %v1203_v52, 4  ;;  %v1211_v34 = vrot.slane %v1210_v12, 4  ;;  %v1231_v3 = vadd.f32 %v1199_v18, %v1191_v36  ;;  %v1238_v53 = vadd.f32 %v1200_v29, %v1192_v59 }
 0x214   :  { %v2514_v0 = vadd.f32 %v2513_v11, %v2495_v31  ;;  %v1218_v44 = vrot.slane %v1217_v27, 4  ;;  %v1225_v26 = vrot.slane %v1224_v50, 4  ;;  %v1245_v62 = vadd.f32 %v1201_v40, %v1193_v2 }
 0x215   :  { %v1205_v24 = vadd.f32 %v1204_v16, %v1203_v52  ;;  %v1212_v7 = vadd.f32 %v1211_v34, %v1210_v12  ;;  %v1232_v17 = vrot.slane %v1231_v3, 4  ;;  %v1239_v46 = vrot.slane %v1238_v53, 4  ;;  %v560_v16 = vpop.xlane.xlu2 %559 }
 0x216   :  { %v2515_v41 = vadd.f32 %v2514_v0, %v2502_v56  ;;  %v1219_v55 = vadd.f32 %v1218_v44, %v1217_v27  ;;  %v1226_v32 = vadd.f32 %v1225_v26, %v1224_v50  ;;  %v1246_v23 = vrot.slane %v1245_v62, 4  ;;  %v459_v27 = vpop.xlane.xlu1 %458  ;;  %v358_v50 = vpop.xlane.xlu0 %357 }
 0x217   :  { %v1206_v42 = vrot.slane %v1205_v24, 2  ;;  %v1213_v35 = vrot.slane %v1212_v7, 2  ;;  %v1233_v1 = vadd.f32 %v1232_v17, %v1231_v3  ;;  %v1240_v57 = vadd.f32 %v1239_v46, %v1238_v53  ;;  %v1530_v46 = vld [vmem:[%s4721_s3] sm:$0x1] }
 0x218   :  { %v2516_v39 = vadd.f32 %v2515_v41, %v2509_v10  ;;  %v1220_v6 = vrot.slane %v1219_v55, 2  ;;  %v1227_v61 = vrot.slane %v1226_v32, 2  ;;  %v1247_v25 = vadd.f32 %v1246_v23, %v1245_v62 }
 0x219   :  { %v1207_v31 = vadd.f32 %v1206_v42, %v1205_v24  ;;  %v1214_v22 = vadd.f32 %v1213_v35, %v1212_v7  ;;  %v1234_v54 = vrot.slane %v1233_v1, 2  ;;  %v1241_v20 = vrot.slane %v1240_v57, 2 }
 0x21a   :  { %2517 = vadd.xlane.f32.xlu1 %v2516_v39  ;;  %v1221_v45 = vadd.f32 %v1220_v6, %v1219_v55  ;;  %v1228_v28 = vadd.f32 %v1227_v61, %v1226_v32  ;;  %v1248_v21 = vrot.slane %v1247_v25, 2  ;;  %v1252_v56 = vadd.f32 %v1202_v30, %v1194_v5 }
 0x21b   :  { %v1208_v36 = vrot.slane %v1207_v31, 1  ;;  %v1215_v59 = vrot.slane %v1214_v22, 1  ;;  %v1235_v63 = vadd.f32 %v1234_v54, %v1233_v1  ;;  %v1242_v2 = vadd.f32 %v1241_v20, %v1240_v57  ;;  %v261_v20 = vld [vmem:[%s4721_s3] sm:$0x1]  ;;  %s2949_s3 = smov [#allocation2]  }
 0x21c   :  { %v1222_v4 = vrot.slane %v1221_v45, 1  ;;  %v1229_v48 = vrot.slane %v1228_v28, 1  ;;  %v1253_v60 = vrot.slane %v1252_v56, 4  ;;  %v1249_v15 = vadd.f32 %v1248_v21, %v1247_v25  ;;  %s2551_s9 = sshll.u32 %s2949_s3, 4  ;;  %s2552_s9 = int_to_ptr.vmem [resolvable:$true] %s2551_s9 }
 0x21d   :  { %v1209_v19 = vadd.f32 %v1208_v36, %v1207_v31  ;;  %v1216_v14 = vadd.f32 %v1215_v59, %v1214_v22  ;;  %v1236_v43 = vrot.slane %v1235_v63, 1  ;;  %v1243_v9 = vrot.slane %v1242_v2, 1  ;;  %v762_v53 = vpop.xlane.xlu2 %761 }
 0x21e   :  { %v1223_v38 = vadd.f32 %v1222_v4, %v1221_v45  ;;  %v1254_v8 = vadd.f32 %v1253_v60, %v1252_v56  ;;  %v1230_v33 = vadd.f32 %v1229_v48, %v1228_v28  ;;  %v1250_v18 = vrot.slane %v1249_v15, 1  ;;  %v4645_v34 = vpop.xlane.xlu1 %862  ;;  %v661_v3 = vpop.xlane.xlu0 %660 }
 0x21f   :  { %v1259_v37 = vadd.f32 %v1216_v14, %v1209_v19  ;;  %v1237_v47 = vadd.f32 %v1236_v43, %v1235_v63  ;;  %v1244_v49 = vadd.f32 %v1243_v9, %v1242_v2  ;;  %v20_v26 = vlaneseq }
 0x220   :  { %v1255_v51 = vrot.slane %v1254_v8, 2  ;;  %v1251_v40 = vadd.f32 %v1250_v18, %v1249_v15 }
 0x221   :  { %v1260_v5 = vadd.f32 %v1259_v37, %v1223_v38  ;;  %v4649_v62 = vand.u32 127, %v20_v26 }
 0x222   :  { %v1256_v58 = vadd.f32 %v1255_v51, %v1254_v8 }
 0x223   :  { %v1261_v29 = vadd.f32 %v1260_v5, %v1230_v33  ;;  %vm359_vm1 = vcmp.eq.s32.totalorder %v4649_v62, 0  ;;  %vm460_vm2 = vcmp.eq.s32.totalorder %v4649_v62, 1  ;;  %vm561_vm3 = vcmp.eq.s32.totalorder %v4649_v62, 2 }
 0x224   :  { %v1257_v13 = vrot.slane %v1256_v58, 1  ;;  %vm662_vm4 = vcmp.eq.s32.totalorder %v4649_v62, 3  ;;  %vm763_vm5 = vcmp.eq.s32.totalorder %v4649_v62, 4  ;;  %v360_v45 = vsel %vm359_vm1, %v358_v50, 0.0 }
 0x225   :  { %v1262_v30 = vadd.f32 %v1261_v29, %v1237_v47  ;;  %v1065_v17 = vpop.xlane.xlu2 %1064  ;;  %vm864_vm6 = vcmp.eq.s32.totalorder %v4649_v62, 5  ;;  %vm965_vm7 = vcmp.eq.s32.totalorder %v4649_v62, 6  ;;  %v361_v36 = vadd.f32 %v360_v45, %v261_v20 }
 0x226   :  { %v1258_v12 = vadd.f32 %v1257_v13, %v1256_v58  ;;  %v4647_v0 = vpop.xlane.xlu1 %1165  ;;  %v964_v44 = vpop.xlane.xlu0 %963  ;;  %v461_v4 = vsel %vm460_vm2, %v459_v27, 0.0  ;;  %vm1066_vm8 = vcmp.eq.s32.totalorder %v4649_v62, 7  ;;  %v562_v14 = vsel %vm561_vm3, %v560_v16, 0.0 }
 0x227   :  { %v1263_v52 = vadd.f32 %v1262_v30, %v1244_v49  ;;  %v462_v48 = vadd.f32 %v461_v4, %v361_v36  ;;  %v663_v43 = vsel %vm662_vm4, %v661_v3, 0.0  ;;  %vm1167_vm9 = vcmp.eq.s32.totalorder %v4649_v62, 8 }
 0x228   :  { %vm1268_vm10 = vcmp.eq.s32.totalorder %v4649_v62, 9  ;;  %v764_v47 = vsel %vm763_vm5, %v762_v53, 0.0  ;;  %v865_v58 = vsel %vm864_vm6, %v4645_v34, 0.0  ;;  %v966_v29 = vsel %vm965_vm7, %v964_v44, 0.0 }
 0x229   :  { %v1264_v10 = vadd.f32 %v1263_v52, %v1251_v40  ;;  %v563_v15 = vadd.f32 %v562_v14, %v462_v48  ;;  %v1067_v13 = vsel %vm1066_vm8, %v1065_v17, 0.0  ;;  %v1168_v52 = vsel %vm1167_vm9, %v4647_v0, 0.0 }
 0x22b   :  { %v1265_v11 = vadd.f32 %v1264_v10, %v1258_v12  ;;  %v664_v9 = vadd.f32 %v663_v43, %v563_v15 }
 0x22d   :  { %1266 = vadd.xlane.f32.xlu0 %v1265_v11  ;;  %v1825_v23 = vpop.xlane.xlu2 %1824  ;;  %v765_v5 = vadd.f32 %v764_v47, %v664_v9 }
 0x22e   :  { %v1726_v24 = vpop.xlane.xlu1 %1725  ;;  %v1627_v7 = vpop.xlane.xlu0 %1626  ;;  %v1826_v1 = vsel %vm561_vm3, %v1825_v23, 0.0 }
 0x22f   :  { %v1628_v41 = vsel %vm359_vm1, %v1627_v7, 0.0  ;;  %v1727_v32 = vsel %vm460_vm2, %v1726_v24, 0.0  ;;  %v866_v49 = vadd.f32 %v865_v58, %v765_v5 }
 0x230   :  { %v1629_v55 = vadd.f32 %v1628_v41, %v1530_v46 }
 0x231   :  { %v967_v40 = vadd.f32 %v966_v29, %v866_v49 }
 0x232   :  { %v1728_v42 = vadd.f32 %v1727_v32, %v1629_v55 }
 0x233   :  { %v1068_v30 = vadd.f32 %v1067_v13, %v967_v40 }
 0x234   :  { %v1827_v39 = vadd.f32 %v1826_v1, %v1728_v42 }
 0x235   :  { %v2122_v31 = vpop.xlane.xlu2 %2121  ;;  %v1169_v12 = vadd.f32 %v1168_v52, %v1068_v30 }
 0x236   :  { %v1924_v35 = vpop.xlane.xlu1 %1923  ;;  %v2123_v28 = vsel %vm864_vm6, %v2122_v31, 0.0 }
 0x237   :  { %v1925_v57 = vsel %vm662_vm4, %v1924_v35, 0.0 }
 0x238   :  { %v1926_v6 = vadd.f32 %v1925_v57, %v1827_v39 }
 0x23e   :  { %v2023_v61 = vpop.xlane.xlu0 %2022 }
 0x23f   :  { %v2024_v25 = vsel %vm763_vm5, %v2023_v61, 0.0 }
 0x240   :  { %v2025_v22 = vadd.f32 %v2024_v25, %v1926_v6 }
 0x242   :  { %v2124_v56 = vadd.f32 %v2123_v28, %v2025_v22 }
 0x251   :  { %v2419_v60 = vpop.xlane.xlu2 %2418 }
 0x252   :  { %v2420_v38 = vsel %vm1167_vm9, %v2419_v60, 0.0 }
 0x265   :  { %v2221_v54 = vpop.xlane.xlu1 %2220 }
 0x266   :  { %v2222_v21 = vsel %vm965_vm7, %v2221_v54, 0.0 }
 0x267   :  { %v2223_v59 = vadd.f32 %v2222_v21, %v2124_v56 }
 0x279   :  { %v2320_v63 = vpop.xlane.xlu0 %2319 }
 0x27a   :  { %v2321_v2 = vsel %vm1066_vm8, %v2320_v63, 0.0 }
 0x27b   :  { %v2322_v19 = vadd.f32 %v2321_v2, %v2223_v59 }
 0x27d   :  { %v2421_v37 = vadd.f32 %v2420_v38, %v2322_v19 }
 0x28d   :  { %v2518_v8 = vpop.xlane.xlu1 %2517 }
 0x28e   :  { %v2519_v51 = vsel %vm1268_vm10, %v2518_v8, 0.0 }
 0x28f   :  { %v2520_v33 = vadd.f32 %v2519_v51, %v2421_v37 }
 0x291   :  { %v2521_v18 = vsel %vm1271_vm11, %v2520_v33, -inf }
 0x292   :  { %2522 = vmax.xlane.f32.xlu0 %v2521_v18 }
 0x2a0   :  { %v1267_v10 = vpop.xlane.xlu0 %1266 }
 0x2a1   :  { %v1269_v11 = vsel %vm1268_vm10, %v1267_v10, 0.0 }
 0x2a2   :  { %v1270_v27 = vadd.f32 %v1269_v11, %v1169_v12 }
 0x2a4   :  { %v1272_v50 = vsel %vm1271_vm11, %v1270_v27, -inf }
 0x2a5   :  { %1273 = vmax.xlane.f32.xlu2 %v1272_v50 }
 0x305   :  { %v2523_v16 = vpop.xlane.xlu0 %2522 }
 0x306   :  { %v2524_v34 = vsub.f32 %v2520_v33, %v2523_v16 }
 0x308   :  { %v2525_v3 = vmul.f32 1.442695, %v2524_v34 }
 0x30a   :  { %2915 = vpow2.f32 %v2525_v3 }
 0x310   :  { %v2916_v53 = vpop.eup %2915 }
 0x311   :  { %v2527_v44 = vsel %vm1271_vm11, %v2916_v53, 0.0 }
 0x312   :  { %2528 = vadd.xlane.f32.xlu2 %v2527_v44 }
 0x318   :  { %v1274_v26 = vpop.xlane.xlu2 %1273 }
 0x319   :  { %v1275_v24 = vsub.f32 %v1270_v27, %v1274_v26 }
 0x31b   :  { %v1276_v0 = vmul.f32 1.442695, %v1275_v24 }
 0x31d   :  { %2917 = vpow2.f32 %v1276_v0 }
 0x323   :  { %v2918_v7 = vpop.eup %2917 }
 0x324   :  { %v1278_v62 = vsel %vm1271_vm11, %v2918_v7, 0.0 }
 0x325   :  { %1279 = vadd.xlane.f32.xlu1 %v1278_v62 }
 0x385   :  { %v2529_v17 = vpop.xlane.xlu2 %2528 }
 0x386   :  { %2919 = vrcp.f32 %v2529_v17  ;;  %v2541_v23 = vand.u32 2147483648, %v2529_v17  ;;  %v2539_v42 = vand.u32 2147483647, %v2529_v17  ;;  %vm2535_vm13 = vweird.f32 %v2529_v17 }
 0x388   :  { %v2542_v57 = vor.u32 1.1754944e-38, %v2541_v23  ;;  %vm2540_vm15 = vcmp.eq.f32.partialorder %v2539_v42, 8.507059e+37 }
 0x38c   :  { %v2920_v46 = vpop.eup %2919 }
 0x38d   :  { %v2531_v41 = vmul.f32 %v2920_v46, %v2529_v17  ;;  %vm2536_vm12 = vweird.f32 %v2920_v46 }
 0x38e   :  { %vm2537_vm14 = vmor %vm2535_vm13, %vm2536_vm12 }
 0x38f   :  { %v2532_v55 = vsub.f32 1.0, %v2531_v41 }
 0x391   :  { %v2533_v32 = vmul.f32 %v2920_v46, %v2532_v55 }
 0x393   :  { %v2534_v35 = vadd.f32 %v2920_v46, %v2533_v32 }
 0x395   :  { %v2538_v39 = vsel %vm2537_vm14, %v2920_v46, %v2534_v35 }
 0x396   :  { %v2543_v6 = vsel %vm2540_vm15, %v2542_v57, %v2538_v39 }
 0x397   :  { %v2544_v61 = vmul.f32 %v2916_v53, %v2543_v6 }
 0x398   :  { %v1280_v1 = vpop.xlane.xlu1 %1279 }
 0x399   :  { %2921 = vrcp.f32 %v1280_v1  ;;  %2545 = vst.msk [vmem:[#allocation2 + $0x1] sm:$0x1] %vm1271_vm11, %v2544_v61  ;;  %v1292_v54 = vand.u32 2147483648, %v1280_v1  ;;  %v1290_v45 = vand.u32 2147483647, %v1280_v1  ;;  %vm1286_vm1 = vweird.f32 %v1280_v1 }
 0x39b   :  { %v1293_v21 = vor.u32 1.1754944e-38, %v1292_v54  ;;  %vm1291_vm3 = vcmp.eq.f32.partialorder %v1290_v45, 8.507059e+37 }
 0x39f   :  { %v2922_v25 = vpop.eup %2921 }
 0x3a0   :  { %v1282_v31 = vmul.f32 %v2922_v25, %v1280_v1  ;;  %vm1287_vm0 = vweird.f32 %v2922_v25 }
 0x3a1   :  { %vm1288_vm2 = vmor %vm1286_vm1, %vm1287_vm0 }
 0x3a2   :  { %v1283_v22 = vsub.f32 1.0, %v1282_v31 }
 0x3a4   :  { %v1284_v20 = vmul.f32 %v2922_v25, %v1283_v22 }
 0x3a6   :  { %v1285_v28 = vadd.f32 %v2922_v25, %v1284_v20 }
 0x3a8   :  { %v1289_v56 = vsel %vm1288_vm2, %v2922_v25, %v1285_v28 }
 0x3a9   :  { %v1294_v36 = vsel %vm1291_vm3, %v1293_v21, %v1289_v56 }
 0x3aa   :  { %v1295_v59 = vmul.f32 %v2918_v7, %v1294_v36 }
 0x3ac   :  { %1296 = vst.msk [vmem:[#allocation2] sm:$0x1] %vm1271_vm11, %v1295_v59 }
 0x3ad   :  { %2556 = dma.vmem_to_hbm [thread:$0]  %s2552_s9, 32, %s2554_s12, [#allocation3]  }
 0x3ae   :  { %2947 = dma.done.wait [#allocation3], 32  }
 0x3af   :  { %2948 = vsyncadd [#allocation3], 4294967264 }
 0x3b0   :  { %2561 = vsyncpa [#allocation3], 1 }

</bundles_post_ra>
